<compile_context>
chip_gen: v5e
topology: v5e:2x2
jax: 0.10.0
libtpu: 0.0.40
codegen_flags: <defaults>
</compile_context>

<pallas_src>
import jax
import jax.numpy as jnp
import numpy as np
from jax.experimental import pallas as pl
from jax.experimental.pallas import tpu as pltpu  # noqa: F401  (TPU backend assumed)


# ----------------------------------------------------------------------------
# In-kernel GRU cell (biases pre-folded: gi already holds b_ih, + b_hh for r,z)
# ----------------------------------------------------------------------------
def _gru_cell(gi, h, whhT, bhh_n, H):
    """gi: (B,3H) = x@W_ihT + b_ih (+ b_hh for r,z).  h: (B,H).  whhT: (H,3H).
    bhh_n: (B,H) pre-broadcast b_hh of the n gate."""
    gh = jnp.dot(h, whhT, preferred_element_type=jnp.float32)
    r = jax.nn.sigmoid(gi[:, 0:H] + gh[:, 0:H])
    z = jax.nn.sigmoid(gi[:, H:2 * H] + gh[:, H:2 * H])
    n = jnp.tanh(gi[:, 2 * H:3 * H] + r * (gh[:, 2 * H:3 * H] + bhh_n))
    return (1.0 - z) * n + z * h


# ----------------------------------------------------------------------------
# Pallas kernels
# ----------------------------------------------------------------------------
def gru_bidir_layer_kernel(gif_ref, gir_ref, whhf_ref, whhr_ref,
                           bnf_ref, bnr_ref, out_ref):
    """Whole-sequence bidirectional GRU layer in ONE kernel invocation.

    gif_ref/gir_ref : (T, B, 3H)   precomputed input-gate projections (fwd / rev)
    whhf_ref/whhr_ref : (H, 3H)    hidden->gate weights (pre-transposed)
    bnf_ref/bnr_ref : (1, H)       b_hh of the n gate
    out_ref : (2, T, B, H)         out[0] = forward hiddens, out[1] = reverse hiddens
    """
    T, B, _ = gif_ref.shape
    H = whhf_ref.shape[0]

    # Hoist weight loads and bias broadcasts out of the serial loop.
    whh_f = whhf_ref[...]
    whh_r = whhr_ref[...]
    bn_f = jnp.broadcast_to(bnf_ref[...], (B, H))
    bn_r = jnp.broadcast_to(bnr_ref[...], (B, H))
    h0 = jnp.zeros((B, H), jnp.float32)

    def body(t, carry):
        h_f, h_r = carry
        # forward direction, timestep t
        h_f = _gru_cell(gif_ref[t], h_f, whh_f, bn_f, H)
        out_ref[0, t] = h_f
        # reverse direction, timestep T-1-t (independent chain -> overlaps with fwd)
        tr = T - 1 - t
        h_r = _gru_cell(gir_ref[tr], h_r, whh_r, bn_r, H)
        out_ref[1, tr] = h_r
        return (h_f, h_r)

    jax.lax.fori_loop(0, T, body, (h0, h0), unroll=True)


def gru_top_layer_head_kernel(gif_ref, gir_last_ref, whhf_ref, whhr_ref,
                              bnf_ref, bnr_ref, fcw_ref, fcb_ref,
                              logits_ref, hid_ref):
    """Top GRU layer fused with the classifier head.

    Only output[:, -1, :] is consumed downstream, so the forward direction runs the
    full T-step recurrence (carry only, no per-step output writes) and the reverse
    direction runs exactly ONE step (its first step, at t = T-1).

    gif_ref : (T, B, 3H)   forward input-gate projections
    gir_last_ref : (B, 3H) reverse input-gate projection at t = T-1
    fcw_ref : (2H, C), fcb_ref : (1, C)
    logits_ref : (B, C)
    hid_ref : (2, B, H)    tanh'd last-step features (fwd, rev); concat in wrapper
    """
    T, B, _ = gif_ref.shape
    H = whhf_ref.shape[0]

    whh_f = whhf_ref[...]
    bn_f = jnp.broadcast_to(bnf_ref[...], (B, H))
    bn_r = jnp.broadcast_to(bnr_ref[...], (B, H))
    h0 = jnp.zeros((B, H), jnp.float32)

    h_fwd = jax.lax.fori_loop(
        0, T, lambda t, h: _gru_cell(gif_ref[t], h, whh_f, bn_f, H), h0, unroll=True)
    h_rev = _gru_cell(gir_last_ref[...], h0, whhr_ref[...], bn_r, H)

    hf = jnp.tanh(h_fwd)
    hr = jnp.tanh(h_rev)
    hid_ref[0] = hf
    hid_ref[1] = hr
    # fc on concat(fwd, rev) done as two half matmuls -> no in-kernel lane concat needed.
    logits_ref[...] = (
        jnp.dot(hf, fcw_ref[0:H, :], preferred_element_type=jnp.float32)
        + jnp.dot(hr, fcw_ref[H:2 * H, :], preferred_element_type=jnp.float32)
        + fcb_ref[...]
    )


# ----------------------------------------------------------------------------
# pallas_call wrappers (grid=(), whole arrays resident in VMEM)
# ----------------------------------------------------------------------------
def gru_bidir_layer(gi_f, gi_r, whhT_f, whhT_r, bn_f, bn_r):
    T, B, _ = gi_f.shape
    H = whhT_f.shape[0]
    # TODO(synk): at production T*B sizes, tile T (emit_pipeline / Buffered specs) and
    # raise vmem_limit_bytes; at these shapes everything fits trivially in VMEM.
    return pl.pallas_call(
        gru_bidir_layer_kernel,
        out_shape=jax.ShapeDtypeStruct((2, T, B, H), jnp.float32),
    )(gi_f, gi_r, whhT_f, whhT_r, bn_f, bn_r)


def gru_top_layer_with_head(gi_f, gi_r_last, whhT_f, whhT_r, bn_f, bn_r, fc_wT, fc_b):
    T, B, _ = gi_f.shape
    H = whhT_f.shape[0]
    C = fc_wT.shape[1]
    return pl.pallas_call(
        gru_top_layer_head_kernel,
        out_shape=(
            jax.ShapeDtypeStruct((B, C), jnp.float32),
            jax.ShapeDtypeStruct((2, B, H), jnp.float32),
        ),
    )(gi_f, gi_r_last, whhT_f, whhT_r, bn_f, bn_r, fc_wT, fc_b)


# ----------------------------------------------------------------------------
# Forward pass (matches TextRNN_GRU.forward in eval mode)
# ----------------------------------------------------------------------------
def textrnn_gru_forward(x, params):
    """x: (B, T, H) batch_first, like the PyTorch module. Returns (logits, hidden_state)."""
    B, T, H = x.shape
    xt = jnp.transpose(x.astype(jnp.float32), (1, 0, 2))  # seq-major (T, B, H)
    # TODO(synk): input / inter-layer / classifier dropout (p=0.1) is identity in eval mode.

    # ---- layer 0 (bidirectional, full sequence) ----
    pf, pr = params["l0_d0"], params["l0_d1"]
    gi_f = jnp.einsum("tbd,dg->tbg", xt, pf["wihT"]) + pf["bi_fold"]   # one big matmul
    gi_r = jnp.einsum("tbd,dg->tbg", xt, pr["wihT"]) + pr["bi_fold"]
    out0 = gru_bidir_layer(gi_f, gi_r, pf["whhT"], pr["whhT"],
                           pf["bhh_n"], pr["bhh_n"])                    # (2, T, B, H)
    x1 = jnp.concatenate([out0[0], out0[1]], axis=-1)                   # (T, B, 2H)

    # ---- layer 1 (top) + tanh + fc head ----
    pf, pr = params["l1_d0"], params["l1_d1"]
    gi_f = jnp.einsum("tbd,dg->tbg", x1, pf["wihT"]) + pf["bi_fold"]
    gi_r_last = x1[T - 1] @ pr["wihT"] + pr["bi_fold"]                  # (B, 3H), t=T-1 only
    logits, hid = gru_top_layer_with_head(
        gi_f, gi_r_last, pf["whhT"], pr["whhT"], pf["bhh_n"], pr["bhh_n"],
        params["fc_wT"], params["fc_b"])
    hidden_state = jnp.concatenate([hid[0], hid[1]], axis=-1)           # (B, 2H)
    return logits, hidden_state


# ----------------------------------------------------------------------------
# Deterministic parameter init (same shapes as nn.GRU / nn.Linear in __init__)
# ----------------------------------------------------------------------------
def init_params(key, H):
    k = 1.0 / np.sqrt(H)
    num_classes = 2
    params = {}
    keys = jax.random.split(key, 2 * 2 * 4 + 2)
    idx = 0
    for layer in range(2):
        Din = H if layer == 0 else 2 * H
        for d in range(2):
            wih = jax.random.uniform(keys[idx], (3 * H, Din), jnp.float32, -k, k); idx += 1
            whh = jax.random.uniform(keys[idx], (3 * H, H), jnp.float32, -k, k); idx += 1
            bih = jax.random.uniform(keys[idx], (3 * H,), jnp.float32, -k, k); idx += 1
            bhh = jax.random.uniform(keys[idx], (3 * H,), jnp.float32, -k, k); idx += 1
            bi_fold = bih.at[:2 * H].add(bhh[:2 * H])   # pre-sum r/z biases
            params[f"l{layer}_d{d}"] = dict(
                wihT=wih.T, whhT=whh.T,
                bih=bih.reshape(1, -1), bhh=bhh.reshape(1, -1),      # raw (for reference)
                bi_fold=bi_fold.reshape(1, -1),                       # folded (for kernel)
                bhh_n=bhh[2 * H:].reshape(1, -1),
            )
    kfc = 1.0 / np.sqrt(2 * H)
    fc_w = jax.random.uniform(keys[idx], (num_classes, 2 * H), jnp.float32, -kfc, kfc); idx += 1
    fc_b = jax.random.uniform(keys[idx], (num_classes,), jnp.float32, -kfc, kfc)
    params["fc_wT"] = fc_w.T
    params["fc_b"] = fc_b.reshape(1, -1)
    return params


# ----------------------------------------------------------------------------
# Pure-JAX reference (lax.scan, unfolded biases) for correctness checking
# ----------------------------------------------------------------------------
def _gru_direction_ref(x_tbd, p, reverse):
    T, B, _ = x_tbd.shape
    H = p["whhT"].shape[0]
    xs = x_tbd[::-1] if reverse else x_tbd

    def step(h, x):
        gi = x @ p["wihT"] + p["bih"]
        gh = h @ p["whhT"] + p["bhh"]
        r = jax.nn.sigmoid(gi[:, :H] + gh[:, :H])
        z = jax.nn.sigmoid(gi[:, H:2 * H] + gh[:, H:2 * H])
        n = jnp.tanh(gi[:, 2 * H:] + r * gh[:, 2 * H:])
        h_new = (1.0 - z) * n + z * h
        return h_new, h_new

    _, out = jax.lax.scan(step, jnp.zeros((B, H), jnp.float32), xs)
    return out[::-1] if reverse else out


def _forward_ref(x, params):
    B, T, H = x.shape
    h_in = jnp.transpose(x.astype(jnp.float32), (1, 0, 2))
    for layer in range(2):
        outs = [
            _gru_direction_ref(h_in, params[f"l{layer}_d{d}"], rev)
            for d, rev in enumerate((False, True))
        ]
        h_in = jnp.concatenate(outs, axis=-1)
    last = jnp.tanh(h_in[T - 1])
    logits = last @ params["fc_wT"] + params["fc_b"]
    return logits, last


# ----------------------------------------------------------------------------
if __name__ == "__main__":
    H, B, T = 32, 2, 8
    key = jax.random.PRNGKey(0)
    kx, kp = jax.random.split(key)
    x = jax.random.normal(kx, (B, T, H), jnp.float32)   # (batch, seq, hidden)
    params = init_params(kp, H)

    fwd = jax.jit(textrnn_gru_forward)
    logits, hidden_state = jax.block_until_ready(fwd(x, params))
    assert logits.shape == (B, 2) and hidden_state.shape == (B, 2 * H)

    ref_logits, ref_hidden = _forward_ref(x, params)
    np.testing.assert_allclose(np.asarray(logits), np.asarray(ref_logits),
                               rtol=1e-4, atol=1e-5)
    np.testing.assert_allclose(np.asarray(hidden_state), np.asarray(ref_hidden),
                               rtol=1e-4, atol=1e-5)

    print("KERNEL_OK")
</pallas_src>

<mosaic_0001>
module attributes {stable_mosaic.version = 11 : i64} {
  func.func @gru_bidir_layer_kernel(%arg0: memref<8x2x96xf32, #tpu.memory_space<vmem>>, %arg1: memref<8x2x96xf32, #tpu.memory_space<vmem>>, %arg2: memref<32x96xf32, #tpu.memory_space<vmem>>, %arg3: memref<32x96xf32, #tpu.memory_space<vmem>>, %arg4: memref<1x32xf32, #tpu.memory_space<vmem>>, %arg5: memref<1x32xf32, #tpu.memory_space<vmem>>, %arg6: memref<2x8x2x32xf32, #tpu.memory_space<vmem>>) attributes {dimension_semantics = [], scalar_prefetch = 0 : i64, scratch_operands = 0 : i64, tpu.core_type = #tpu.core_type<tc>} {
    %c0 = arith.constant 0 : index
    %c0_0 = arith.constant 0 : index
    %0 = vector.load %arg2[%c0, %c0_0] : memref<32x96xf32, #tpu.memory_space<vmem>>, vector<32x96xf32>
    %c0_1 = arith.constant 0 : index
    %c0_2 = arith.constant 0 : index
    %1 = vector.load %arg3[%c0_1, %c0_2] : memref<32x96xf32, #tpu.memory_space<vmem>>, vector<32x96xf32>
    %c0_3 = arith.constant 0 : index
    %c0_4 = arith.constant 0 : index
    %2 = vector.load %arg4[%c0_3, %c0_4] : memref<1x32xf32, #tpu.memory_space<vmem>>, vector<1x32xf32>
    %3 = vector.shape_cast %2 : vector<1x32xf32> to vector<1x32xf32>
    %4 = vector.broadcast %3 : vector<1x32xf32> to vector<2x32xf32>
    %c0_5 = arith.constant 0 : index
    %c0_6 = arith.constant 0 : index
    %5 = vector.load %arg5[%c0_5, %c0_6] : memref<1x32xf32, #tpu.memory_space<vmem>>, vector<1x32xf32>
    %6 = vector.shape_cast %5 : vector<1x32xf32> to vector<1x32xf32>
    %7 = vector.broadcast %6 : vector<1x32xf32> to vector<2x32xf32>
    %cst = arith.constant 0.000000e+00 : f32
    %8 = vector.broadcast %cst : f32 to vector<2x32xf32>
    %c0_i32 = arith.constant 0 : i32
    %9 = arith.index_cast %c0_i32 : i32 to index
    %c0_7 = arith.constant 0 : index
    %c0_8 = arith.constant 0 : index
    %10 = vector.load %arg0[%9, %c0_7, %c0_8] : memref<8x2x96xf32, #tpu.memory_space<vmem>>, vector<1x2x96xf32>
    %11 = vector.shape_cast %10 : vector<1x2x96xf32> to vector<2x96xf32>
    %cst_9 = arith.constant dense<0.000000e+00> : vector<2x96xf32>
    %12 = tpu.matmul %8, %0, %cst_9 {dimension_numbers = #tpu.dot_dimension_numbers<[1], [0], [0], [1], [0, 0, 1, 1], [], []>} : vector<2x32xf32>, vector<32x96xf32>, vector<2x96xf32> -> vector<2x96xf32>
    %13 = vector.extract_strided_slice %11 {offsets = [0, 0], sizes = [2, 32], strides = [1, 1]} : vector<2x96xf32> to vector<2x32xf32>
    %14 = vector.extract_strided_slice %12 {offsets = [0, 0], sizes = [2, 32], strides = [1, 1]} : vector<2x96xf32> to vector<2x32xf32>
    %15 = arith.addf %13, %14 : vector<2x32xf32>
    %16 = arith.negf %15 : vector<2x32xf32>
    %17 = math.exp %16 : vector<2x32xf32>
    %cst_10 = arith.constant 1.000000e+00 : f32
    %18 = vector.broadcast %cst_10 : f32 to vector<2x32xf32>
    %19 = arith.addf %18, %17 : vector<2x32xf32>
    %20 = arith.divf %18, %19 : vector<2x32xf32>
    %21 = vector.extract_strided_slice %11 {offsets = [0, 32], sizes = [2, 32], strides = [1, 1]} : vector<2x96xf32> to vector<2x32xf32>
    %22 = vector.extract_strided_slice %12 {offsets = [0, 32], sizes = [2, 32], strides = [1, 1]} : vector<2x96xf32> to vector<2x32xf32>
    %23 = arith.addf %21, %22 : vector<2x32xf32>
    %24 = arith.negf %23 : vector<2x32xf32>
    %25 = math.exp %24 : vector<2x32xf32>
    %cst_11 = arith.constant 1.000000e+00 : f32
    %26 = vector.broadcast %cst_11 : f32 to vector<2x32xf32>
    %27 = arith.addf %26, %25 : vector<2x32xf32>
    %28 = arith.divf %26, %27 : vector<2x32xf32>
    %29 = vector.extract_strided_slice %11 {offsets = [0, 64], sizes = [2, 32], strides = [1, 1]} : vector<2x96xf32> to vector<2x32xf32>
    %30 = vector.extract_strided_slice %12 {offsets = [0, 64], sizes = [2, 32], strides = [1, 1]} : vector<2x96xf32> to vector<2x32xf32>
    %31 = arith.addf %30, %4 : vector<2x32xf32>
    %32 = arith.mulf %20, %31 : vector<2x32xf32>
    %33 = arith.addf %29, %32 : vector<2x32xf32>
    %34 = math.tanh %33 : vector<2x32xf32>
    %cst_12 = arith.constant 1.000000e+00 : f32
    %35 = vector.broadcast %cst_12 : f32 to vector<2x32xf32>
    %36 = arith.subf %35, %28 : vector<2x32xf32>
    %37 = arith.mulf %36, %34 : vector<2x32xf32>
    %38 = arith.mulf %28, %8 : vector<2x32xf32>
    %39 = arith.addf %37, %38 : vector<2x32xf32>
    %c0_13 = arith.constant 0 : index
    %40 = arith.index_cast %c0_i32 : i32 to index
    %c0_14 = arith.constant 0 : index
    %c0_15 = arith.constant 0 : index
    %41 = vector.load %arg6[%c0_13, %40, %c0_14, %c0_15] : memref<2x8x2x32xf32, #tpu.memory_space<vmem>>, vector<1x1x2x32xf32>
    %42 = vector.shape_cast %41 : vector<1x1x2x32xf32> to vector<2x32xf32>
    %43 = vector.shape_cast %39 : vector<2x32xf32> to vector<1x1x2x32xf32>
    tpu.vector_store %arg6[%c0_13, %40, %c0_14, %c0_15], %43 {strides = array<i32>} : memref<2x8x2x32xf32, #tpu.memory_space<vmem>>, vector<1x1x2x32xf32>,
    %c7_i32 = arith.constant 7 : i32
    %44 = arith.subi %c7_i32, %c0_i32 : i32
    %45 = arith.index_cast %44 : i32 to index
    %c0_16 = arith.constant 0 : index
    %c0_17 = arith.constant 0 : index
    %46 = vector.load %arg1[%45, %c0_16, %c0_17] : memref<8x2x96xf32, #tpu.memory_space<vmem>>, vector<1x2x96xf32>
    %47 = vector.shape_cast %46 : vector<1x2x96xf32> to vector<2x96xf32>
    %cst_18 = arith.constant dense<0.000000e+00> : vector<2x96xf32>
    %48 = tpu.matmul %8, %1, %cst_18 {dimension_numbers = #tpu.dot_dimension_numbers<[1], [0], [0], [1], [0, 0, 1, 1], [], []>} : vector<2x32xf32>, vector<32x96xf32>, vector<2x96xf32> -> vector<2x96xf32>
    %49 = vector.extract_strided_slice %47 {offsets = [0, 0], sizes = [2, 32], strides = [1, 1]} : vector<2x96xf32> to vector<2x32xf32>
    %50 = vector.extract_strided_slice %48 {offsets = [0, 0], sizes = [2, 32], strides = [1, 1]} : vector<2x96xf32> to vector<2x32xf32>
    %51 = arith.addf %49, %50 : vector<2x32xf32>
    %52 = arith.negf %51 : vector<2x32xf32>
    %53 = math.exp %52 : vector<2x32xf32>
    %cst_19 = arith.constant 1.000000e+00 : f32
    %54 = vector.broadcast %cst_19 : f32 to vector<2x32xf32>
    %55 = arith.addf %54, %53 : vector<2x32xf32>
    %56 = arith.divf %54, %55 : vector<2x32xf32>
    %57 = vector.extract_strided_slice %47 {offsets = [0, 32], sizes = [2, 32], strides = [1, 1]} : vector<2x96xf32> to vector<2x32xf32>
    %58 = vector.extract_strided_slice %48 {offsets = [0, 32], sizes = [2, 32], strides = [1, 1]} : vector<2x96xf32> to vector<2x32xf32>
    %59 = arith.addf %57, %58 : vector<2x32xf32>
    %60 = arith.negf %59 : vector<2x32xf32>
    %61 = math.exp %60 : vector<2x32xf32>
    %cst_20 = arith.constant 1.000000e+00 : f32
    %62 = vector.broadcast %cst_20 : f32 to vector<2x32xf32>
    %63 = arith.addf %62, %61 : vector<2x32xf32>
    %64 = arith.divf %62, %63 : vector<2x32xf32>
    %65 = vector.extract_strided_slice %47 {offsets = [0, 64], sizes = [2, 32], strides = [1, 1]} : vector<2x96xf32> to vector<2x32xf32>
    %66 = vector.extract_strided_slice %48 {offsets = [0, 64], sizes = [2, 32], strides = [1, 1]} : vector<2x96xf32> to vector<2x32xf32>
    %67 = arith.addf %66, %7 : vector<2x32xf32>
    %68 = arith.mulf %56, %67 : vector<2x32xf32>
    %69 = arith.addf %65, %68 : vector<2x32xf32>
    %70 = math.tanh %69 : vector<2x32xf32>
    %cst_21 = arith.constant 1.000000e+00 : f32
    %71 = vector.broadcast %cst_21 : f32 to vector<2x32xf32>
    %72 = arith.subf %71, %64 : vector<2x32xf32>
    %73 = arith.mulf %72, %70 : vector<2x32xf32>
    %74 = arith.mulf %64, %8 : vector<2x32xf32>
    %75 = arith.addf %73, %74 : vector<2x32xf32>
    %c1 = arith.constant 1 : index
    %76 = arith.index_cast %44 : i32 to index
    %c0_22 = arith.constant 0 : index
    %c0_23 = arith.constant 0 : index
    %77 = vector.load %arg6[%c1, %76, %c0_22, %c0_23] : memref<2x8x2x32xf32, #tpu.memory_space<vmem>>, vector<1x1x2x32xf32>
    %78 = vector.shape_cast %77 : vector<1x1x2x32xf32> to vector<2x32xf32>
    %79 = vector.shape_cast %75 : vector<2x32xf32> to vector<1x1x2x32xf32>
    tpu.vector_store %arg6[%c1, %76, %c0_22, %c0_23], %79 {strides = array<i32>} : memref<2x8x2x32xf32, #tpu.memory_space<vmem>>, vector<1x1x2x32xf32>,
    %c1_i32 = arith.constant 1 : i32
    %80 = arith.index_cast %c1_i32 : i32 to index
    %c0_24 = arith.constant 0 : index
    %c0_25 = arith.constant 0 : index
    %81 = vector.load %arg0[%80, %c0_24, %c0_25] : memref<8x2x96xf32, #tpu.memory_space<vmem>>, vector<1x2x96xf32>
    %82 = vector.shape_cast %81 : vector<1x2x96xf32> to vector<2x96xf32>
    %cst_26 = arith.constant dense<0.000000e+00> : vector<2x96xf32>
    %83 = tpu.matmul %39, %0, %cst_26 {dimension_numbers = #tpu.dot_dimension_numbers<[1], [0], [0], [1], [0, 0, 1, 1], [], []>} : vector<2x32xf32>, vector<32x96xf32>, vector<2x96xf32> -> vector<2x96xf32>
    %84 = vector.extract_strided_slice %82 {offsets = [0, 0], sizes = [2, 32], strides = [1, 1]} : vector<2x96xf32> to vector<2x32xf32>
    %85 = vector.extract_strided_slice %83 {offsets = [0, 0], sizes = [2, 32], strides = [1, 1]} : vector<2x96xf32> to vector<2x32xf32>
    %86 = arith.addf %84, %85 : vector<2x32xf32>
    %87 = arith.negf %86 : vector<2x32xf32>
    %88 = math.exp %87 : vector<2x32xf32>
    %cst_27 = arith.constant 1.000000e+00 : f32
    %89 = vector.broadcast %cst_27 : f32 to vector<2x32xf32>
    %90 = arith.addf %89, %88 : vector<2x32xf32>
    %91 = arith.divf %89, %90 : vector<2x32xf32>
    %92 = vector.extract_strided_slice %82 {offsets = [0, 32], sizes = [2, 32], strides = [1, 1]} : vector<2x96xf32> to vector<2x32xf32>
    %93 = vector.extract_strided_slice %83 {offsets = [0, 32], sizes = [2, 32], strides = [1, 1]} : vector<2x96xf32> to vector<2x32xf32>
    %94 = arith.addf %92, %93 : vector<2x32xf32>
    %95 = arith.negf %94 : vector<2x32xf32>
    %96 = math.exp %95 : vector<2x32xf32>
    %cst_28 = arith.constant 1.000000e+00 : f32
    %97 = vector.broadcast %cst_28 : f32 to vector<2x32xf32>
    %98 = arith.addf %97, %96 : vector<2x32xf32>
    %99 = arith.divf %97, %98 : vector<2x32xf32>
    %100 = vector.extract_strided_slice %82 {offsets = [0, 64], sizes = [2, 32], strides = [1, 1]} : vector<2x96xf32> to vector<2x32xf32>
    %101 = vector.extract_strided_slice %83 {offsets = [0, 64], sizes = [2, 32], strides = [1, 1]} : vector<2x96xf32> to vector<2x32xf32>
    %102 = arith.addf %101, %4 : vector<2x32xf32>
    %103 = arith.mulf %91, %102 : vector<2x32xf32>
    %104 = arith.addf %100, %103 : vector<2x32xf32>
    %105 = math.tanh %104 : vector<2x32xf32>
    %cst_29 = arith.constant 1.000000e+00 : f32
    %106 = vector.broadcast %cst_29 : f32 to vector<2x32xf32>
    %107 = arith.subf %106, %99 : vector<2x32xf32>
    %108 = arith.mulf %107, %105 : vector<2x32xf32>
    %109 = arith.mulf %99, %39 : vector<2x32xf32>
    %110 = arith.addf %108, %109 : vector<2x32xf32>
    %c0_30 = arith.constant 0 : index
    %111 = arith.index_cast %c1_i32 : i32 to index
    %c0_31 = arith.constant 0 : index
    %c0_32 = arith.constant 0 : index
    %112 = vector.load %arg6[%c0_30, %111, %c0_31, %c0_32] : memref<2x8x2x32xf32, #tpu.memory_space<vmem>>, vector<1x1x2x32xf32>
    %113 = vector.shape_cast %112 : vector<1x1x2x32xf32> to vector<2x32xf32>
    %114 = vector.shape_cast %110 : vector<2x32xf32> to vector<1x1x2x32xf32>
    tpu.vector_store %arg6[%c0_30, %111, %c0_31, %c0_32], %114 {strides = array<i32>} : memref<2x8x2x32xf32, #tpu.memory_space<vmem>>, vector<1x1x2x32xf32>,
    %c7_i32_33 = arith.constant 7 : i32
    %115 = arith.subi %c7_i32_33, %c1_i32 : i32
    %116 = arith.index_cast %115 : i32 to index
    %c0_34 = arith.constant 0 : index
    %c0_35 = arith.constant 0 : index
    %117 = vector.load %arg1[%116, %c0_34, %c0_35] : memref<8x2x96xf32, #tpu.memory_space<vmem>>, vector<1x2x96xf32>
    %118 = vector.shape_cast %117 : vector<1x2x96xf32> to vector<2x96xf32>
    %cst_36 = arith.constant dense<0.000000e+00> : vector<2x96xf32>
    %119 = tpu.matmul %75, %1, %cst_36 {dimension_numbers = #tpu.dot_dimension_numbers<[1], [0], [0], [1], [0, 0, 1, 1], [], []>} : vector<2x32xf32>, vector<32x96xf32>, vector<2x96xf32> -> vector<2x96xf32>
    %120 = vector.extract_strided_slice %118 {offsets = [0, 0], sizes = [2, 32], strides = [1, 1]} : vector<2x96xf32> to vector<2x32xf32>
    %121 = vector.extract_strided_slice %119 {offsets = [0, 0], sizes = [2, 32], strides = [1, 1]} : vector<2x96xf32> to vector<2x32xf32>
    %122 = arith.addf %120, %121 : vector<2x32xf32>
    %123 = arith.negf %122 : vector<2x32xf32>
    %124 = math.exp %123 : vector<2x32xf32>
    %cst_37 = arith.constant 1.000000e+00 : f32
    %125 = vector.broadcast %cst_37 : f32 to vector<2x32xf32>
    %126 = arith.addf %125, %124 : vector<2x32xf32>
    %127 = arith.divf %125, %126 : vector<2x32xf32>
    %128 = vector.extract_strided_slice %118 {offsets = [0, 32], sizes = [2, 32], strides = [1, 1]} : vector<2x96xf32> to vector<2x32xf32>
    %129 = vector.extract_strided_slice %119 {offsets = [0, 32], sizes = [2, 32], strides = [1, 1]} : vector<2x96xf32> to vector<2x32xf32>
    %130 = arith.addf %128, %129 : vector<2x32xf32>
    %131 = arith.negf %130 : vector<2x32xf32>
    %132 = math.exp %131 : vector<2x32xf32>
    %cst_38 = arith.constant 1.000000e+00 : f32
    %133 = vector.broadcast %cst_38 : f32 to vector<2x32xf32>
    %134 = arith.addf %133, %132 : vector<2x32xf32>
    %135 = arith.divf %133, %134 : vector<2x32xf32>
    %136 = vector.extract_strided_slice %118 {offsets = [0, 64], sizes = [2, 32], strides = [1, 1]} : vector<2x96xf32> to vector<2x32xf32>
    %137 = vector.extract_strided_slice %119 {offsets = [0, 64], sizes = [2, 32], strides = [1, 1]} : vector<2x96xf32> to vector<2x32xf32>
    %138 = arith.addf %137, %7 : vector<2x32xf32>
    %139 = arith.mulf %127, %138 : vector<2x32xf32>
    %140 = arith.addf %136, %139 : vector<2x32xf32>
    %141 = math.tanh %140 : vector<2x32xf32>
    %cst_39 = arith.constant 1.000000e+00 : f32
    %142 = vector.broadcast %cst_39 : f32 to vector<2x32xf32>
    %143 = arith.subf %142, %135 : vector<2x32xf32>
    %144 = arith.mulf %143, %141 : vector<2x32xf32>
    %145 = arith.mulf %135, %75 : vector<2x32xf32>
    %146 = arith.addf %144, %145 : vector<2x32xf32>
    %c1_40 = arith.constant 1 : index
    %147 = arith.index_cast %115 : i32 to index
    %c0_41 = arith.constant 0 : index
    %c0_42 = arith.constant 0 : index
    %148 = vector.load %arg6[%c1_40, %147, %c0_41, %c0_42] : memref<2x8x2x32xf32, #tpu.memory_space<vmem>>, vector<1x1x2x32xf32>
    %149 = vector.shape_cast %148 : vector<1x1x2x32xf32> to vector<2x32xf32>
    %150 = vector.shape_cast %146 : vector<2x32xf32> to vector<1x1x2x32xf32>
    tpu.vector_store %arg6[%c1_40, %147, %c0_41, %c0_42], %150 {strides = array<i32>} : memref<2x8x2x32xf32, #tpu.memory_space<vmem>>, vector<1x1x2x32xf32>,
    %c2_i32 = arith.constant 2 : i32
    %151 = arith.index_cast %c2_i32 : i32 to index
    %c0_43 = arith.constant 0 : index
    %c0_44 = arith.constant 0 : index
    %152 = vector.load %arg0[%151, %c0_43, %c0_44] : memref<8x2x96xf32, #tpu.memory_space<vmem>>, vector<1x2x96xf32>
    %153 = vector.shape_cast %152 : vector<1x2x96xf32> to vector<2x96xf32>
    %cst_45 = arith.constant dense<0.000000e+00> : vector<2x96xf32>
    %154 = tpu.matmul %110, %0, %cst_45 {dimension_numbers = #tpu.dot_dimension_numbers<[1], [0], [0], [1], [0, 0, 1, 1], [], []>} : vector<2x32xf32>, vector<32x96xf32>, vector<2x96xf32> -> vector<2x96xf32>
    %155 = vector.extract_strided_slice %153 {offsets = [0, 0], sizes = [2, 32], strides = [1, 1]} : vector<2x96xf32> to vector<2x32xf32>
    %156 = vector.extract_strided_slice %154 {offsets = [0, 0], sizes = [2, 32], strides = [1, 1]} : vector<2x96xf32> to vector<2x32xf32>
    %157 = arith.addf %155, %156 : vector<2x32xf32>
    %158 = arith.negf %157 : vector<2x32xf32>
    %159 = math.exp %158 : vector<2x32xf32>
    %cst_46 = arith.constant 1.000000e+00 : f32
    %160 = vector.broadcast %cst_46 : f32 to vector<2x32xf32>
    %161 = arith.addf %160, %159 : vector<2x32xf32>
    %162 = arith.divf %160, %161 : vector<2x32xf32>
    %163 = vector.extract_strided_slice %153 {offsets = [0, 32], sizes = [2, 32], strides = [1, 1]} : vector<2x96xf32> to vector<2x32xf32>
    %164 = vector.extract_strided_slice %154 {offsets = [0, 32], sizes = [2, 32], strides = [1, 1]} : vector<2x96xf32> to vector<2x32xf32>
    %165 = arith.addf %163, %164 : vector<2x32xf32>
    %166 = arith.negf %165 : vector<2x32xf32>
    %167 = math.exp %166 : vector<2x32xf32>
    %cst_47 = arith.constant 1.000000e+00 : f32
    %168 = vector.broadcast %cst_47 : f32 to vector<2x32xf32>
    %169 = arith.addf %168, %167 : vector<2x32xf32>
    %170 = arith.divf %168, %169 : vector<2x32xf32>
    %171 = vector.extract_strided_slice %153 {offsets = [0, 64], sizes = [2, 32], strides = [1, 1]} : vector<2x96xf32> to vector<2x32xf32>
    %172 = vector.extract_strided_slice %154 {offsets = [0, 64], sizes = [2, 32], strides = [1, 1]} : vector<2x96xf32> to vector<2x32xf32>
    %173 = arith.addf %172, %4 : vector<2x32xf32>
    %174 = arith.mulf %162, %173 : vector<2x32xf32>
    %175 = arith.addf %171, %174 : vector<2x32xf32>
    %176 = math.tanh %175 : vector<2x32xf32>
    %cst_48 = arith.constant 1.000000e+00 : f32
    %177 = vector.broadcast %cst_48 : f32 to vector<2x32xf32>
    %178 = arith.subf %177, %170 : vector<2x32xf32>
    %179 = arith.mulf %178, %176 : vector<2x32xf32>
    %180 = arith.mulf %170, %110 : vector<2x32xf32>
    %181 = arith.addf %179, %180 : vector<2x32xf32>
    %c0_49 = arith.constant 0 : index
    %182 = arith.index_cast %c2_i32 : i32 to index
    %c0_50 = arith.constant 0 : index
    %c0_51 = arith.constant 0 : index
    %183 = vector.load %arg6[%c0_49, %182, %c0_50, %c0_51] : memref<2x8x2x32xf32, #tpu.memory_space<vmem>>, vector<1x1x2x32xf32>
    %184 = vector.shape_cast %183 : vector<1x1x2x32xf32> to vector<2x32xf32>
    %185 = vector.shape_cast %181 : vector<2x32xf32> to vector<1x1x2x32xf32>
    tpu.vector_store %arg6[%c0_49, %182, %c0_50, %c0_51], %185 {strides = array<i32>} : memref<2x8x2x32xf32, #tpu.memory_space<vmem>>, vector<1x1x2x32xf32>,
    %c7_i32_52 = arith.constant 7 : i32
    %186 = arith.subi %c7_i32_52, %c2_i32 : i32
    %187 = arith.index_cast %186 : i32 to index
    %c0_53 = arith.constant 0 : index
    %c0_54 = arith.constant 0 : index
    %188 = vector.load %arg1[%187, %c0_53, %c0_54] : memref<8x2x96xf32, #tpu.memory_space<vmem>>, vector<1x2x96xf32>
    %189 = vector.shape_cast %188 : vector<1x2x96xf32> to vector<2x96xf32>
    %cst_55 = arith.constant dense<0.000000e+00> : vector<2x96xf32>
    %190 = tpu.matmul %146, %1, %cst_55 {dimension_numbers = #tpu.dot_dimension_numbers<[1], [0], [0], [1], [0, 0, 1, 1], [], []>} : vector<2x32xf32>, vector<32x96xf32>, vector<2x96xf32> -> vector<2x96xf32>
    %191 = vector.extract_strided_slice %189 {offsets = [0, 0], sizes = [2, 32], strides = [1, 1]} : vector<2x96xf32> to vector<2x32xf32>
    %192 = vector.extract_strided_slice %190 {offsets = [0, 0], sizes = [2, 32], strides = [1, 1]} : vector<2x96xf32> to vector<2x32xf32>
    %193 = arith.addf %191, %192 : vector<2x32xf32>
    %194 = arith.negf %193 : vector<2x32xf32>
    %195 = math.exp %194 : vector<2x32xf32>
    %cst_56 = arith.constant 1.000000e+00 : f32
    %196 = vector.broadcast %cst_56 : f32 to vector<2x32xf32>
    %197 = arith.addf %196, %195 : vector<2x32xf32>
    %198 = arith.divf %196, %197 : vector<2x32xf32>
    %199 = vector.extract_strided_slice %189 {offsets = [0, 32], sizes = [2, 32], strides = [1, 1]} : vector<2x96xf32> to vector<2x32xf32>
    %200 = vector.extract_strided_slice %190 {offsets = [0, 32], sizes = [2, 32], strides = [1, 1]} : vector<2x96xf32> to vector<2x32xf32>
    %201 = arith.addf %199, %200 : vector<2x32xf32>
    %202 = arith.negf %201 : vector<2x32xf32>
    %203 = math.exp %202 : vector<2x32xf32>
    %cst_57 = arith.constant 1.000000e+00 : f32
    %204 = vector.broadcast %cst_57 : f32 to vector<2x32xf32>
    %205 = arith.addf %204, %203 : vector<2x32xf32>
    %206 = arith.divf %204, %205 : vector<2x32xf32>
    %207 = vector.extract_strided_slice %189 {offsets = [0, 64], sizes = [2, 32], strides = [1, 1]} : vector<2x96xf32> to vector<2x32xf32>
    %208 = vector.extract_strided_slice %190 {offsets = [0, 64], sizes = [2, 32], strides = [1, 1]} : vector<2x96xf32> to vector<2x32xf32>
    %209 = arith.addf %208, %7 : vector<2x32xf32>
    %210 = arith.mulf %198, %209 : vector<2x32xf32>
    %211 = arith.addf %207, %210 : vector<2x32xf32>
    %212 = math.tanh %211 : vector<2x32xf32>
    %cst_58 = arith.constant 1.000000e+00 : f32
    %213 = vector.broadcast %cst_58 : f32 to vector<2x32xf32>
    %214 = arith.subf %213, %206 : vector<2x32xf32>
    %215 = arith.mulf %214, %212 : vector<2x32xf32>
    %216 = arith.mulf %206, %146 : vector<2x32xf32>
    %217 = arith.addf %215, %216 : vector<2x32xf32>
    %c1_59 = arith.constant 1 : index
    %218 = arith.index_cast %186 : i32 to index
    %c0_60 = arith.constant 0 : index
    %c0_61 = arith.constant 0 : index
    %219 = vector.load %arg6[%c1_59, %218, %c0_60, %c0_61] : memref<2x8x2x32xf32, #tpu.memory_space<vmem>>, vector<1x1x2x32xf32>
    %220 = vector.shape_cast %219 : vector<1x1x2x32xf32> to vector<2x32xf32>
    %221 = vector.shape_cast %217 : vector<2x32xf32> to vector<1x1x2x32xf32>
    tpu.vector_store %arg6[%c1_59, %218, %c0_60, %c0_61], %221 {strides = array<i32>} : memref<2x8x2x32xf32, #tpu.memory_space<vmem>>, vector<1x1x2x32xf32>,
    %c3_i32 = arith.constant 3 : i32
    %222 = arith.index_cast %c3_i32 : i32 to index
    %c0_62 = arith.constant 0 : index
    %c0_63 = arith.constant 0 : index
    %223 = vector.load %arg0[%222, %c0_62, %c0_63] : memref<8x2x96xf32, #tpu.memory_space<vmem>>, vector<1x2x96xf32>
    %224 = vector.shape_cast %223 : vector<1x2x96xf32> to vector<2x96xf32>
    %cst_64 = arith.constant dense<0.000000e+00> : vector<2x96xf32>
    %225 = tpu.matmul %181, %0, %cst_64 {dimension_numbers = #tpu.dot_dimension_numbers<[1], [0], [0], [1], [0, 0, 1, 1], [], []>} : vector<2x32xf32>, vector<32x96xf32>, vector<2x96xf32> -> vector<2x96xf32>
    %226 = vector.extract_strided_slice %224 {offsets = [0, 0], sizes = [2, 32], strides = [1, 1]} : vector<2x96xf32> to vector<2x32xf32>
    %227 = vector.extract_strided_slice %225 {offsets = [0, 0], sizes = [2, 32], strides = [1, 1]} : vector<2x96xf32> to vector<2x32xf32>
    %228 = arith.addf %226, %227 : vector<2x32xf32>
    %229 = arith.negf %228 : vector<2x32xf32>
    %230 = math.exp %229 : vector<2x32xf32>
    %cst_65 = arith.constant 1.000000e+00 : f32
    %231 = vector.broadcast %cst_65 : f32 to vector<2x32xf32>
    %232 = arith.addf %231, %230 : vector<2x32xf32>
    %233 = arith.divf %231, %232 : vector<2x32xf32>
    %234 = vector.extract_strided_slice %224 {offsets = [0, 32], sizes = [2, 32], strides = [1, 1]} : vector<2x96xf32> to vector<2x32xf32>
    %235 = vector.extract_strided_slice %225 {offsets = [0, 32], sizes = [2, 32], strides = [1, 1]} : vector<2x96xf32> to vector<2x32xf32>
    %236 = arith.addf %234, %235 : vector<2x32xf32>
    %237 = arith.negf %236 : vector<2x32xf32>
    %238 = math.exp %237 : vector<2x32xf32>
    %cst_66 = arith.constant 1.000000e+00 : f32
    %239 = vector.broadcast %cst_66 : f32 to vector<2x32xf32>
    %240 = arith.addf %239, %238 : vector<2x32xf32>
    %241 = arith.divf %239, %240 : vector<2x32xf32>
    %242 = vector.extract_strided_slice %224 {offsets = [0, 64], sizes = [2, 32], strides = [1, 1]} : vector<2x96xf32> to vector<2x32xf32>
    %243 = vector.extract_strided_slice %225 {offsets = [0, 64], sizes = [2, 32], strides = [1, 1]} : vector<2x96xf32> to vector<2x32xf32>
    %244 = arith.addf %243, %4 : vector<2x32xf32>
    %245 = arith.mulf %233, %244 : vector<2x32xf32>
    %246 = arith.addf %242, %245 : vector<2x32xf32>
    %247 = math.tanh %246 : vector<2x32xf32>
    %cst_67 = arith.constant 1.000000e+00 : f32
    %248 = vector.broadcast %cst_67 : f32 to vector<2x32xf32>
    %249 = arith.subf %248, %241 : vector<2x32xf32>
    %250 = arith.mulf %249, %247 : vector<2x32xf32>
    %251 = arith.mulf %241, %181 : vector<2x32xf32>
    %252 = arith.addf %250, %251 : vector<2x32xf32>
    %c0_68 = arith.constant 0 : index
    %253 = arith.index_cast %c3_i32 : i32 to index
    %c0_69 = arith.constant 0 : index
    %c0_70 = arith.constant 0 : index
    %254 = vector.load %arg6[%c0_68, %253, %c0_69, %c0_70] : memref<2x8x2x32xf32, #tpu.memory_space<vmem>>, vector<1x1x2x32xf32>
    %255 = vector.shape_cast %254 : vector<1x1x2x32xf32> to vector<2x32xf32>
    %256 = vector.shape_cast %252 : vector<2x32xf32> to vector<1x1x2x32xf32>
    tpu.vector_store %arg6[%c0_68, %253, %c0_69, %c0_70], %256 {strides = array<i32>} : memref<2x8x2x32xf32, #tpu.memory_space<vmem>>, vector<1x1x2x32xf32>,
    %c7_i32_71 = arith.constant 7 : i32
    %257 = arith.subi %c7_i32_71, %c3_i32 : i32
    %258 = arith.index_cast %257 : i32 to index
    %c0_72 = arith.constant 0 : index
    %c0_73 = arith.constant 0 : index
    %259 = vector.load %arg1[%258, %c0_72, %c0_73] : memref<8x2x96xf32, #tpu.memory_space<vmem>>, vector<1x2x96xf32>
    %260 = vector.shape_cast %259 : vector<1x2x96xf32> to vector<2x96xf32>
    %cst_74 = arith.constant dense<0.000000e+00> : vector<2x96xf32>
    %261 = tpu.matmul %217, %1, %cst_74 {dimension_numbers = #tpu.dot_dimension_numbers<[1], [0], [0], [1], [0, 0, 1, 1], [], []>} : vector<2x32xf32>, vector<32x96xf32>, vector<2x96xf32> -> vector<2x96xf32>
    %262 = vector.extract_strided_slice %260 {offsets = [0, 0], sizes = [2, 32], strides = [1, 1]} : vector<2x96xf32> to vector<2x32xf32>
    %263 = vector.extract_strided_slice %261 {offsets = [0, 0], sizes = [2, 32], strides = [1, 1]} : vector<2x96xf32> to vector<2x32xf32>
    %264 = arith.addf %262, %263 : vector<2x32xf32>
    %265 = arith.negf %264 : vector<2x32xf32>
    %266 = math.exp %265 : vector<2x32xf32>
    %cst_75 = arith.constant 1.000000e+00 : f32
    %267 = vector.broadcast %cst_75 : f32 to vector<2x32xf32>
    %268 = arith.addf %267, %266 : vector<2x32xf32>
    %269 = arith.divf %267, %268 : vector<2x32xf32>
    %270 = vector.extract_strided_slice %260 {offsets = [0, 32], sizes = [2, 32], strides = [1, 1]} : vector<2x96xf32> to vector<2x32xf32>
    %271 = vector.extract_strided_slice %261 {offsets = [0, 32], sizes = [2, 32], strides = [1, 1]} : vector<2x96xf32> to vector<2x32xf32>
    %272 = arith.addf %270, %271 : vector<2x32xf32>
    %273 = arith.negf %272 : vector<2x32xf32>
    %274 = math.exp %273 : vector<2x32xf32>
    %cst_76 = arith.constant 1.000000e+00 : f32
    %275 = vector.broadcast %cst_76 : f32 to vector<2x32xf32>
    %276 = arith.addf %275, %274 : vector<2x32xf32>
    %277 = arith.divf %275, %276 : vector<2x32xf32>
    %278 = vector.extract_strided_slice %260 {offsets = [0, 64], sizes = [2, 32], strides = [1, 1]} : vector<2x96xf32> to vector<2x32xf32>
    %279 = vector.extract_strided_slice %261 {offsets = [0, 64], sizes = [2, 32], strides = [1, 1]} : vector<2x96xf32> to vector<2x32xf32>
    %280 = arith.addf %279, %7 : vector<2x32xf32>
    %281 = arith.mulf %269, %280 : vector<2x32xf32>
    %282 = arith.addf %278, %281 : vector<2x32xf32>
    %283 = math.tanh %282 : vector<2x32xf32>
    %cst_77 = arith.constant 1.000000e+00 : f32
    %284 = vector.broadcast %cst_77 : f32 to vector<2x32xf32>
    %285 = arith.subf %284, %277 : vector<2x32xf32>
    %286 = arith.mulf %285, %283 : vector<2x32xf32>
    %287 = arith.mulf %277, %217 : vector<2x32xf32>
    %288 = arith.addf %286, %287 : vector<2x32xf32>
    %c1_78 = arith.constant 1 : index
    %289 = arith.index_cast %257 : i32 to index
    %c0_79 = arith.constant 0 : index
    %c0_80 = arith.constant 0 : index
    %290 = vector.load %arg6[%c1_78, %289, %c0_79, %c0_80] : memref<2x8x2x32xf32, #tpu.memory_space<vmem>>, vector<1x1x2x32xf32>
    %291 = vector.shape_cast %290 : vector<1x1x2x32xf32> to vector<2x32xf32>
    %292 = vector.shape_cast %288 : vector<2x32xf32> to vector<1x1x2x32xf32>
    tpu.vector_store %arg6[%c1_78, %289, %c0_79, %c0_80], %292 {strides = array<i32>} : memref<2x8x2x32xf32, #tpu.memory_space<vmem>>, vector<1x1x2x32xf32>,
    %c4_i32 = arith.constant 4 : i32
    %293 = arith.index_cast %c4_i32 : i32 to index
    %c0_81 = arith.constant 0 : index
    %c0_82 = arith.constant 0 : index
    %294 = vector.load %arg0[%293, %c0_81, %c0_82] : memref<8x2x96xf32, #tpu.memory_space<vmem>>, vector<1x2x96xf32>
    %295 = vector.shape_cast %294 : vector<1x2x96xf32> to vector<2x96xf32>
    %cst_83 = arith.constant dense<0.000000e+00> : vector<2x96xf32>
    %296 = tpu.matmul %252, %0, %cst_83 {dimension_numbers = #tpu.dot_dimension_numbers<[1], [0], [0], [1], [0, 0, 1, 1], [], []>} : vector<2x32xf32>, vector<32x96xf32>, vector<2x96xf32> -> vector<2x96xf32>
    %297 = vector.extract_strided_slice %295 {offsets = [0, 0], sizes = [2, 32], strides = [1, 1]} : vector<2x96xf32> to vector<2x32xf32>
    %298 = vector.extract_strided_slice %296 {offsets = [0, 0], sizes = [2, 32], strides = [1, 1]} : vector<2x96xf32> to vector<2x32xf32>
    %299 = arith.addf %297, %298 : vector<2x32xf32>
    %300 = arith.negf %299 : vector<2x32xf32>
    %301 = math.exp %300 : vector<2x32xf32>
    %cst_84 = arith.constant 1.000000e+00 : f32
    %302 = vector.broadcast %cst_84 : f32 to vector<2x32xf32>
    %303 = arith.addf %302, %301 : vector<2x32xf32>
    %304 = arith.divf %302, %303 : vector<2x32xf32>
    %305 = vector.extract_strided_slice %295 {offsets = [0, 32], sizes = [2, 32], strides = [1, 1]} : vector<2x96xf32> to vector<2x32xf32>
    %306 = vector.extract_strided_slice %296 {offsets = [0, 32], sizes = [2, 32], strides = [1, 1]} : vector<2x96xf32> to vector<2x32xf32>
    %307 = arith.addf %305, %306 : vector<2x32xf32>
    %308 = arith.negf %307 : vector<2x32xf32>
    %309 = math.exp %308 : vector<2x32xf32>
    %cst_85 = arith.constant 1.000000e+00 : f32
    %310 = vector.broadcast %cst_85 : f32 to vector<2x32xf32>
    %311 = arith.addf %310, %309 : vector<2x32xf32>
    %312 = arith.divf %310, %311 : vector<2x32xf32>
    %313 = vector.extract_strided_slice %295 {offsets = [0, 64], sizes = [2, 32], strides = [1, 1]} : vector<2x96xf32> to vector<2x32xf32>
    %314 = vector.extract_strided_slice %296 {offsets = [0, 64], sizes = [2, 32], strides = [1, 1]} : vector<2x96xf32> to vector<2x32xf32>
    %315 = arith.addf %314, %4 : vector<2x32xf32>
    %316 = arith.mulf %304, %315 : vector<2x32xf32>
    %317 = arith.addf %313, %316 : vector<2x32xf32>
    %318 = math.tanh %317 : vector<2x32xf32>
    %cst_86 = arith.constant 1.000000e+00 : f32
    %319 = vector.broadcast %cst_86 : f32 to vector<2x32xf32>
    %320 = arith.subf %319, %312 : vector<2x32xf32>
    %321 = arith.mulf %320, %318 : vector<2x32xf32>
    %322 = arith.mulf %312, %252 : vector<2x32xf32>
    %323 = arith.addf %321, %322 : vector<2x32xf32>
    %c0_87 = arith.constant 0 : index
    %324 = arith.index_cast %c4_i32 : i32 to index
    %c0_88 = arith.constant 0 : index
    %c0_89 = arith.constant 0 : index
    %325 = vector.load %arg6[%c0_87, %324, %c0_88, %c0_89] : memref<2x8x2x32xf32, #tpu.memory_space<vmem>>, vector<1x1x2x32xf32>
    %326 = vector.shape_cast %325 : vector<1x1x2x32xf32> to vector<2x32xf32>
    %327 = vector.shape_cast %323 : vector<2x32xf32> to vector<1x1x2x32xf32>
    tpu.vector_store %arg6[%c0_87, %324, %c0_88, %c0_89], %327 {strides = array<i32>} : memref<2x8x2x32xf32, #tpu.memory_space<vmem>>, vector<1x1x2x32xf32>,
    %c7_i32_90 = arith.constant 7 : i32
    %328 = arith.subi %c7_i32_90, %c4_i32 : i32
    %329 = arith.index_cast %328 : i32 to index
    %c0_91 = arith.constant 0 : index
    %c0_92 = arith.constant 0 : index
    %330 = vector.load %arg1[%329, %c0_91, %c0_92] : memref<8x2x96xf32, #tpu.memory_space<vmem>>, vector<1x2x96xf32>
    %331 = vector.shape_cast %330 : vector<1x2x96xf32> to vector<2x96xf32>
    %cst_93 = arith.constant dense<0.000000e+00> : vector<2x96xf32>
    %332 = tpu.matmul %288, %1, %cst_93 {dimension_numbers = #tpu.dot_dimension_numbers<[1], [0], [0], [1], [0, 0, 1, 1], [], []>} : vector<2x32xf32>, vector<32x96xf32>, vector<2x96xf32> -> vector<2x96xf32>
    %333 = vector.extract_strided_slice %331 {offsets = [0, 0], sizes = [2, 32], strides = [1, 1]} : vector<2x96xf32> to vector<2x32xf32>
    %334 = vector.extract_strided_slice %332 {offsets = [0, 0], sizes = [2, 32], strides = [1, 1]} : vector<2x96xf32> to vector<2x32xf32>
    %335 = arith.addf %333, %334 : vector<2x32xf32>
    %336 = arith.negf %335 : vector<2x32xf32>
    %337 = math.exp %336 : vector<2x32xf32>
    %cst_94 = arith.constant 1.000000e+00 : f32
    %338 = vector.broadcast %cst_94 : f32 to vector<2x32xf32>
    %339 = arith.addf %338, %337 : vector<2x32xf32>
    %340 = arith.divf %338, %339 : vector<2x32xf32>
    %341 = vector.extract_strided_slice %331 {offsets = [0, 32], sizes = [2, 32], strides = [1, 1]} : vector<2x96xf32> to vector<2x32xf32>
    %342 = vector.extract_strided_slice %332 {offsets = [0, 32], sizes = [2, 32], strides = [1, 1]} : vector<2x96xf32> to vector<2x32xf32>
    %343 = arith.addf %341, %342 : vector<2x32xf32>
    %344 = arith.negf %343 : vector<2x32xf32>
    %345 = math.exp %344 : vector<2x32xf32>
    %cst_95 = arith.constant 1.000000e+00 : f32
    %346 = vector.broadcast %cst_95 : f32 to vector<2x32xf32>
    %347 = arith.addf %346, %345 : vector<2x32xf32>
    %348 = arith.divf %346, %347 : vector<2x32xf32>
    %349 = vector.extract_strided_slice %331 {offsets = [0, 64], sizes = [2, 32], strides = [1, 1]} : vector<2x96xf32> to vector<2x32xf32>
    %350 = vector.extract_strided_slice %332 {offsets = [0, 64], sizes = [2, 32], strides = [1, 1]} : vector<2x96xf32> to vector<2x32xf32>
    %351 = arith.addf %350, %7 : vector<2x32xf32>
    %352 = arith.mulf %340, %351 : vector<2x32xf32>
    %353 = arith.addf %349, %352 : vector<2x32xf32>
    %354 = math.tanh %353 : vector<2x32xf32>
    %cst_96 = arith.constant 1.000000e+00 : f32
    %355 = vector.broadcast %cst_96 : f32 to vector<2x32xf32>
    %356 = arith.subf %355, %348 : vector<2x32xf32>
    %357 = arith.mulf %356, %354 : vector<2x32xf32>
    %358 = arith.mulf %348, %288 : vector<2x32xf32>
    %359 = arith.addf %357, %358 : vector<2x32xf32>
    %c1_97 = arith.constant 1 : index
    %360 = arith.index_cast %328 : i32 to index
    %c0_98 = arith.constant 0 : index
    %c0_99 = arith.constant 0 : index
    %361 = vector.load %arg6[%c1_97, %360, %c0_98, %c0_99] : memref<2x8x2x32xf32, #tpu.memory_space<vmem>>, vector<1x1x2x32xf32>
    %362 = vector.shape_cast %361 : vector<1x1x2x32xf32> to vector<2x32xf32>
    %363 = vector.shape_cast %359 : vector<2x32xf32> to vector<1x1x2x32xf32>
    tpu.vector_store %arg6[%c1_97, %360, %c0_98, %c0_99], %363 {strides = array<i32>} : memref<2x8x2x32xf32, #tpu.memory_space<vmem>>, vector<1x1x2x32xf32>,
    %c5_i32 = arith.constant 5 : i32
    %364 = arith.index_cast %c5_i32 : i32 to index
    %c0_100 = arith.constant 0 : index
    %c0_101 = arith.constant 0 : index
    %365 = vector.load %arg0[%364, %c0_100, %c0_101] : memref<8x2x96xf32, #tpu.memory_space<vmem>>, vector<1x2x96xf32>
    %366 = vector.shape_cast %365 : vector<1x2x96xf32> to vector<2x96xf32>
    %cst_102 = arith.constant dense<0.000000e+00> : vector<2x96xf32>
    %367 = tpu.matmul %323, %0, %cst_102 {dimension_numbers = #tpu.dot_dimension_numbers<[1], [0], [0], [1], [0, 0, 1, 1], [], []>} : vector<2x32xf32>, vector<32x96xf32>, vector<2x96xf32> -> vector<2x96xf32>
    %368 = vector.extract_strided_slice %366 {offsets = [0, 0], sizes = [2, 32], strides = [1, 1]} : vector<2x96xf32> to vector<2x32xf32>
    %369 = vector.extract_strided_slice %367 {offsets = [0, 0], sizes = [2, 32], strides = [1, 1]} : vector<2x96xf32> to vector<2x32xf32>
    %370 = arith.addf %368, %369 : vector<2x32xf32>
    %371 = arith.negf %370 : vector<2x32xf32>
    %372 = math.exp %371 : vector<2x32xf32>
    %cst_103 = arith.constant 1.000000e+00 : f32
    %373 = vector.broadcast %cst_103 : f32 to vector<2x32xf32>
    %374 = arith.addf %373, %372 : vector<2x32xf32>
    %375 = arith.divf %373, %374 : vector<2x32xf32>
    %376 = vector.extract_strided_slice %366 {offsets = [0, 32], sizes = [2, 32], strides = [1, 1]} : vector<2x96xf32> to vector<2x32xf32>
    %377 = vector.extract_strided_slice %367 {offsets = [0, 32], sizes = [2, 32], strides = [1, 1]} : vector<2x96xf32> to vector<2x32xf32>
    %378 = arith.addf %376, %377 : vector<2x32xf32>
    %379 = arith.negf %378 : vector<2x32xf32>
    %380 = math.exp %379 : vector<2x32xf32>
    %cst_104 = arith.constant 1.000000e+00 : f32
    %381 = vector.broadcast %cst_104 : f32 to vector<2x32xf32>
    %382 = arith.addf %381, %380 : vector<2x32xf32>
    %383 = arith.divf %381, %382 : vector<2x32xf32>
    %384 = vector.extract_strided_slice %366 {offsets = [0, 64], sizes = [2, 32], strides = [1, 1]} : vector<2x96xf32> to vector<2x32xf32>
    %385 = vector.extract_strided_slice %367 {offsets = [0, 64], sizes = [2, 32], strides = [1, 1]} : vector<2x96xf32> to vector<2x32xf32>
    %386 = arith.addf %385, %4 : vector<2x32xf32>
    %387 = arith.mulf %375, %386 : vector<2x32xf32>
    %388 = arith.addf %384, %387 : vector<2x32xf32>
    %389 = math.tanh %388 : vector<2x32xf32>
    %cst_105 = arith.constant 1.000000e+00 : f32
    %390 = vector.broadcast %cst_105 : f32 to vector<2x32xf32>
    %391 = arith.subf %390, %383 : vector<2x32xf32>
    %392 = arith.mulf %391, %389 : vector<2x32xf32>
    %393 = arith.mulf %383, %323 : vector<2x32xf32>
    %394 = arith.addf %392, %393 : vector<2x32xf32>
    %c0_106 = arith.constant 0 : index
    %395 = arith.index_cast %c5_i32 : i32 to index
    %c0_107 = arith.constant 0 : index
    %c0_108 = arith.constant 0 : index
    %396 = vector.load %arg6[%c0_106, %395, %c0_107, %c0_108] : memref<2x8x2x32xf32, #tpu.memory_space<vmem>>, vector<1x1x2x32xf32>
    %397 = vector.shape_cast %396 : vector<1x1x2x32xf32> to vector<2x32xf32>
    %398 = vector.shape_cast %394 : vector<2x32xf32> to vector<1x1x2x32xf32>
    tpu.vector_store %arg6[%c0_106, %395, %c0_107, %c0_108], %398 {strides = array<i32>} : memref<2x8x2x32xf32, #tpu.memory_space<vmem>>, vector<1x1x2x32xf32>,
    %c7_i32_109 = arith.constant 7 : i32
    %399 = arith.subi %c7_i32_109, %c5_i32 : i32
    %400 = arith.index_cast %399 : i32 to index
    %c0_110 = arith.constant 0 : index
    %c0_111 = arith.constant 0 : index
    %401 = vector.load %arg1[%400, %c0_110, %c0_111] : memref<8x2x96xf32, #tpu.memory_space<vmem>>, vector<1x2x96xf32>
    %402 = vector.shape_cast %401 : vector<1x2x96xf32> to vector<2x96xf32>
    %cst_112 = arith.constant dense<0.000000e+00> : vector<2x96xf32>
    %403 = tpu.matmul %359, %1, %cst_112 {dimension_numbers = #tpu.dot_dimension_numbers<[1], [0], [0], [1], [0, 0, 1, 1], [], []>} : vector<2x32xf32>, vector<32x96xf32>, vector<2x96xf32> -> vector<2x96xf32>
    %404 = vector.extract_strided_slice %402 {offsets = [0, 0], sizes = [2, 32], strides = [1, 1]} : vector<2x96xf32> to vector<2x32xf32>
    %405 = vector.extract_strided_slice %403 {offsets = [0, 0], sizes = [2, 32], strides = [1, 1]} : vector<2x96xf32> to vector<2x32xf32>
    %406 = arith.addf %404, %405 : vector<2x32xf32>
    %407 = arith.negf %406 : vector<2x32xf32>
    %408 = math.exp %407 : vector<2x32xf32>
    %cst_113 = arith.constant 1.000000e+00 : f32
    %409 = vector.broadcast %cst_113 : f32 to vector<2x32xf32>
    %410 = arith.addf %409, %408 : vector<2x32xf32>
    %411 = arith.divf %409, %410 : vector<2x32xf32>
    %412 = vector.extract_strided_slice %402 {offsets = [0, 32], sizes = [2, 32], strides = [1, 1]} : vector<2x96xf32> to vector<2x32xf32>
    %413 = vector.extract_strided_slice %403 {offsets = [0, 32], sizes = [2, 32], strides = [1, 1]} : vector<2x96xf32> to vector<2x32xf32>
    %414 = arith.addf %412, %413 : vector<2x32xf32>
    %415 = arith.negf %414 : vector<2x32xf32>
    %416 = math.exp %415 : vector<2x32xf32>
    %cst_114 = arith.constant 1.000000e+00 : f32
    %417 = vector.broadcast %cst_114 : f32 to vector<2x32xf32>
    %418 = arith.addf %417, %416 : vector<2x32xf32>
    %419 = arith.divf %417, %418 : vector<2x32xf32>
    %420 = vector.extract_strided_slice %402 {offsets = [0, 64], sizes = [2, 32], strides = [1, 1]} : vector<2x96xf32> to vector<2x32xf32>
    %421 = vector.extract_strided_slice %403 {offsets = [0, 64], sizes = [2, 32], strides = [1, 1]} : vector<2x96xf32> to vector<2x32xf32>
    %422 = arith.addf %421, %7 : vector<2x32xf32>
    %423 = arith.mulf %411, %422 : vector<2x32xf32>
    %424 = arith.addf %420, %423 : vector<2x32xf32>
    %425 = math.tanh %424 : vector<2x32xf32>
    %cst_115 = arith.constant 1.000000e+00 : f32
    %426 = vector.broadcast %cst_115 : f32 to vector<2x32xf32>
    %427 = arith.subf %426, %419 : vector<2x32xf32>
    %428 = arith.mulf %427, %425 : vector<2x32xf32>
    %429 = arith.mulf %419, %359 : vector<2x32xf32>
    %430 = arith.addf %428, %429 : vector<2x32xf32>
    %c1_116 = arith.constant 1 : index
    %431 = arith.index_cast %399 : i32 to index
    %c0_117 = arith.constant 0 : index
    %c0_118 = arith.constant 0 : index
    %432 = vector.load %arg6[%c1_116, %431, %c0_117, %c0_118] : memref<2x8x2x32xf32, #tpu.memory_space<vmem>>, vector<1x1x2x32xf32>
    %433 = vector.shape_cast %432 : vector<1x1x2x32xf32> to vector<2x32xf32>
    %434 = vector.shape_cast %430 : vector<2x32xf32> to vector<1x1x2x32xf32>
    tpu.vector_store %arg6[%c1_116, %431, %c0_117, %c0_118], %434 {strides = array<i32>} : memref<2x8x2x32xf32, #tpu.memory_space<vmem>>, vector<1x1x2x32xf32>,
    %c6_i32 = arith.constant 6 : i32
    %435 = arith.index_cast %c6_i32 : i32 to index
    %c0_119 = arith.constant 0 : index
    %c0_120 = arith.constant 0 : index
    %436 = vector.load %arg0[%435, %c0_119, %c0_120] : memref<8x2x96xf32, #tpu.memory_space<vmem>>, vector<1x2x96xf32>
    %437 = vector.shape_cast %436 : vector<1x2x96xf32> to vector<2x96xf32>
    %cst_121 = arith.constant dense<0.000000e+00> : vector<2x96xf32>
    %438 = tpu.matmul %394, %0, %cst_121 {dimension_numbers = #tpu.dot_dimension_numbers<[1], [0], [0], [1], [0, 0, 1, 1], [], []>} : vector<2x32xf32>, vector<32x96xf32>, vector<2x96xf32> -> vector<2x96xf32>
    %439 = vector.extract_strided_slice %437 {offsets = [0, 0], sizes = [2, 32], strides = [1, 1]} : vector<2x96xf32> to vector<2x32xf32>
    %440 = vector.extract_strided_slice %438 {offsets = [0, 0], sizes = [2, 32], strides = [1, 1]} : vector<2x96xf32> to vector<2x32xf32>
    %441 = arith.addf %439, %440 : vector<2x32xf32>
    %442 = arith.negf %441 : vector<2x32xf32>
    %443 = math.exp %442 : vector<2x32xf32>
    %cst_122 = arith.constant 1.000000e+00 : f32
    %444 = vector.broadcast %cst_122 : f32 to vector<2x32xf32>
    %445 = arith.addf %444, %443 : vector<2x32xf32>
    %446 = arith.divf %444, %445 : vector<2x32xf32>
    %447 = vector.extract_strided_slice %437 {offsets = [0, 32], sizes = [2, 32], strides = [1, 1]} : vector<2x96xf32> to vector<2x32xf32>
    %448 = vector.extract_strided_slice %438 {offsets = [0, 32], sizes = [2, 32], strides = [1, 1]} : vector<2x96xf32> to vector<2x32xf32>
    %449 = arith.addf %447, %448 : vector<2x32xf32>
    %450 = arith.negf %449 : vector<2x32xf32>
    %451 = math.exp %450 : vector<2x32xf32>
    %cst_123 = arith.constant 1.000000e+00 : f32
    %452 = vector.broadcast %cst_123 : f32 to vector<2x32xf32>
    %453 = arith.addf %452, %451 : vector<2x32xf32>
    %454 = arith.divf %452, %453 : vector<2x32xf32>
    %455 = vector.extract_strided_slice %437 {offsets = [0, 64], sizes = [2, 32], strides = [1, 1]} : vector<2x96xf32> to vector<2x32xf32>
    %456 = vector.extract_strided_slice %438 {offsets = [0, 64], sizes = [2, 32], strides = [1, 1]} : vector<2x96xf32> to vector<2x32xf32>
    %457 = arith.addf %456, %4 : vector<2x32xf32>
    %458 = arith.mulf %446, %457 : vector<2x32xf32>
    %459 = arith.addf %455, %458 : vector<2x32xf32>
    %460 = math.tanh %459 : vector<2x32xf32>
    %cst_124 = arith.constant 1.000000e+00 : f32
    %461 = vector.broadcast %cst_124 : f32 to vector<2x32xf32>
    %462 = arith.subf %461, %454 : vector<2x32xf32>
    %463 = arith.mulf %462, %460 : vector<2x32xf32>
    %464 = arith.mulf %454, %394 : vector<2x32xf32>
    %465 = arith.addf %463, %464 : vector<2x32xf32>
    %c0_125 = arith.constant 0 : index
    %466 = arith.index_cast %c6_i32 : i32 to index
    %c0_126 = arith.constant 0 : index
    %c0_127 = arith.constant 0 : index
    %467 = vector.load %arg6[%c0_125, %466, %c0_126, %c0_127] : memref<2x8x2x32xf32, #tpu.memory_space<vmem>>, vector<1x1x2x32xf32>
    %468 = vector.shape_cast %467 : vector<1x1x2x32xf32> to vector<2x32xf32>
    %469 = vector.shape_cast %465 : vector<2x32xf32> to vector<1x1x2x32xf32>
    tpu.vector_store %arg6[%c0_125, %466, %c0_126, %c0_127], %469 {strides = array<i32>} : memref<2x8x2x32xf32, #tpu.memory_space<vmem>>, vector<1x1x2x32xf32>,
    %c7_i32_128 = arith.constant 7 : i32
    %470 = arith.subi %c7_i32_128, %c6_i32 : i32
    %471 = arith.index_cast %470 : i32 to index
    %c0_129 = arith.constant 0 : index
    %c0_130 = arith.constant 0 : index
    %472 = vector.load %arg1[%471, %c0_129, %c0_130] : memref<8x2x96xf32, #tpu.memory_space<vmem>>, vector<1x2x96xf32>
    %473 = vector.shape_cast %472 : vector<1x2x96xf32> to vector<2x96xf32>
    %cst_131 = arith.constant dense<0.000000e+00> : vector<2x96xf32>
    %474 = tpu.matmul %430, %1, %cst_131 {dimension_numbers = #tpu.dot_dimension_numbers<[1], [0], [0], [1], [0, 0, 1, 1], [], []>} : vector<2x32xf32>, vector<32x96xf32>, vector<2x96xf32> -> vector<2x96xf32>
    %475 = vector.extract_strided_slice %473 {offsets = [0, 0], sizes = [2, 32], strides = [1, 1]} : vector<2x96xf32> to vector<2x32xf32>
    %476 = vector.extract_strided_slice %474 {offsets = [0, 0], sizes = [2, 32], strides = [1, 1]} : vector<2x96xf32> to vector<2x32xf32>
    %477 = arith.addf %475, %476 : vector<2x32xf32>
    %478 = arith.negf %477 : vector<2x32xf32>
    %479 = math.exp %478 : vector<2x32xf32>
    %cst_132 = arith.constant 1.000000e+00 : f32
    %480 = vector.broadcast %cst_132 : f32 to vector<2x32xf32>
    %481 = arith.addf %480, %479 : vector<2x32xf32>
    %482 = arith.divf %480, %481 : vector<2x32xf32>
    %483 = vector.extract_strided_slice %473 {offsets = [0, 32], sizes = [2, 32], strides = [1, 1]} : vector<2x96xf32> to vector<2x32xf32>
    %484 = vector.extract_strided_slice %474 {offsets = [0, 32], sizes = [2, 32], strides = [1, 1]} : vector<2x96xf32> to vector<2x32xf32>
    %485 = arith.addf %483, %484 : vector<2x32xf32>
    %486 = arith.negf %485 : vector<2x32xf32>
    %487 = math.exp %486 : vector<2x32xf32>
    %cst_133 = arith.constant 1.000000e+00 : f32
    %488 = vector.broadcast %cst_133 : f32 to vector<2x32xf32>
    %489 = arith.addf %488, %487 : vector<2x32xf32>
    %490 = arith.divf %488, %489 : vector<2x32xf32>
    %491 = vector.extract_strided_slice %473 {offsets = [0, 64], sizes = [2, 32], strides = [1, 1]} : vector<2x96xf32> to vector<2x32xf32>
    %492 = vector.extract_strided_slice %474 {offsets = [0, 64], sizes = [2, 32], strides = [1, 1]} : vector<2x96xf32> to vector<2x32xf32>
    %493 = arith.addf %492, %7 : vector<2x32xf32>
    %494 = arith.mulf %482, %493 : vector<2x32xf32>
    %495 = arith.addf %491, %494 : vector<2x32xf32>
    %496 = math.tanh %495 : vector<2x32xf32>
    %cst_134 = arith.constant 1.000000e+00 : f32
    %497 = vector.broadcast %cst_134 : f32 to vector<2x32xf32>
    %498 = arith.subf %497, %490 : vector<2x32xf32>
    %499 = arith.mulf %498, %496 : vector<2x32xf32>
    %500 = arith.mulf %490, %430 : vector<2x32xf32>
    %501 = arith.addf %499, %500 : vector<2x32xf32>
    %c1_135 = arith.constant 1 : index
    %502 = arith.index_cast %470 : i32 to index
    %c0_136 = arith.constant 0 : index
    %c0_137 = arith.constant 0 : index
    %503 = vector.load %arg6[%c1_135, %502, %c0_136, %c0_137] : memref<2x8x2x32xf32, #tpu.memory_space<vmem>>, vector<1x1x2x32xf32>
    %504 = vector.shape_cast %503 : vector<1x1x2x32xf32> to vector<2x32xf32>
    %505 = vector.shape_cast %501 : vector<2x32xf32> to vector<1x1x2x32xf32>
    tpu.vector_store %arg6[%c1_135, %502, %c0_136, %c0_137], %505 {strides = array<i32>} : memref<2x8x2x32xf32, #tpu.memory_space<vmem>>, vector<1x1x2x32xf32>,
    %c7_i32_138 = arith.constant 7 : i32
    %506 = arith.index_cast %c7_i32_138 : i32 to index
    %c0_139 = arith.constant 0 : index
    %c0_140 = arith.constant 0 : index
    %507 = vector.load %arg0[%506, %c0_139, %c0_140] : memref<8x2x96xf32, #tpu.memory_space<vmem>>, vector<1x2x96xf32>
    %508 = vector.shape_cast %507 : vector<1x2x96xf32> to vector<2x96xf32>
    %cst_141 = arith.constant dense<0.000000e+00> : vector<2x96xf32>
    %509 = tpu.matmul %465, %0, %cst_141 {dimension_numbers = #tpu.dot_dimension_numbers<[1], [0], [0], [1], [0, 0, 1, 1], [], []>} : vector<2x32xf32>, vector<32x96xf32>, vector<2x96xf32> -> vector<2x96xf32>
    %510 = vector.extract_strided_slice %508 {offsets = [0, 0], sizes = [2, 32], strides = [1, 1]} : vector<2x96xf32> to vector<2x32xf32>
    %511 = vector.extract_strided_slice %509 {offsets = [0, 0], sizes = [2, 32], strides = [1, 1]} : vector<2x96xf32> to vector<2x32xf32>
    %512 = arith.addf %510, %511 : vector<2x32xf32>
    %513 = arith.negf %512 : vector<2x32xf32>
    %514 = math.exp %513 : vector<2x32xf32>
    %cst_142 = arith.constant 1.000000e+00 : f32
    %515 = vector.broadcast %cst_142 : f32 to vector<2x32xf32>
    %516 = arith.addf %515, %514 : vector<2x32xf32>
    %517 = arith.divf %515, %516 : vector<2x32xf32>
    %518 = vector.extract_strided_slice %508 {offsets = [0, 32], sizes = [2, 32], strides = [1, 1]} : vector<2x96xf32> to vector<2x32xf32>
    %519 = vector.extract_strided_slice %509 {offsets = [0, 32], sizes = [2, 32], strides = [1, 1]} : vector<2x96xf32> to vector<2x32xf32>
    %520 = arith.addf %518, %519 : vector<2x32xf32>
    %521 = arith.negf %520 : vector<2x32xf32>
    %522 = math.exp %521 : vector<2x32xf32>
    %cst_143 = arith.constant 1.000000e+00 : f32
    %523 = vector.broadcast %cst_143 : f32 to vector<2x32xf32>
    %524 = arith.addf %523, %522 : vector<2x32xf32>
    %525 = arith.divf %523, %524 : vector<2x32xf32>
    %526 = vector.extract_strided_slice %508 {offsets = [0, 64], sizes = [2, 32], strides = [1, 1]} : vector<2x96xf32> to vector<2x32xf32>
    %527 = vector.extract_strided_slice %509 {offsets = [0, 64], sizes = [2, 32], strides = [1, 1]} : vector<2x96xf32> to vector<2x32xf32>
    %528 = arith.addf %527, %4 : vector<2x32xf32>
    %529 = arith.mulf %517, %528 : vector<2x32xf32>
    %530 = arith.addf %526, %529 : vector<2x32xf32>
    %531 = math.tanh %530 : vector<2x32xf32>
    %cst_144 = arith.constant 1.000000e+00 : f32
    %532 = vector.broadcast %cst_144 : f32 to vector<2x32xf32>
    %533 = arith.subf %532, %525 : vector<2x32xf32>
    %534 = arith.mulf %533, %531 : vector<2x32xf32>
    %535 = arith.mulf %525, %465 : vector<2x32xf32>
    %536 = arith.addf %534, %535 : vector<2x32xf32>
    %c0_145 = arith.constant 0 : index
    %537 = arith.index_cast %c7_i32_138 : i32 to index
    %c0_146 = arith.constant 0 : index
    %c0_147 = arith.constant 0 : index
    %538 = vector.load %arg6[%c0_145, %537, %c0_146, %c0_147] : memref<2x8x2x32xf32, #tpu.memory_space<vmem>>, vector<1x1x2x32xf32>
    %539 = vector.shape_cast %538 : vector<1x1x2x32xf32> to vector<2x32xf32>
    %540 = vector.shape_cast %536 : vector<2x32xf32> to vector<1x1x2x32xf32>
    tpu.vector_store %arg6[%c0_145, %537, %c0_146, %c0_147], %540 {strides = array<i32>} : memref<2x8x2x32xf32, #tpu.memory_space<vmem>>, vector<1x1x2x32xf32>,
    %c7_i32_148 = arith.constant 7 : i32
    %541 = arith.subi %c7_i32_148, %c7_i32_138 : i32
    %542 = arith.index_cast %541 : i32 to index
    %c0_149 = arith.constant 0 : index
    %c0_150 = arith.constant 0 : index
    %543 = vector.load %arg1[%542, %c0_149, %c0_150] : memref<8x2x96xf32, #tpu.memory_space<vmem>>, vector<1x2x96xf32>
    %544 = vector.shape_cast %543 : vector<1x2x96xf32> to vector<2x96xf32>
    %cst_151 = arith.constant dense<0.000000e+00> : vector<2x96xf32>
    %545 = tpu.matmul %501, %1, %cst_151 {dimension_numbers = #tpu.dot_dimension_numbers<[1], [0], [0], [1], [0, 0, 1, 1], [], []>} : vector<2x32xf32>, vector<32x96xf32>, vector<2x96xf32> -> vector<2x96xf32>
    %546 = vector.extract_strided_slice %544 {offsets = [0, 0], sizes = [2, 32], strides = [1, 1]} : vector<2x96xf32> to vector<2x32xf32>
    %547 = vector.extract_strided_slice %545 {offsets = [0, 0], sizes = [2, 32], strides = [1, 1]} : vector<2x96xf32> to vector<2x32xf32>
    %548 = arith.addf %546, %547 : vector<2x32xf32>
    %549 = arith.negf %548 : vector<2x32xf32>
    %550 = math.exp %549 : vector<2x32xf32>
    %cst_152 = arith.constant 1.000000e+00 : f32
    %551 = vector.broadcast %cst_152 : f32 to vector<2x32xf32>
    %552 = arith.addf %551, %550 : vector<2x32xf32>
    %553 = arith.divf %551, %552 : vector<2x32xf32>
    %554 = vector.extract_strided_slice %544 {offsets = [0, 32], sizes = [2, 32], strides = [1, 1]} : vector<2x96xf32> to vector<2x32xf32>
    %555 = vector.extract_strided_slice %545 {offsets = [0, 32], sizes = [2, 32], strides = [1, 1]} : vector<2x96xf32> to vector<2x32xf32>
    %556 = arith.addf %554, %555 : vector<2x32xf32>
    %557 = arith.negf %556 : vector<2x32xf32>
    %558 = math.exp %557 : vector<2x32xf32>
    %cst_153 = arith.constant 1.000000e+00 : f32
    %559 = vector.broadcast %cst_153 : f32 to vector<2x32xf32>
    %560 = arith.addf %559, %558 : vector<2x32xf32>
    %561 = arith.divf %559, %560 : vector<2x32xf32>
    %562 = vector.extract_strided_slice %544 {offsets = [0, 64], sizes = [2, 32], strides = [1, 1]} : vector<2x96xf32> to vector<2x32xf32>
    %563 = vector.extract_strided_slice %545 {offsets = [0, 64], sizes = [2, 32], strides = [1, 1]} : vector<2x96xf32> to vector<2x32xf32>
    %564 = arith.addf %563, %7 : vector<2x32xf32>
    %565 = arith.mulf %553, %564 : vector<2x32xf32>
    %566 = arith.addf %562, %565 : vector<2x32xf32>
    %567 = math.tanh %566 : vector<2x32xf32>
    %cst_154 = arith.constant 1.000000e+00 : f32
    %568 = vector.broadcast %cst_154 : f32 to vector<2x32xf32>
    %569 = arith.subf %568, %561 : vector<2x32xf32>
    %570 = arith.mulf %569, %567 : vector<2x32xf32>
    %571 = arith.mulf %561, %501 : vector<2x32xf32>
    %572 = arith.addf %570, %571 : vector<2x32xf32>
    %c1_155 = arith.constant 1 : index
    %573 = arith.index_cast %541 : i32 to index
    %c0_156 = arith.constant 0 : index
    %c0_157 = arith.constant 0 : index
    %574 = vector.load %arg6[%c1_155, %573, %c0_156, %c0_157] : memref<2x8x2x32xf32, #tpu.memory_space<vmem>>, vector<1x1x2x32xf32>
    %575 = vector.shape_cast %574 : vector<1x1x2x32xf32> to vector<2x32xf32>
    %576 = vector.shape_cast %572 : vector<2x32xf32> to vector<1x1x2x32xf32>
    tpu.vector_store %arg6[%c1_155, %573, %c0_156, %c0_157], %576 {strides = array<i32>} : memref<2x8x2x32xf32, #tpu.memory_space<vmem>>, vector<1x1x2x32xf32>,
    %c8_i32 = arith.constant 8 : i32
    return
  }
}

module attributes {stable_mosaic.version = 11 : i64} {
  func.func @gru_top_layer_head_kernel(%arg0: memref<8x2x96xf32, #tpu.memory_space<vmem>>, %arg1: memref<2x96xf32, #tpu.memory_space<vmem>>, %arg2: memref<32x96xf32, #tpu.memory_space<vmem>>, %arg3: memref<32x96xf32, #tpu.memory_space<vmem>>, %arg4: memref<1x32xf32, #tpu.memory_space<vmem>>, %arg5: memref<1x32xf32, #tpu.memory_space<vmem>>, %arg6: memref<64x2xf32, #tpu.memory_space<vmem>>, %arg7: memref<1x2xf32, #tpu.memory_space<vmem>>, %arg8: memref<2x2xf32, #tpu.memory_space<vmem>>, %arg9: memref<2x2x32xf32, #tpu.memory_space<vmem>>) attributes {dimension_semantics = [], scalar_prefetch = 0 : i64, scratch_operands = 0 : i64, tpu.core_type = #tpu.core_type<tc>} {
    %c0 = arith.constant 0 : index
    %c0_0 = arith.constant 0 : index
    %0 = vector.load %arg2[%c0, %c0_0] : memref<32x96xf32, #tpu.memory_space<vmem>>, vector<32x96xf32>
    %c0_1 = arith.constant 0 : index
    %c0_2 = arith.constant 0 : index
    %1 = vector.load %arg4[%c0_1, %c0_2] : memref<1x32xf32, #tpu.memory_space<vmem>>, vector<1x32xf32>
    %2 = vector.shape_cast %1 : vector<1x32xf32> to vector<1x32xf32>
    %3 = vector.broadcast %2 : vector<1x32xf32> to vector<2x32xf32>
    %c0_3 = arith.constant 0 : index
    %c0_4 = arith.constant 0 : index
    %4 = vector.load %arg5[%c0_3, %c0_4] : memref<1x32xf32, #tpu.memory_space<vmem>>, vector<1x32xf32>
    %5 = vector.shape_cast %4 : vector<1x32xf32> to vector<1x32xf32>
    %6 = vector.broadcast %5 : vector<1x32xf32> to vector<2x32xf32>
    %cst = arith.constant 0.000000e+00 : f32
    %7 = vector.broadcast %cst : f32 to vector<2x32xf32>
    %c0_i32 = arith.constant 0 : i32
    %8 = arith.index_cast %c0_i32 : i32 to index
    %c0_5 = arith.constant 0 : index
    %c0_6 = arith.constant 0 : index
    %9 = vector.load %arg0[%8, %c0_5, %c0_6] : memref<8x2x96xf32, #tpu.memory_space<vmem>>, vector<1x2x96xf32>
    %10 = vector.shape_cast %9 : vector<1x2x96xf32> to vector<2x96xf32>
    %cst_7 = arith.constant dense<0.000000e+00> : vector<2x96xf32>
    %11 = tpu.matmul %7, %0, %cst_7 {dimension_numbers = #tpu.dot_dimension_numbers<[1], [0], [0], [1], [0, 0, 1, 1], [], []>} : vector<2x32xf32>, vector<32x96xf32>, vector<2x96xf32> -> vector<2x96xf32>
    %12 = vector.extract_strided_slice %10 {offsets = [0, 0], sizes = [2, 32], strides = [1, 1]} : vector<2x96xf32> to vector<2x32xf32>
    %13 = vector.extract_strided_slice %11 {offsets = [0, 0], sizes = [2, 32], strides = [1, 1]} : vector<2x96xf32> to vector<2x32xf32>
    %14 = arith.addf %12, %13 : vector<2x32xf32>
    %15 = arith.negf %14 : vector<2x32xf32>
    %16 = math.exp %15 : vector<2x32xf32>
    %cst_8 = arith.constant 1.000000e+00 : f32
    %17 = vector.broadcast %cst_8 : f32 to vector<2x32xf32>
    %18 = arith.addf %17, %16 : vector<2x32xf32>
    %19 = arith.divf %17, %18 : vector<2x32xf32>
    %20 = vector.extract_strided_slice %10 {offsets = [0, 32], sizes = [2, 32], strides = [1, 1]} : vector<2x96xf32> to vector<2x32xf32>
    %21 = vector.extract_strided_slice %11 {offsets = [0, 32], sizes = [2, 32], strides = [1, 1]} : vector<2x96xf32> to vector<2x32xf32>
    %22 = arith.addf %20, %21 : vector<2x32xf32>
    %23 = arith.negf %22 : vector<2x32xf32>
    %24 = math.exp %23 : vector<2x32xf32>
    %cst_9 = arith.constant 1.000000e+00 : f32
    %25 = vector.broadcast %cst_9 : f32 to vector<2x32xf32>
    %26 = arith.addf %25, %24 : vector<2x32xf32>
    %27 = arith.divf %25, %26 : vector<2x32xf32>
    %28 = vector.extract_strided_slice %10 {offsets = [0, 64], sizes = [2, 32], strides = [1, 1]} : vector<2x96xf32> to vector<2x32xf32>
    %29 = vector.extract_strided_slice %11 {offsets = [0, 64], sizes = [2, 32], strides = [1, 1]} : vector<2x96xf32> to vector<2x32xf32>
    %30 = arith.addf %29, %3 : vector<2x32xf32>
    %31 = arith.mulf %19, %30 : vector<2x32xf32>
    %32 = arith.addf %28, %31 : vector<2x32xf32>
    %33 = math.tanh %32 : vector<2x32xf32>
    %cst_10 = arith.constant 1.000000e+00 : f32
    %34 = vector.broadcast %cst_10 : f32 to vector<2x32xf32>
    %35 = arith.subf %34, %27 : vector<2x32xf32>
    %36 = arith.mulf %35, %33 : vector<2x32xf32>
    %37 = arith.mulf %27, %7 : vector<2x32xf32>
    %38 = arith.addf %36, %37 : vector<2x32xf32>
    %c1_i32 = arith.constant 1 : i32
    %39 = arith.index_cast %c1_i32 : i32 to index
    %c0_11 = arith.constant 0 : index
    %c0_12 = arith.constant 0 : index
    %40 = vector.load %arg0[%39, %c0_11, %c0_12] : memref<8x2x96xf32, #tpu.memory_space<vmem>>, vector<1x2x96xf32>
    %41 = vector.shape_cast %40 : vector<1x2x96xf32> to vector<2x96xf32>
    %cst_13 = arith.constant dense<0.000000e+00> : vector<2x96xf32>
    %42 = tpu.matmul %38, %0, %cst_13 {dimension_numbers = #tpu.dot_dimension_numbers<[1], [0], [0], [1], [0, 0, 1, 1], [], []>} : vector<2x32xf32>, vector<32x96xf32>, vector<2x96xf32> -> vector<2x96xf32>
    %43 = vector.extract_strided_slice %41 {offsets = [0, 0], sizes = [2, 32], strides = [1, 1]} : vector<2x96xf32> to vector<2x32xf32>
    %44 = vector.extract_strided_slice %42 {offsets = [0, 0], sizes = [2, 32], strides = [1, 1]} : vector<2x96xf32> to vector<2x32xf32>
    %45 = arith.addf %43, %44 : vector<2x32xf32>
    %46 = arith.negf %45 : vector<2x32xf32>
    %47 = math.exp %46 : vector<2x32xf32>
    %cst_14 = arith.constant 1.000000e+00 : f32
    %48 = vector.broadcast %cst_14 : f32 to vector<2x32xf32>
    %49 = arith.addf %48, %47 : vector<2x32xf32>
    %50 = arith.divf %48, %49 : vector<2x32xf32>
    %51 = vector.extract_strided_slice %41 {offsets = [0, 32], sizes = [2, 32], strides = [1, 1]} : vector<2x96xf32> to vector<2x32xf32>
    %52 = vector.extract_strided_slice %42 {offsets = [0, 32], sizes = [2, 32], strides = [1, 1]} : vector<2x96xf32> to vector<2x32xf32>
    %53 = arith.addf %51, %52 : vector<2x32xf32>
    %54 = arith.negf %53 : vector<2x32xf32>
    %55 = math.exp %54 : vector<2x32xf32>
    %cst_15 = arith.constant 1.000000e+00 : f32
    %56 = vector.broadcast %cst_15 : f32 to vector<2x32xf32>
    %57 = arith.addf %56, %55 : vector<2x32xf32>
    %58 = arith.divf %56, %57 : vector<2x32xf32>
    %59 = vector.extract_strided_slice %41 {offsets = [0, 64], sizes = [2, 32], strides = [1, 1]} : vector<2x96xf32> to vector<2x32xf32>
    %60 = vector.extract_strided_slice %42 {offsets = [0, 64], sizes = [2, 32], strides = [1, 1]} : vector<2x96xf32> to vector<2x32xf32>
    %61 = arith.addf %60, %3 : vector<2x32xf32>
    %62 = arith.mulf %50, %61 : vector<2x32xf32>
    %63 = arith.addf %59, %62 : vector<2x32xf32>
    %64 = math.tanh %63 : vector<2x32xf32>
    %cst_16 = arith.constant 1.000000e+00 : f32
    %65 = vector.broadcast %cst_16 : f32 to vector<2x32xf32>
    %66 = arith.subf %65, %58 : vector<2x32xf32>
    %67 = arith.mulf %66, %64 : vector<2x32xf32>
    %68 = arith.mulf %58, %38 : vector<2x32xf32>
    %69 = arith.addf %67, %68 : vector<2x32xf32>
    %c2_i32 = arith.constant 2 : i32
    %70 = arith.index_cast %c2_i32 : i32 to index
    %c0_17 = arith.constant 0 : index
    %c0_18 = arith.constant 0 : index
    %71 = vector.load %arg0[%70, %c0_17, %c0_18] : memref<8x2x96xf32, #tpu.memory_space<vmem>>, vector<1x2x96xf32>
    %72 = vector.shape_cast %71 : vector<1x2x96xf32> to vector<2x96xf32>
    %cst_19 = arith.constant dense<0.000000e+00> : vector<2x96xf32>
    %73 = tpu.matmul %69, %0, %cst_19 {dimension_numbers = #tpu.dot_dimension_numbers<[1], [0], [0], [1], [0, 0, 1, 1], [], []>} : vector<2x32xf32>, vector<32x96xf32>, vector<2x96xf32> -> vector<2x96xf32>
    %74 = vector.extract_strided_slice %72 {offsets = [0, 0], sizes = [2, 32], strides = [1, 1]} : vector<2x96xf32> to vector<2x32xf32>
    %75 = vector.extract_strided_slice %73 {offsets = [0, 0], sizes = [2, 32], strides = [1, 1]} : vector<2x96xf32> to vector<2x32xf32>
    %76 = arith.addf %74, %75 : vector<2x32xf32>
    %77 = arith.negf %76 : vector<2x32xf32>
    %78 = math.exp %77 : vector<2x32xf32>
    %cst_20 = arith.constant 1.000000e+00 : f32
    %79 = vector.broadcast %cst_20 : f32 to vector<2x32xf32>
    %80 = arith.addf %79, %78 : vector<2x32xf32>
    %81 = arith.divf %79, %80 : vector<2x32xf32>
    %82 = vector.extract_strided_slice %72 {offsets = [0, 32], sizes = [2, 32], strides = [1, 1]} : vector<2x96xf32> to vector<2x32xf32>
    %83 = vector.extract_strided_slice %73 {offsets = [0, 32], sizes = [2, 32], strides = [1, 1]} : vector<2x96xf32> to vector<2x32xf32>
    %84 = arith.addf %82, %83 : vector<2x32xf32>
    %85 = arith.negf %84 : vector<2x32xf32>
    %86 = math.exp %85 : vector<2x32xf32>
    %cst_21 = arith.constant 1.000000e+00 : f32
    %87 = vector.broadcast %cst_21 : f32 to vector<2x32xf32>
    %88 = arith.addf %87, %86 : vector<2x32xf32>
    %89 = arith.divf %87, %88 : vector<2x32xf32>
    %90 = vector.extract_strided_slice %72 {offsets = [0, 64], sizes = [2, 32], strides = [1, 1]} : vector<2x96xf32> to vector<2x32xf32>
    %91 = vector.extract_strided_slice %73 {offsets = [0, 64], sizes = [2, 32], strides = [1, 1]} : vector<2x96xf32> to vector<2x32xf32>
    %92 = arith.addf %91, %3 : vector<2x32xf32>
    %93 = arith.mulf %81, %92 : vector<2x32xf32>
    %94 = arith.addf %90, %93 : vector<2x32xf32>
    %95 = math.tanh %94 : vector<2x32xf32>
    %cst_22 = arith.constant 1.000000e+00 : f32
    %96 = vector.broadcast %cst_22 : f32 to vector<2x32xf32>
    %97 = arith.subf %96, %89 : vector<2x32xf32>
    %98 = arith.mulf %97, %95 : vector<2x32xf32>
    %99 = arith.mulf %89, %69 : vector<2x32xf32>
    %100 = arith.addf %98, %99 : vector<2x32xf32>
    %c3_i32 = arith.constant 3 : i32
    %101 = arith.index_cast %c3_i32 : i32 to index
    %c0_23 = arith.constant 0 : index
    %c0_24 = arith.constant 0 : index
    %102 = vector.load %arg0[%101, %c0_23, %c0_24] : memref<8x2x96xf32, #tpu.memory_space<vmem>>, vector<1x2x96xf32>
    %103 = vector.shape_cast %102 : vector<1x2x96xf32> to vector<2x96xf32>
    %cst_25 = arith.constant dense<0.000000e+00> : vector<2x96xf32>
    %104 = tpu.matmul %100, %0, %cst_25 {dimension_numbers = #tpu.dot_dimension_numbers<[1], [0], [0], [1], [0, 0, 1, 1], [], []>} : vector<2x32xf32>, vector<32x96xf32>, vector<2x96xf32> -> vector<2x96xf32>
    %105 = vector.extract_strided_slice %103 {offsets = [0, 0], sizes = [2, 32], strides = [1, 1]} : vector<2x96xf32> to vector<2x32xf32>
    %106 = vector.extract_strided_slice %104 {offsets = [0, 0], sizes = [2, 32], strides = [1, 1]} : vector<2x96xf32> to vector<2x32xf32>
    %107 = arith.addf %105, %106 : vector<2x32xf32>
    %108 = arith.negf %107 : vector<2x32xf32>
    %109 = math.exp %108 : vector<2x32xf32>
    %cst_26 = arith.constant 1.000000e+00 : f32
    %110 = vector.broadcast %cst_26 : f32 to vector<2x32xf32>
    %111 = arith.addf %110, %109 : vector<2x32xf32>
    %112 = arith.divf %110, %111 : vector<2x32xf32>
    %113 = vector.extract_strided_slice %103 {offsets = [0, 32], sizes = [2, 32], strides = [1, 1]} : vector<2x96xf32> to vector<2x32xf32>
    %114 = vector.extract_strided_slice %104 {offsets = [0, 32], sizes = [2, 32], strides = [1, 1]} : vector<2x96xf32> to vector<2x32xf32>
    %115 = arith.addf %113, %114 : vector<2x32xf32>
    %116 = arith.negf %115 : vector<2x32xf32>
    %117 = math.exp %116 : vector<2x32xf32>
    %cst_27 = arith.constant 1.000000e+00 : f32
    %118 = vector.broadcast %cst_27 : f32 to vector<2x32xf32>
    %119 = arith.addf %118, %117 : vector<2x32xf32>
    %120 = arith.divf %118, %119 : vector<2x32xf32>
    %121 = vector.extract_strided_slice %103 {offsets = [0, 64], sizes = [2, 32], strides = [1, 1]} : vector<2x96xf32> to vector<2x32xf32>
    %122 = vector.extract_strided_slice %104 {offsets = [0, 64], sizes = [2, 32], strides = [1, 1]} : vector<2x96xf32> to vector<2x32xf32>
    %123 = arith.addf %122, %3 : vector<2x32xf32>
    %124 = arith.mulf %112, %123 : vector<2x32xf32>
    %125 = arith.addf %121, %124 : vector<2x32xf32>
    %126 = math.tanh %125 : vector<2x32xf32>
    %cst_28 = arith.constant 1.000000e+00 : f32
    %127 = vector.broadcast %cst_28 : f32 to vector<2x32xf32>
    %128 = arith.subf %127, %120 : vector<2x32xf32>
    %129 = arith.mulf %128, %126 : vector<2x32xf32>
    %130 = arith.mulf %120, %100 : vector<2x32xf32>
    %131 = arith.addf %129, %130 : vector<2x32xf32>
    %c4_i32 = arith.constant 4 : i32
    %132 = arith.index_cast %c4_i32 : i32 to index
    %c0_29 = arith.constant 0 : index
    %c0_30 = arith.constant 0 : index
    %133 = vector.load %arg0[%132, %c0_29, %c0_30] : memref<8x2x96xf32, #tpu.memory_space<vmem>>, vector<1x2x96xf32>
    %134 = vector.shape_cast %133 : vector<1x2x96xf32> to vector<2x96xf32>
    %cst_31 = arith.constant dense<0.000000e+00> : vector<2x96xf32>
    %135 = tpu.matmul %131, %0, %cst_31 {dimension_numbers = #tpu.dot_dimension_numbers<[1], [0], [0], [1], [0, 0, 1, 1], [], []>} : vector<2x32xf32>, vector<32x96xf32>, vector<2x96xf32> -> vector<2x96xf32>
    %136 = vector.extract_strided_slice %134 {offsets = [0, 0], sizes = [2, 32], strides = [1, 1]} : vector<2x96xf32> to vector<2x32xf32>
    %137 = vector.extract_strided_slice %135 {offsets = [0, 0], sizes = [2, 32], strides = [1, 1]} : vector<2x96xf32> to vector<2x32xf32>
    %138 = arith.addf %136, %137 : vector<2x32xf32>
    %139 = arith.negf %138 : vector<2x32xf32>
    %140 = math.exp %139 : vector<2x32xf32>
    %cst_32 = arith.constant 1.000000e+00 : f32
    %141 = vector.broadcast %cst_32 : f32 to vector<2x32xf32>
    %142 = arith.addf %141, %140 : vector<2x32xf32>
    %143 = arith.divf %141, %142 : vector<2x32xf32>
    %144 = vector.extract_strided_slice %134 {offsets = [0, 32], sizes = [2, 32], strides = [1, 1]} : vector<2x96xf32> to vector<2x32xf32>
    %145 = vector.extract_strided_slice %135 {offsets = [0, 32], sizes = [2, 32], strides = [1, 1]} : vector<2x96xf32> to vector<2x32xf32>
    %146 = arith.addf %144, %145 : vector<2x32xf32>
    %147 = arith.negf %146 : vector<2x32xf32>
    %148 = math.exp %147 : vector<2x32xf32>
    %cst_33 = arith.constant 1.000000e+00 : f32
    %149 = vector.broadcast %cst_33 : f32 to vector<2x32xf32>
    %150 = arith.addf %149, %148 : vector<2x32xf32>
    %151 = arith.divf %149, %150 : vector<2x32xf32>
    %152 = vector.extract_strided_slice %134 {offsets = [0, 64], sizes = [2, 32], strides = [1, 1]} : vector<2x96xf32> to vector<2x32xf32>
    %153 = vector.extract_strided_slice %135 {offsets = [0, 64], sizes = [2, 32], strides = [1, 1]} : vector<2x96xf32> to vector<2x32xf32>
    %154 = arith.addf %153, %3 : vector<2x32xf32>
    %155 = arith.mulf %143, %154 : vector<2x32xf32>
    %156 = arith.addf %152, %155 : vector<2x32xf32>
    %157 = math.tanh %156 : vector<2x32xf32>
    %cst_34 = arith.constant 1.000000e+00 : f32
    %158 = vector.broadcast %cst_34 : f32 to vector<2x32xf32>
    %159 = arith.subf %158, %151 : vector<2x32xf32>
    %160 = arith.mulf %159, %157 : vector<2x32xf32>
    %161 = arith.mulf %151, %131 : vector<2x32xf32>
    %162 = arith.addf %160, %161 : vector<2x32xf32>
    %c5_i32 = arith.constant 5 : i32
    %163 = arith.index_cast %c5_i32 : i32 to index
    %c0_35 = arith.constant 0 : index
    %c0_36 = arith.constant 0 : index
    %164 = vector.load %arg0[%163, %c0_35, %c0_36] : memref<8x2x96xf32, #tpu.memory_space<vmem>>, vector<1x2x96xf32>
    %165 = vector.shape_cast %164 : vector<1x2x96xf32> to vector<2x96xf32>
    %cst_37 = arith.constant dense<0.000000e+00> : vector<2x96xf32>
    %166 = tpu.matmul %162, %0, %cst_37 {dimension_numbers = #tpu.dot_dimension_numbers<[1], [0], [0], [1], [0, 0, 1, 1], [], []>} : vector<2x32xf32>, vector<32x96xf32>, vector<2x96xf32> -> vector<2x96xf32>
    %167 = vector.extract_strided_slice %165 {offsets = [0, 0], sizes = [2, 32], strides = [1, 1]} : vector<2x96xf32> to vector<2x32xf32>
    %168 = vector.extract_strided_slice %166 {offsets = [0, 0], sizes = [2, 32], strides = [1, 1]} : vector<2x96xf32> to vector<2x32xf32>
    %169 = arith.addf %167, %168 : vector<2x32xf32>
    %170 = arith.negf %169 : vector<2x32xf32>
    %171 = math.exp %170 : vector<2x32xf32>
    %cst_38 = arith.constant 1.000000e+00 : f32
    %172 = vector.broadcast %cst_38 : f32 to vector<2x32xf32>
    %173 = arith.addf %172, %171 : vector<2x32xf32>
    %174 = arith.divf %172, %173 : vector<2x32xf32>
    %175 = vector.extract_strided_slice %165 {offsets = [0, 32], sizes = [2, 32], strides = [1, 1]} : vector<2x96xf32> to vector<2x32xf32>
    %176 = vector.extract_strided_slice %166 {offsets = [0, 32], sizes = [2, 32], strides = [1, 1]} : vector<2x96xf32> to vector<2x32xf32>
    %177 = arith.addf %175, %176 : vector<2x32xf32>
    %178 = arith.negf %177 : vector<2x32xf32>
    %179 = math.exp %178 : vector<2x32xf32>
    %cst_39 = arith.constant 1.000000e+00 : f32
    %180 = vector.broadcast %cst_39 : f32 to vector<2x32xf32>
    %181 = arith.addf %180, %179 : vector<2x32xf32>
    %182 = arith.divf %180, %181 : vector<2x32xf32>
    %183 = vector.extract_strided_slice %165 {offsets = [0, 64], sizes = [2, 32], strides = [1, 1]} : vector<2x96xf32> to vector<2x32xf32>
    %184 = vector.extract_strided_slice %166 {offsets = [0, 64], sizes = [2, 32], strides = [1, 1]} : vector<2x96xf32> to vector<2x32xf32>
    %185 = arith.addf %184, %3 : vector<2x32xf32>
    %186 = arith.mulf %174, %185 : vector<2x32xf32>
    %187 = arith.addf %183, %186 : vector<2x32xf32>
    %188 = math.tanh %187 : vector<2x32xf32>
    %cst_40 = arith.constant 1.000000e+00 : f32
    %189 = vector.broadcast %cst_40 : f32 to vector<2x32xf32>
    %190 = arith.subf %189, %182 : vector<2x32xf32>
    %191 = arith.mulf %190, %188 : vector<2x32xf32>
    %192 = arith.mulf %182, %162 : vector<2x32xf32>
    %193 = arith.addf %191, %192 : vector<2x32xf32>
    %c6_i32 = arith.constant 6 : i32
    %194 = arith.index_cast %c6_i32 : i32 to index
    %c0_41 = arith.constant 0 : index
    %c0_42 = arith.constant 0 : index
    %195 = vector.load %arg0[%194, %c0_41, %c0_42] : memref<8x2x96xf32, #tpu.memory_space<vmem>>, vector<1x2x96xf32>
    %196 = vector.shape_cast %195 : vector<1x2x96xf32> to vector<2x96xf32>
    %cst_43 = arith.constant dense<0.000000e+00> : vector<2x96xf32>
    %197 = tpu.matmul %193, %0, %cst_43 {dimension_numbers = #tpu.dot_dimension_numbers<[1], [0], [0], [1], [0, 0, 1, 1], [], []>} : vector<2x32xf32>, vector<32x96xf32>, vector<2x96xf32> -> vector<2x96xf32>
    %198 = vector.extract_strided_slice %196 {offsets = [0, 0], sizes = [2, 32], strides = [1, 1]} : vector<2x96xf32> to vector<2x32xf32>
    %199 = vector.extract_strided_slice %197 {offsets = [0, 0], sizes = [2, 32], strides = [1, 1]} : vector<2x96xf32> to vector<2x32xf32>
    %200 = arith.addf %198, %199 : vector<2x32xf32>
    %201 = arith.negf %200 : vector<2x32xf32>
    %202 = math.exp %201 : vector<2x32xf32>
    %cst_44 = arith.constant 1.000000e+00 : f32
    %203 = vector.broadcast %cst_44 : f32 to vector<2x32xf32>
    %204 = arith.addf %203, %202 : vector<2x32xf32>
    %205 = arith.divf %203, %204 : vector<2x32xf32>
    %206 = vector.extract_strided_slice %196 {offsets = [0, 32], sizes = [2, 32], strides = [1, 1]} : vector<2x96xf32> to vector<2x32xf32>
    %207 = vector.extract_strided_slice %197 {offsets = [0, 32], sizes = [2, 32], strides = [1, 1]} : vector<2x96xf32> to vector<2x32xf32>
    %208 = arith.addf %206, %207 : vector<2x32xf32>
    %209 = arith.negf %208 : vector<2x32xf32>
    %210 = math.exp %209 : vector<2x32xf32>
    %cst_45 = arith.constant 1.000000e+00 : f32
    %211 = vector.broadcast %cst_45 : f32 to vector<2x32xf32>
    %212 = arith.addf %211, %210 : vector<2x32xf32>
    %213 = arith.divf %211, %212 : vector<2x32xf32>
    %214 = vector.extract_strided_slice %196 {offsets = [0, 64], sizes = [2, 32], strides = [1, 1]} : vector<2x96xf32> to vector<2x32xf32>
    %215 = vector.extract_strided_slice %197 {offsets = [0, 64], sizes = [2, 32], strides = [1, 1]} : vector<2x96xf32> to vector<2x32xf32>
    %216 = arith.addf %215, %3 : vector<2x32xf32>
    %217 = arith.mulf %205, %216 : vector<2x32xf32>
    %218 = arith.addf %214, %217 : vector<2x32xf32>
    %219 = math.tanh %218 : vector<2x32xf32>
    %cst_46 = arith.constant 1.000000e+00 : f32
    %220 = vector.broadcast %cst_46 : f32 to vector<2x32xf32>
    %221 = arith.subf %220, %213 : vector<2x32xf32>
    %222 = arith.mulf %221, %219 : vector<2x32xf32>
    %223 = arith.mulf %213, %193 : vector<2x32xf32>
    %224 = arith.addf %222, %223 : vector<2x32xf32>
    %c7_i32 = arith.constant 7 : i32
    %225 = arith.index_cast %c7_i32 : i32 to index
    %c0_47 = arith.constant 0 : index
    %c0_48 = arith.constant 0 : index
    %226 = vector.load %arg0[%225, %c0_47, %c0_48] : memref<8x2x96xf32, #tpu.memory_space<vmem>>, vector<1x2x96xf32>
    %227 = vector.shape_cast %226 : vector<1x2x96xf32> to vector<2x96xf32>
    %cst_49 = arith.constant dense<0.000000e+00> : vector<2x96xf32>
    %228 = tpu.matmul %224, %0, %cst_49 {dimension_numbers = #tpu.dot_dimension_numbers<[1], [0], [0], [1], [0, 0, 1, 1], [], []>} : vector<2x32xf32>, vector<32x96xf32>, vector<2x96xf32> -> vector<2x96xf32>
    %229 = vector.extract_strided_slice %227 {offsets = [0, 0], sizes = [2, 32], strides = [1, 1]} : vector<2x96xf32> to vector<2x32xf32>
    %230 = vector.extract_strided_slice %228 {offsets = [0, 0], sizes = [2, 32], strides = [1, 1]} : vector<2x96xf32> to vector<2x32xf32>
    %231 = arith.addf %229, %230 : vector<2x32xf32>
    %232 = arith.negf %231 : vector<2x32xf32>
    %233 = math.exp %232 : vector<2x32xf32>
    %cst_50 = arith.constant 1.000000e+00 : f32
    %234 = vector.broadcast %cst_50 : f32 to vector<2x32xf32>
    %235 = arith.addf %234, %233 : vector<2x32xf32>
    %236 = arith.divf %234, %235 : vector<2x32xf32>
    %237 = vector.extract_strided_slice %227 {offsets = [0, 32], sizes = [2, 32], strides = [1, 1]} : vector<2x96xf32> to vector<2x32xf32>
    %238 = vector.extract_strided_slice %228 {offsets = [0, 32], sizes = [2, 32], strides = [1, 1]} : vector<2x96xf32> to vector<2x32xf32>
    %239 = arith.addf %237, %238 : vector<2x32xf32>
    %240 = arith.negf %239 : vector<2x32xf32>
    %241 = math.exp %240 : vector<2x32xf32>
    %cst_51 = arith.constant 1.000000e+00 : f32
    %242 = vector.broadcast %cst_51 : f32 to vector<2x32xf32>
    %243 = arith.addf %242, %241 : vector<2x32xf32>
    %244 = arith.divf %242, %243 : vector<2x32xf32>
    %245 = vector.extract_strided_slice %227 {offsets = [0, 64], sizes = [2, 32], strides = [1, 1]} : vector<2x96xf32> to vector<2x32xf32>
    %246 = vector.extract_strided_slice %228 {offsets = [0, 64], sizes = [2, 32], strides = [1, 1]} : vector<2x96xf32> to vector<2x32xf32>
    %247 = arith.addf %246, %3 : vector<2x32xf32>
    %248 = arith.mulf %236, %247 : vector<2x32xf32>
    %249 = arith.addf %245, %248 : vector<2x32xf32>
    %250 = math.tanh %249 : vector<2x32xf32>
    %cst_52 = arith.constant 1.000000e+00 : f32
    %251 = vector.broadcast %cst_52 : f32 to vector<2x32xf32>
    %252 = arith.subf %251, %244 : vector<2x32xf32>
    %253 = arith.mulf %252, %250 : vector<2x32xf32>
    %254 = arith.mulf %244, %224 : vector<2x32xf32>
    %255 = arith.addf %253, %254 : vector<2x32xf32>
    %c8_i32 = arith.constant 8 : i32
    %c0_53 = arith.constant 0 : index
    %c0_54 = arith.constant 0 : index
    %256 = vector.load %arg1[%c0_53, %c0_54] : memref<2x96xf32, #tpu.memory_space<vmem>>, vector<2x96xf32>
    %c0_55 = arith.constant 0 : index
    %c0_56 = arith.constant 0 : index
    %257 = vector.load %arg3[%c0_55, %c0_56] : memref<32x96xf32, #tpu.memory_space<vmem>>, vector<32x96xf32>
    %cst_57 = arith.constant dense<0.000000e+00> : vector<2x96xf32>
    %258 = tpu.matmul %7, %257, %cst_57 {dimension_numbers = #tpu.dot_dimension_numbers<[1], [0], [0], [1], [0, 0, 1, 1], [], []>} : vector<2x32xf32>, vector<32x96xf32>, vector<2x96xf32> -> vector<2x96xf32>
    %259 = vector.extract_strided_slice %256 {offsets = [0, 0], sizes = [2, 32], strides = [1, 1]} : vector<2x96xf32> to vector<2x32xf32>
    %260 = vector.extract_strided_slice %258 {offsets = [0, 0], sizes = [2, 32], strides = [1, 1]} : vector<2x96xf32> to vector<2x32xf32>
    %261 = arith.addf %259, %260 : vector<2x32xf32>
    %262 = arith.negf %261 : vector<2x32xf32>
    %263 = math.exp %262 : vector<2x32xf32>
    %cst_58 = arith.constant 1.000000e+00 : f32
    %264 = vector.broadcast %cst_58 : f32 to vector<2x32xf32>
    %265 = arith.addf %264, %263 : vector<2x32xf32>
    %266 = arith.divf %264, %265 : vector<2x32xf32>
    %267 = vector.extract_strided_slice %256 {offsets = [0, 32], sizes = [2, 32], strides = [1, 1]} : vector<2x96xf32> to vector<2x32xf32>
    %268 = vector.extract_strided_slice %258 {offsets = [0, 32], sizes = [2, 32], strides = [1, 1]} : vector<2x96xf32> to vector<2x32xf32>
    %269 = arith.addf %267, %268 : vector<2x32xf32>
    %270 = arith.negf %269 : vector<2x32xf32>
    %271 = math.exp %270 : vector<2x32xf32>
    %cst_59 = arith.constant 1.000000e+00 : f32
    %272 = vector.broadcast %cst_59 : f32 to vector<2x32xf32>
    %273 = arith.addf %272, %271 : vector<2x32xf32>
    %274 = arith.divf %272, %273 : vector<2x32xf32>
    %275 = vector.extract_strided_slice %256 {offsets = [0, 64], sizes = [2, 32], strides = [1, 1]} : vector<2x96xf32> to vector<2x32xf32>
    %276 = vector.extract_strided_slice %258 {offsets = [0, 64], sizes = [2, 32], strides = [1, 1]} : vector<2x96xf32> to vector<2x32xf32>
    %277 = arith.addf %276, %6 : vector<2x32xf32>
    %278 = arith.mulf %266, %277 : vector<2x32xf32>
    %279 = arith.addf %275, %278 : vector<2x32xf32>
    %280 = math.tanh %279 : vector<2x32xf32>
    %cst_60 = arith.constant 1.000000e+00 : f32
    %281 = vector.broadcast %cst_60 : f32 to vector<2x32xf32>
    %282 = arith.subf %281, %274 : vector<2x32xf32>
    %283 = arith.mulf %282, %280 : vector<2x32xf32>
    %284 = arith.mulf %274, %7 : vector<2x32xf32>
    %285 = arith.addf %283, %284 : vector<2x32xf32>
    %286 = math.tanh %255 : vector<2x32xf32>
    %287 = math.tanh %285 : vector<2x32xf32>
    %c0_61 = arith.constant 0 : index
    %c0_62 = arith.constant 0 : index
    %c0_63 = arith.constant 0 : index
    %288 = vector.load %arg9[%c0_61, %c0_62, %c0_63] : memref<2x2x32xf32, #tpu.memory_space<vmem>>, vector<1x2x32xf32>
    %289 = vector.shape_cast %288 : vector<1x2x32xf32> to vector<2x32xf32>
    %290 = vector.shape_cast %286 : vector<2x32xf32> to vector<1x2x32xf32>
    tpu.vector_store %arg9[%c0_61, %c0_62, %c0_63], %290 {strides = array<i32>} : memref<2x2x32xf32, #tpu.memory_space<vmem>>, vector<1x2x32xf32>,
    %c1 = arith.constant 1 : index
    %c0_64 = arith.constant 0 : index
    %c0_65 = arith.constant 0 : index
    %291 = vector.load %arg9[%c1, %c0_64, %c0_65] : memref<2x2x32xf32, #tpu.memory_space<vmem>>, vector<1x2x32xf32>
    %292 = vector.shape_cast %291 : vector<1x2x32xf32> to vector<2x32xf32>
    %293 = vector.shape_cast %287 : vector<2x32xf32> to vector<1x2x32xf32>
    tpu.vector_store %arg9[%c1, %c0_64, %c0_65], %293 {strides = array<i32>} : memref<2x2x32xf32, #tpu.memory_space<vmem>>, vector<1x2x32xf32>,
    %c0_66 = arith.constant 0 : index
    %c0_67 = arith.constant 0 : index
    %294 = vector.load %arg6[%c0_66, %c0_67] : memref<64x2xf32, #tpu.memory_space<vmem>>, vector<32x2xf32>
    %cst_68 = arith.constant dense<0.000000e+00> : vector<2x2xf32>
    %295 = tpu.matmul %286, %294, %cst_68 {dimension_numbers = #tpu.dot_dimension_numbers<[1], [0], [0], [1], [0, 0, 1, 1], [], []>} : vector<2x32xf32>, vector<32x2xf32>, vector<2x2xf32> -> vector<2x2xf32>
    %c32 = arith.constant 32 : index
    %c0_69 = arith.constant 0 : index
    %296 = vector.load %arg6[%c32, %c0_69] : memref<64x2xf32, #tpu.memory_space<vmem>>, vector<32x2xf32>
    %cst_70 = arith.constant dense<0.000000e+00> : vector<2x2xf32>
    %297 = tpu.matmul %287, %296, %cst_70 {dimension_numbers = #tpu.dot_dimension_numbers<[1], [0], [0], [1], [0, 0, 1, 1], [], []>} : vector<2x32xf32>, vector<32x2xf32>, vector<2x2xf32> -> vector<2x2xf32>
    %298 = arith.addf %295, %297 : vector<2x2xf32>
    %c0_71 = arith.constant 0 : index
    %c0_72 = arith.constant 0 : index
    %299 = vector.load %arg7[%c0_71, %c0_72] : memref<1x2xf32, #tpu.memory_space<vmem>>, vector<1x2xf32>
    %300 = vector.broadcast %299 : vector<1x2xf32> to vector<2x2xf32>
    %301 = arith.addf %298, %300 : vector<2x2xf32>
    %c0_73 = arith.constant 0 : index
    %c0_74 = arith.constant 0 : index
    %302 = vector.load %arg8[%c0_73, %c0_74] : memref<2x2xf32, #tpu.memory_space<vmem>>, vector<2x2xf32>
    tpu.vector_store %arg8[%c0_73, %c0_74], %301 {strides = array<i32>} : memref<2x2xf32, #tpu.memory_space<vmem>>, vector<2x2xf32>,
    return
  }
}

</mosaic_0001>

<bundles_post_ra>
// kernel: textrnn_gru_forward.3
= control target key start
LH: loop header
LB: loop body
LE: loop exit
PB: predicated region body
PF: predicated region fallthrough
CT: control target
= control target key end

     0   :  { %s1067_s0 = inlined_call_operand.vmem [shape: f32[8,2,96], index: 0, kind: input, shape index: {}]   ;;  %s1068_s1 = inlined_call_operand.vmem [shape: f32[2,96], index: 1, kind: input, shape index: {}]   ;;  %s1069_s2 = inlined_call_operand.vmem [shape: f32[32,96], index: 2, kind: input, shape index: {}]   ;;  %s1070_s3 = inlined_call_operand.vmem [shape: f32[32,96], index: 3, kind: input, shape index: {}]   ;;  %s1071_s4 = inlined_call_operand.vmem [shape: f32[1,32], index: 4, kind: input, shape index: {}]   ;;  %s1072_s5 = inlined_call_operand.vmem [shape: f32[1,32], index: 5, kind: input, shape index: {}]   ;;  %s1073_s6 = inlined_call_operand.vmem [shape: f32[64,2], index: 6, kind: input, shape index: {}]   ;;  %s1074_s7 = inlined_call_operand.vmem [shape: f32[1,2], index: 7, kind: input, shape index: {}]   ;;  %s1075_s8 = inlined_call_operand.hbm [shape: f32[2,2], index: 8, kind: output, shape index: {0}]   ;;  %s1076_s9 = inlined_call_operand.vmem [shape: f32[2,2,32], index: 9, kind: output, shape index: {1}]  }
   0x1   :  { %v35_v0 = vld [vmem:[%s1069_s2 + $0x18] sm:$0xff]  ;;  %v34_v1 = vld [vmem:[%s1069_s2 + $0x10] sm:$0xff]  ;;  %v33_v2 = vld [vmem:[%s1069_s2 + $0x8] sm:$0xff] }
   0x2   :  { %59 = vmatpush.msra.mxu0 %v35_v0  ;;  %v770_v3 = vld [vmem:[%s1071_s4] ss:$0 sm:$0xff]  ;;  %129 = vmatpush.msra.mxu1 %v35_v0 }
   0x3   :  { %196 = vmatpush.msra.mxu2 %v35_v0  ;;  %263 = vmatpush.msra.mxu3 %v35_v0 }
   0x4   :  { %15 = vsyncpa [#allocation3], 0  ;;  %60 = vmatpush.msra.mxu0 %v34_v1  ;;  %s857_s17 = smov 64   ;;  %v32_v4 = vld [vmem:[%s1069_s2] sm:$0xff]  ;;  %130 = vmatpush.msra.mxu1 %v34_v1  ;;  %v858_v5 = vmov 0.0   ;;  %s859_s20 = smov 96  }
   0x5   :  { %87 = vrot.lane.b32.xlu0 %v770_v3, %s857_s17  ;;  %197 = vmatpush.msra.mxu2 %v34_v1  ;;  %v42_v9 = vld [vmem:[%s1067_s0] sm:$0x3]  ;;  %vm43_vm4 = vcmask 261120   ;;  %v741_v37 = vld [vmem:[%s1067_s0 + $0x2] sm:$0x3] }
   0x6   :  { %61 = vmatpush.msra.mxu0 %v33_v2  ;;  %264 = vmatpush.msra.mxu3 %v34_v1 }
   0x7   :  { %131 = vmatpush.msra.mxu1 %v33_v2  ;;  %198 = vmatpush.msra.mxu2 %v33_v2 }
   0x8   :  { %62 = vmatpush.msra.mxu0 %v32_v4  ;;  %265 = vmatpush.msra.mxu3 %v33_v2 }
   0x9   :  { %63 = vmatmul.f32.vlgmr.msra.gmra.mxu0 %v858_v5  ;;  %132 = vmatpush.msra.mxu1 %v32_v4 }
   0xa   :  { %199 = vmatpush.msra.mxu2 %v32_v4  ;;  %266 = vmatpush.msra.mxu3 %v32_v4 }
   0xb   :  { %330 = vmatpush.msrb.mxu0 %v35_v0  ;;  %397 = vmatpush.msrb.mxu1 %v35_v0 }
   0xc   :  { %464 = vmatpush.msrb.mxu2 %v35_v0  ;;  %531 = vmatpush.msrb.mxu3 %v35_v0 }
   0xd   :  { %331 = vmatpush.msrb.mxu0 %v34_v1  ;;  %398 = vmatpush.msrb.mxu1 %v34_v1 }
   0xe   :  { %465 = vmatpush.msrb.mxu2 %v34_v1  ;;  %532 = vmatpush.msrb.mxu3 %v34_v1  ;;  %v744_v1 = vld [vmem:[%s1067_s0 + $0x4] sm:$0x3] }
   0xf   :  { %332 = vmatpush.msrb.mxu0 %v33_v2  ;;  %399 = vmatpush.msrb.mxu1 %v33_v2 }
  0x10   :  { %466 = vmatpush.msrb.mxu2 %v33_v2  ;;  %533 = vmatpush.msrb.mxu3 %v33_v2 }
  0x11   :  { %333 = vmatpush.msrb.mxu0 %v32_v4  ;;  %400 = vmatpush.msrb.mxu1 %v32_v4 }
  0x12   :  { %467 = vmatpush.msrb.mxu2 %v32_v4  ;;  %534 = vmatpush.msrb.mxu3 %v32_v4 }
  0x77   :  { %v928_v6 = vpop.permute.xlu0 %87 }
  0x86   :  { %v64_v7 = vpop.f32.mrf.mxu0 }
  0x87   :  { %v90_v8 = vadd.f32 %v928_v6, %v64_v7  ;;  %v67_v10 = vadd.f32 %v64_v7, %v42_v9 }
  0x89   :  { %92 = vrot.lane.b32.xlu0 %v90_v8, %s857_s17  ;;  %v740_v11 = vmul.f32 -1.442695, %v67_v10 }
  0x8b   :  { %773 = vpow2.f32 %v740_v11 }
  0x91   :  { %v774_v12 = vpop.eup %773 }
  0x92   :  { %v71_v13 = vadd.f32 1.0, %v774_v12 }
  0x94   :  { %775 = vrcp.f32 %v71_v13  ;;  %v83_v19 = vand.u32 2147483648, %v71_v13  ;;  %vm77_vm1 = vweird.f32 %v71_v13  ;;  %v81_v20 = vand.u32 2147483647, %v71_v13 }
  0x96   :  { %v84_v22 = vor.u32 1.1754944e-38, %v83_v19  ;;  %vm82_vm3 = vcmp.eq.f32.partialorder %v81_v20, 8.507059e+37 }
  0x9a   :  { %v776_v14 = vpop.eup %775 }
  0x9b   :  { %v73_v15 = vmul.f32 %v776_v14, %v71_v13  ;;  %vm78_vm0 = vweird.f32 %v776_v14 }
  0x9c   :  { %vm79_vm2 = vmor %vm77_vm1, %vm78_vm0 }
  0x9d   :  { %v74_v16 = vsub.f32 1.0, %v73_v15 }
  0x9f   :  { %v75_v17 = vmul.f32 %v776_v14, %v74_v16 }
  0xa1   :  { %v76_v18 = vadd.f32 %v776_v14, %v75_v17 }
  0xa3   :  { %v80_v21 = vsel %vm79_vm2, %v776_v14, %v76_v18 }
  0xa4   :  { %v85_v24 = vsel %vm82_vm3, %v84_v22, %v80_v21 }
  0xa5   :  { %v102_v29 = vsub.f32 1.0, %v85_v24  ;;  %v108_v32 = vmul.f32 0.0, %v85_v24 }
  0xfb   :  { %v93_v23 = vpop.permute.xlu0 %92 }
  0xfc   :  { %v95_v25 = vmul.f32 %v93_v23, %v85_v24 }
  0xfe   :  { %97 = vrot.lane.b32.xlu1 %v95_v25, %s857_s17 }
 0x170   :  { %v98_v26 = vpop.permute.xlu1 %97 }
 0x171   :  { %v100_v27 = vadd.f32 %v98_v26, %v42_v9 }
 0x173   :  { %777 = vtanh.f32 %v100_v27 }
 0x179   :  { %v778_v28 = vpop.eup %777 }
 0x17a   :  { %104 = vrot.lane.b32.xlu1 %v778_v28, %s859_s20 }
 0x1ec   :  { %v105_v30 = vpop.permute.xlu1 %104 }
 0x1ed   :  { %v107_v31 = vmul.f32 %v105_v30, %v102_v29 }
 0x1ef   :  { %v109_v33 = vadd.f32 %v108_v32, %v107_v31  ;;  %v747_v31 = vld [vmem:[%s1067_s0 + $0x6] sm:$0x3] }
 0x1f1   :  { %113 = vrot.lane.b32.xlu2 %v109_v33, %s859_s20 }
 0x24b   :  { %v114_v34 = vpop.permute.xlu2 %113 }
 0x24c   :  { %742 = vmatmul.msk.f32.vlgmr.msra.gmra.mxu1 %vm43_vm4, %v114_v34 }
 0x2c9   :  { %v134_v35 = vpop.f32.mrf.mxu1 }
 0x2ca   :  { %v157_v36 = vadd.f32 %v134_v35, %v928_v6  ;;  %v137_v38 = vadd.f32 %v741_v37, %v134_v35 }
 0x2cc   :  { %159 = vrot.lane.b32.xlu2 %v157_v36, %s857_s17  ;;  %v743_v39 = vmul.f32 -1.442695, %v137_v38 }
 0x2ce   :  { %779 = vpow2.f32 %v743_v39 }
 0x2d4   :  { %v780_v40 = vpop.eup %779 }
 0x2d5   :  { %v141_v41 = vadd.f32 1.0, %v780_v40 }
 0x2d7   :  { %781 = vrcp.f32 %v141_v41  ;;  %v153_v47 = vand.u32 2147483648, %v141_v41  ;;  %vm147_vm6 = vweird.f32 %v141_v41  ;;  %v151_v48 = vand.u32 2147483647, %v141_v41 }
 0x2d9   :  { %v154_v50 = vor.u32 1.1754944e-38, %v153_v47  ;;  %vm152_vm8 = vcmp.eq.f32.partialorder %v151_v48, 8.507059e+37 }
 0x2dd   :  { %v782_v42 = vpop.eup %781 }
 0x2de   :  { %v143_v43 = vmul.f32 %v782_v42, %v141_v41  ;;  %vm148_vm5 = vweird.f32 %v782_v42 }
 0x2df   :  { %vm149_vm7 = vmor %vm147_vm6, %vm148_vm5 }
 0x2e0   :  { %v144_v44 = vsub.f32 1.0, %v143_v43 }
 0x2e2   :  { %v145_v45 = vmul.f32 %v782_v42, %v144_v44 }
 0x2e4   :  { %v146_v46 = vadd.f32 %v782_v42, %v145_v45 }
 0x2e6   :  { %v150_v49 = vsel %vm149_vm7, %v782_v42, %v146_v46 }
 0x2e7   :  { %v155_v52 = vsel %vm152_vm8, %v154_v50, %v150_v49 }
 0x2e8   :  { %v169_v57 = vsub.f32 1.0, %v155_v52  ;;  %v175_v59 = vmul.f32 %v155_v52, %v109_v33 }
 0x326   :  { %v160_v51 = vpop.permute.xlu2 %159 }
 0x327   :  { %v162_v53 = vmul.f32 %v160_v51, %v155_v52 }
 0x329   :  { %164 = vrot.lane.b32.xlu0 %v162_v53, %s857_s17 }
 0x39b   :  { %v165_v54 = vpop.permute.xlu0 %164 }
 0x39c   :  { %v167_v55 = vadd.f32 %v741_v37, %v165_v54 }
 0x39e   :  { %783 = vtanh.f32 %v167_v55 }
 0x3a4   :  { %v784_v56 = vpop.eup %783 }
 0x3a5   :  { %171 = vrot.lane.b32.xlu1 %v784_v56, %s859_s20 }
 0x417   :  { %v172_v58 = vpop.permute.xlu1 %171 }
 0x418   :  { %v174_v60 = vmul.f32 %v172_v58, %v169_v57 }
 0x41a   :  { %v176_v61 = vadd.f32 %v175_v59, %v174_v60  ;;  %v750_v59 = vld [vmem:[%s1067_s0 + $0x8] sm:$0x3] }
 0x41c   :  { %180 = vrot.lane.b32.xlu2 %v176_v61, %s859_s20 }
 0x476   :  { %v181_v62 = vpop.permute.xlu2 %180 }
 0x477   :  { %745 = vmatmul.msk.f32.vlgmr.msra.gmra.mxu2 %vm43_vm4, %v181_v62 }
 0x4fa   :  { %v201_v63 = vpop.f32.mrf.mxu2 }
 0x4fb   :  { %v224_v0 = vadd.f32 %v201_v63, %v928_v6  ;;  %v204_v2 = vadd.f32 %v744_v1, %v201_v63 }
 0x4fd   :  { %226 = vrot.lane.b32.xlu0 %v224_v0, %s857_s17  ;;  %v746_v3 = vmul.f32 -1.442695, %v204_v2 }
 0x4ff   :  { %785 = vpow2.f32 %v746_v3 }
 0x505   :  { %v786_v4 = vpop.eup %785 }
 0x506   :  { %v208_v7 = vadd.f32 1.0, %v786_v4 }
 0x508   :  { %787 = vrcp.f32 %v208_v7  ;;  %v220_v13 = vand.u32 2147483648, %v208_v7  ;;  %vm214_vm10 = vweird.f32 %v208_v7  ;;  %v218_v14 = vand.u32 2147483647, %v208_v7 }
 0x50a   :  { %v221_v16 = vor.u32 1.1754944e-38, %v220_v13  ;;  %vm219_vm12 = vcmp.eq.f32.partialorder %v218_v14, 8.507059e+37 }
 0x50e   :  { %v788_v8 = vpop.eup %787 }
 0x50f   :  { %v210_v9 = vmul.f32 %v788_v8, %v208_v7  ;;  %vm215_vm9 = vweird.f32 %v788_v8 }
 0x510   :  { %vm216_vm11 = vmor %vm214_vm10, %vm215_vm9 }
 0x511   :  { %v211_v10 = vsub.f32 1.0, %v210_v9 }
 0x513   :  { %v212_v11 = vmul.f32 %v788_v8, %v211_v10 }
 0x515   :  { %v213_v12 = vadd.f32 %v788_v8, %v212_v11 }
 0x517   :  { %v217_v15 = vsel %vm216_vm11, %v788_v8, %v213_v12 }
 0x518   :  { %v222_v18 = vsel %vm219_vm12, %v221_v16, %v217_v15 }
 0x519   :  { %v236_v23 = vsub.f32 1.0, %v222_v18  ;;  %v242_v25 = vmul.f32 %v222_v18, %v176_v61 }
 0x56f   :  { %v227_v17 = vpop.permute.xlu0 %226 }
 0x570   :  { %v229_v19 = vmul.f32 %v227_v17, %v222_v18 }
 0x572   :  { %231 = vrot.lane.b32.xlu1 %v229_v19, %s857_s17 }
 0x5e4   :  { %v232_v20 = vpop.permute.xlu1 %231 }
 0x5e5   :  { %v234_v21 = vadd.f32 %v744_v1, %v232_v20 }
 0x5e7   :  { %789 = vtanh.f32 %v234_v21 }
 0x5ed   :  { %v790_v22 = vpop.eup %789 }
 0x5ee   :  { %238 = vrot.lane.b32.xlu2 %v790_v22, %s859_s20 }
 0x648   :  { %v239_v24 = vpop.permute.xlu2 %238 }
 0x649   :  { %v241_v26 = vmul.f32 %v239_v24, %v236_v23 }
 0x64b   :  { %v243_v27 = vadd.f32 %v242_v25, %v241_v26  ;;  %v753_v25 = vld [vmem:[%s1067_s0 + $0xa] sm:$0x3] }
 0x64d   :  { %247 = vrot.lane.b32.xlu0 %v243_v27, %s859_s20 }
 0x6bf   :  { %v248_v28 = vpop.permute.xlu0 %247 }
 0x6c0   :  { %748 = vmatmul.msk.f32.vlgmr.msra.gmra.mxu3 %vm43_vm4, %v248_v28 }
 0x743   :  { %v268_v29 = vpop.f32.mrf.mxu3 }
 0x744   :  { %v291_v30 = vadd.f32 %v268_v29, %v928_v6  ;;  %v271_v32 = vadd.f32 %v747_v31, %v268_v29 }
 0x746   :  { %293 = vrot.lane.b32.xlu1 %v291_v30, %s857_s17  ;;  %v749_v33 = vmul.f32 -1.442695, %v271_v32 }
 0x748   :  { %791 = vpow2.f32 %v749_v33 }
 0x74e   :  { %v792_v34 = vpop.eup %791 }
 0x74f   :  { %v275_v35 = vadd.f32 1.0, %v792_v34 }
 0x751   :  { %793 = vrcp.f32 %v275_v35  ;;  %v287_v41 = vand.u32 2147483648, %v275_v35  ;;  %vm281_vm14 = vweird.f32 %v275_v35  ;;  %v285_v42 = vand.u32 2147483647, %v275_v35 }
 0x753   :  { %v288_v44 = vor.u32 1.1754944e-38, %v287_v41  ;;  %vm286_vm0 = vcmp.eq.f32.partialorder %v285_v42, 8.507059e+37 }
 0x757   :  { %v794_v36 = vpop.eup %793 }
 0x758   :  { %v277_v37 = vmul.f32 %v794_v36, %v275_v35  ;;  %vm282_vm13 = vweird.f32 %v794_v36 }
 0x759   :  { %vm283_vm15 = vmor %vm281_vm14, %vm282_vm13 }
 0x75a   :  { %v278_v38 = vsub.f32 1.0, %v277_v37 }
 0x75c   :  { %v279_v39 = vmul.f32 %v794_v36, %v278_v38 }
 0x75e   :  { %v280_v40 = vadd.f32 %v794_v36, %v279_v39 }
 0x760   :  { %v284_v43 = vsel %vm283_vm15, %v794_v36, %v280_v40 }
 0x761   :  { %v289_v46 = vsel %vm286_vm0, %v288_v44, %v284_v43 }
 0x762   :  { %v303_v51 = vsub.f32 1.0, %v289_v46  ;;  %v309_v53 = vmul.f32 %v289_v46, %v243_v27 }
 0x7b8   :  { %v294_v45 = vpop.permute.xlu1 %293 }
 0x7b9   :  { %v296_v47 = vmul.f32 %v294_v45, %v289_v46 }
 0x7bb   :  { %298 = vrot.lane.b32.xlu2 %v296_v47, %s857_s17 }
 0x815   :  { %v299_v48 = vpop.permute.xlu2 %298 }
 0x816   :  { %v301_v49 = vadd.f32 %v747_v31, %v299_v48 }
 0x818   :  { %795 = vtanh.f32 %v301_v49 }
 0x81e   :  { %v796_v50 = vpop.eup %795 }
 0x81f   :  { %305 = vrot.lane.b32.xlu0 %v796_v50, %s859_s20 }
 0x891   :  { %v306_v52 = vpop.permute.xlu0 %305 }
 0x892   :  { %v308_v54 = vmul.f32 %v306_v52, %v303_v51 }
 0x894   :  { %v310_v55 = vadd.f32 %v309_v53, %v308_v54  ;;  %v756_v53 = vld [vmem:[%s1067_s0 + $0xc] sm:$0x3] }
 0x896   :  { %314 = vrot.lane.b32.xlu1 %v310_v55, %s859_s20 }
 0x908   :  { %v315_v56 = vpop.permute.xlu1 %314 }
 0x909   :  { %751 = vmatmul.msk.f32.vlgmr.msrb.gmra.mxu0 %vm43_vm4, %v315_v56 }
 0x986   :  { %v335_v57 = vpop.f32.mrf.mxu0 }
 0x987   :  { %v358_v58 = vadd.f32 %v335_v57, %v928_v6  ;;  %v338_v60 = vadd.f32 %v750_v59, %v335_v57 }
 0x989   :  { %360 = vrot.lane.b32.xlu2 %v358_v58, %s857_s17  ;;  %v752_v61 = vmul.f32 -1.442695, %v338_v60 }
 0x98b   :  { %797 = vpow2.f32 %v752_v61 }
 0x991   :  { %v798_v62 = vpop.eup %797 }
 0x992   :  { %v342_v63 = vadd.f32 1.0, %v798_v62 }
 0x994   :  { %799 = vrcp.f32 %v342_v63  ;;  %v354_v7 = vand.u32 2147483648, %v342_v63  ;;  %vm348_vm2 = vweird.f32 %v342_v63  ;;  %v352_v8 = vand.u32 2147483647, %v342_v63 }
 0x996   :  { %v355_v10 = vor.u32 1.1754944e-38, %v354_v7  ;;  %vm353_vm5 = vcmp.eq.f32.partialorder %v352_v8, 8.507059e+37 }
 0x99a   :  { %v800_v0 = vpop.eup %799 }
 0x99b   :  { %v344_v1 = vmul.f32 %v800_v0, %v342_v63  ;;  %vm349_vm1 = vweird.f32 %v800_v0 }
 0x99c   :  { %vm350_vm3 = vmor %vm348_vm2, %vm349_vm1 }
 0x99d   :  { %v345_v2 = vsub.f32 1.0, %v344_v1 }
 0x99f   :  { %v346_v3 = vmul.f32 %v800_v0, %v345_v2 }
 0x9a1   :  { %v347_v4 = vadd.f32 %v800_v0, %v346_v3 }
 0x9a3   :  { %v351_v9 = vsel %vm350_vm3, %v800_v0, %v347_v4 }
 0x9a4   :  { %v356_v12 = vsel %vm353_vm5, %v355_v10, %v351_v9 }
 0x9a5   :  { %v370_v17 = vsub.f32 1.0, %v356_v12  ;;  %v376_v19 = vmul.f32 %v356_v12, %v310_v55 }
 0x9e3   :  { %v361_v11 = vpop.permute.xlu2 %360 }
 0x9e4   :  { %v363_v13 = vmul.f32 %v361_v11, %v356_v12  ;;  %v583_v11 = vld [vmem:[%s1070_s3 + $0x18] sm:$0xff]  ;;  %v582_v12 = vld [vmem:[%s1070_s3 + $0x10] sm:$0xff] }
 0x9e5   :  { %596 = vmatpush.msra.mxu0 %v583_v11  ;;  %v666_v11 = vld [vmem:[%s1073_s6 + $0x28] sm:$0xff] }
 0x9e6   :  { %365 = vrot.lane.b32.xlu0 %v363_v13, %s857_s17  ;;  %v771_v13 = vld [vmem:[%s1072_s5] ss:$0 sm:$0xff] }
 0x9e7   :  { %597 = vmatpush.msra.mxu0 %v582_v12  ;;  %v665_v12 = vld [vmem:[%s1073_s6 + $0x20] sm:$0xff] }
 0xa58   :  { %v366_v14 = vpop.permute.xlu0 %365 }
 0xa59   :  { %v368_v15 = vadd.f32 %v750_v59, %v366_v14  ;;  %v581_v14 = vld [vmem:[%s1070_s3 + $0x8] sm:$0xff] }
 0xa5a   :  { %598 = vmatpush.msra.mxu0 %v581_v14  ;;  %v663_v14 = vld [vmem:[%s1073_s6 + $0x10] sm:$0xff] }
 0xa5b   :  { %801 = vtanh.f32 %v368_v15  ;;  %v580_v15 = vld [vmem:[%s1070_s3] sm:$0xff] }
 0xa5c   :  { %599 = vmatpush.msra.mxu0 %v580_v15  ;;  %v662_v15 = vld [vmem:[%s1073_s6 + $0x8] sm:$0xff] }
 0xa5d   :  { %600 = vmatmul.f32.vlgmr.msra.gmra.mxu0 %v858_v5  ;;  %v579_v5 = vld [vmem:[%s1068_s1] sm:$0x3]  ;;  %s727_s1 = sshll.u32 %s1075_s8, 4  ;;  %s728_s1 = int_to_ptr.hbm [resolvable:$true] %s727_s1 }
 0xa61   :  { %v802_v16 = vpop.eup %801 }
 0xa62   :  { %372 = vrot.lane.b32.xlu1 %v802_v16, %s859_s20 }
 0xad4   :  { %v373_v18 = vpop.permute.xlu1 %372 }
 0xad5   :  { %v375_v20 = vmul.f32 %v373_v18, %v370_v17 }
 0xad7   :  { %v377_v21 = vadd.f32 %v376_v19, %v375_v20 }
 0xad9   :  { %381 = vrot.lane.b32.xlu2 %v377_v21, %s859_s20 }
 0xb33   :  { %v382_v22 = vpop.permute.xlu2 %381 }
 0xb34   :  { %754 = vmatmul.msk.f32.vlgmr.msrb.gmra.mxu1 %vm43_vm4, %v382_v22  ;;  %v601_v22 = vpop.f32.mrf.mxu0 }
 0xbb1   :  { %v402_v23 = vpop.f32.mrf.mxu1 }
 0xbb2   :  { %v425_v24 = vadd.f32 %v402_v23, %v928_v6  ;;  %v405_v26 = vadd.f32 %v753_v25, %v402_v23 }
 0xbb4   :  { %427 = vrot.lane.b32.xlu0 %v425_v24, %s857_s17  ;;  %v755_v27 = vmul.f32 -1.442695, %v405_v26 }
 0xbb6   :  { %803 = vpow2.f32 %v755_v27 }
 0xbbc   :  { %v804_v28 = vpop.eup %803 }
 0xbbd   :  { %v409_v29 = vadd.f32 1.0, %v804_v28 }
 0xbbf   :  { %805 = vrcp.f32 %v409_v29  ;;  %v421_v35 = vand.u32 2147483648, %v409_v29  ;;  %vm415_vm7 = vweird.f32 %v409_v29  ;;  %v419_v36 = vand.u32 2147483647, %v409_v29 }
 0xbc1   :  { %v422_v38 = vor.u32 1.1754944e-38, %v421_v35  ;;  %vm420_vm9 = vcmp.eq.f32.partialorder %v419_v36, 8.507059e+37 }
 0xbc5   :  { %v806_v30 = vpop.eup %805 }
 0xbc6   :  { %v411_v31 = vmul.f32 %v806_v30, %v409_v29  ;;  %vm416_vm6 = vweird.f32 %v806_v30 }
 0xbc7   :  { %vm417_vm8 = vmor %vm415_vm7, %vm416_vm6  ;;  %vm653_vm7 = vcmask 254976  }
 0xbc8   :  { %v412_v32 = vsub.f32 1.0, %v411_v31 }
 0xbca   :  { %v413_v33 = vmul.f32 %v806_v30, %v412_v32 }
 0xbcc   :  { %v414_v34 = vadd.f32 %v806_v30, %v413_v33 }
 0xbce   :  { %v418_v37 = vsel %vm417_vm8, %v806_v30, %v414_v34  ;;  %vm718_vm8 = vcmask 9216  }
 0xbcf   :  { %v423_v40 = vsel %vm420_vm9, %v422_v38, %v418_v37 }
 0xbd0   :  { %v437_v45 = vsub.f32 1.0, %v423_v40  ;;  %v443_v47 = vmul.f32 %v423_v40, %v377_v21 }
 0xc26   :  { %v428_v39 = vpop.permute.xlu0 %427 }
 0xc27   :  { %v430_v41 = vmul.f32 %v428_v39, %v423_v40 }
 0xc29   :  { %432 = vrot.lane.b32.xlu1 %v430_v41, %s857_s17 }
 0xc9b   :  { %v433_v42 = vpop.permute.xlu1 %432 }
 0xc9c   :  { %v435_v43 = vadd.f32 %v753_v25, %v433_v42  ;;  %v604_v25 = vadd.f32 %v601_v22, %v579_v5 }
 0xc9e   :  { %807 = vtanh.f32 %v435_v43  ;;  %v762_v26 = vmul.f32 -1.442695, %v604_v25  ;;  %v759_v43 = vld [vmem:[%s1067_s0 + $0xe] sm:$0x3] }
 0xca4   :  { %v808_v44 = vpop.eup %807 }
 0xca5   :  { %439 = vrot.lane.b32.xlu2 %v808_v44, %s859_s20 }
 0xcff   :  { %v440_v46 = vpop.permute.xlu2 %439 }
 0xd00   :  { %v442_v48 = vmul.f32 %v440_v46, %v437_v45 }
 0xd02   :  { %v444_v49 = vadd.f32 %v443_v47, %v442_v48 }
 0xd04   :  { %448 = vrot.lane.b32.xlu0 %v444_v49, %s859_s20 }
 0xd76   :  { %v449_v50 = vpop.permute.xlu0 %448 }
 0xd77   :  { %757 = vmatmul.msk.f32.vlgmr.msrb.gmra.mxu2 %vm43_vm4, %v449_v50 }
 0xdfa   :  { %v469_v51 = vpop.f32.mrf.mxu2 }
 0xdfb   :  { %v492_v52 = vadd.f32 %v469_v51, %v928_v6  ;;  %v472_v54 = vadd.f32 %v756_v53, %v469_v51 }
 0xdfd   :  { %494 = vrot.lane.b32.xlu1 %v492_v52, %s857_s17  ;;  %v758_v55 = vmul.f32 -1.442695, %v472_v54 }
 0xdff   :  { %809 = vpow2.f32 %v758_v55 }
 0xe05   :  { %v810_v56 = vpop.eup %809 }
 0xe06   :  { %v476_v57 = vadd.f32 1.0, %v810_v56 }
 0xe08   :  { %811 = vrcp.f32 %v476_v57  ;;  %v488_v63 = vand.u32 2147483648, %v476_v57  ;;  %vm482_vm11 = vweird.f32 %v476_v57  ;;  %v486_v0 = vand.u32 2147483647, %v476_v57 }
 0xe0a   :  { %v489_v2 = vor.u32 1.1754944e-38, %v488_v63  ;;  %vm487_vm13 = vcmp.eq.f32.partialorder %v486_v0, 8.507059e+37 }
 0xe0e   :  { %v812_v58 = vpop.eup %811 }
 0xe0f   :  { %v478_v59 = vmul.f32 %v812_v58, %v476_v57  ;;  %vm483_vm10 = vweird.f32 %v812_v58 }
 0xe10   :  { %vm484_vm12 = vmor %vm482_vm11, %vm483_vm10 }
 0xe11   :  { %v479_v60 = vsub.f32 1.0, %v478_v59 }
 0xe13   :  { %v480_v61 = vmul.f32 %v812_v58, %v479_v60 }
 0xe15   :  { %v481_v62 = vadd.f32 %v812_v58, %v480_v61 }
 0xe17   :  { %v485_v1 = vsel %vm484_vm12, %v812_v58, %v481_v62 }
 0xe18   :  { %v490_v4 = vsel %vm487_vm13, %v489_v2, %v485_v1 }
 0xe19   :  { %v504_v16 = vsub.f32 1.0, %v490_v4  ;;  %v510_v18 = vmul.f32 %v490_v4, %v444_v49 }
 0xe6f   :  { %v495_v3 = vpop.permute.xlu1 %494 }
 0xe70   :  { %v497_v7 = vmul.f32 %v495_v3, %v490_v4 }
 0xe72   :  { %499 = vrot.lane.b32.xlu2 %v497_v7, %s857_s17 }
 0xe7a   :  { %624 = vrot.lane.b32.xlu2 %v771_v13, %s857_s17  ;;  %v664_v13 = vld [vmem:[%s1073_s6 + $0x18] sm:$0xff] }
 0xe7b   :  { %705 = vmatpush.msra.mxu2 %v664_v13 }
 0xe7d   :  { %706 = vmatpush.msra.mxu2 %v663_v14 }
 0xe7f   :  { %707 = vmatpush.msra.mxu2 %v662_v15 }
 0xecc   :  { %v500_v8 = vpop.permute.xlu2 %499 }
 0xecd   :  { %v502_v9 = vadd.f32 %v756_v53, %v500_v8 }
 0xecf   :  { %813 = vtanh.f32 %v502_v9  ;;  %v668_v9 = vld [vmem:[%s1073_s6 + $0x38] sm:$0xff] }
 0xed0   :  { %815 = vpow2.f32 %v762_v26  ;;  %683 = vmatpush.msra.mxu1 %v668_v9 }
 0xed4   :  { %v625_v21 = vpop.permute.xlu2 %624 }
 0xed5   :  { %v814_v10 = vpop.eup %813  ;;  %v627_v23 = vadd.f32 %v625_v21, %v601_v22 }
 0xed6   :  { %506 = vrot.lane.b32.xlu0 %v814_v10, %s859_s20  ;;  %v816_v27 = vpop.eup %815  ;;  %v667_v10 = vld [vmem:[%s1073_s6 + $0x30] sm:$0xff] }
 0xed7   :  { %v608_v28 = vadd.f32 1.0, %v816_v27  ;;  %684 = vmatpush.msra.mxu1 %v667_v10 }
 0xed9   :  { %817 = vrcp.f32 %v608_v28  ;;  %vm614_vm14 = vweird.f32 %v608_v28  ;;  %v620_v33 = vand.u32 2147483648, %v608_v28  ;;  %v618_v35 = vand.u32 2147483647, %v608_v28  ;;  %685 = vmatpush.msra.mxu1 %v666_v11 }
 0xedb   :  { %v621_v37 = vor.u32 1.1754944e-38, %v620_v33  ;;  %vm619_vm1 = vcmp.eq.f32.partialorder %v618_v35, 8.507059e+37  ;;  %686 = vmatpush.msra.mxu1 %v665_v12 }
 0xedf   :  { %v818_v29 = vpop.eup %817 }
 0xee0   :  { %v610_v30 = vmul.f32 %v818_v29, %v608_v28  ;;  %vm615_vm15 = vweird.f32 %v818_v29 }
 0xee1   :  { %vm616_vm0 = vmor %vm614_vm14, %vm615_vm15 }
 0xee2   :  { %v611_v31 = vsub.f32 1.0, %v610_v30 }
 0xee4   :  { %v612_v32 = vmul.f32 %v818_v29, %v611_v31 }
 0xee6   :  { %v613_v34 = vadd.f32 %v818_v29, %v612_v32 }
 0xee8   :  { %v617_v39 = vsel %vm616_vm0, %v818_v29, %v613_v34 }
 0xee9   :  { %v622_v40 = vsel %vm619_vm1, %v621_v37, %v617_v39 }
 0xeea   :  { %v639_v1 = vsub.f32 1.0, %v622_v40  ;;  %v645_v3 = vmul.f32 0.0, %v622_v40 }
 0xf48   :  { %v507_v17 = vpop.permute.xlu0 %506 }
 0xf49   :  { %v509_v19 = vmul.f32 %v507_v17, %v504_v16  ;;  %v661_v16 = vld [vmem:[%s1073_s6] sm:$0xff] }
 0xf4a   :  { %708 = vmatpush.msra.mxu2 %v661_v16 }
 0xf4b   :  { %v1008_v20 = vadd.f32 %v510_v18, %v509_v19 }
 0xf4d   :  { %515 = vrot.lane.b32.xlu1 %v1008_v20, %s859_s20 }
 0xf55   :  { %629 = vrot.lane.b32.xlu1 %v627_v23, %s857_s17 }
 0xfbf   :  { %v516_v24 = vpop.permute.xlu1 %515 }
 0xfc0   :  { %760 = vmatmul.msk.f32.vlgmr.msrb.gmra.mxu3 %vm43_vm4, %v516_v24 }
 0xfc7   :  { %v630_v41 = vpop.permute.xlu1 %629 }
 0xfc8   :  { %v632_v42 = vmul.f32 %v630_v41, %v622_v40 }
0x1043   :  { %v536_v36 = vpop.f32.mrf.mxu3 }
0x1044   :  { %v559_v38 = vadd.f32 %v536_v36, %v928_v6  ;;  %v539_v44 = vadd.f32 %v759_v43, %v536_v36 }
0x1046   :  { %561 = vrot.lane.b32.xlu0 %v559_v38, %s857_s17  ;;  %v761_v45 = vmul.f32 -1.442695, %v539_v44 }
0x1048   :  { %819 = vpow2.f32 %v761_v45 }
0x104e   :  { %634 = vrot.lane.b32.xlu0 %v632_v42, %s857_s17  ;;  %v820_v46 = vpop.eup %819 }
0x104f   :  { %v543_v47 = vadd.f32 1.0, %v820_v46 }
0x1051   :  { %821 = vrcp.f32 %v543_v47  ;;  %v555_v52 = vand.u32 2147483648, %v543_v47  ;;  %vm549_vm3 = vweird.f32 %v543_v47  ;;  %v553_v53 = vand.u32 2147483647, %v543_v47 }
0x1053   :  { %v556_v55 = vor.u32 1.1754944e-38, %v555_v52  ;;  %vm554_vm6 = vcmp.eq.f32.partialorder %v553_v53, 8.507059e+37 }
0x1057   :  { %v822_v6 = vpop.eup %821 }
0x1058   :  { %v545_v48 = vmul.f32 %v822_v6, %v543_v47  ;;  %vm550_vm2 = vweird.f32 %v822_v6 }
0x1059   :  { %vm551_vm5 = vmor %vm549_vm3, %vm550_vm2 }
0x105a   :  { %v546_v49 = vsub.f32 1.0, %v545_v48 }
0x105c   :  { %v547_v50 = vmul.f32 %v822_v6, %v546_v49 }
0x105e   :  { %v548_v51 = vadd.f32 %v822_v6, %v547_v50 }
0x1060   :  { %v552_v54 = vsel %vm551_vm5, %v822_v6, %v548_v51 }
0x1061   :  { %v557_v57 = vsel %vm554_vm6, %v556_v55, %v552_v54 }
0x1062   :  { %v571_v17 = vsub.f32 1.0, %v557_v57  ;;  %v577_v19 = vmul.f32 %v557_v57, %v1008_v20  ;;  %v772_v20 = vld [vmem:[%s1074_s7] ss:$0 sm:$0xff] }
0x10b8   :  { %v562_v56 = vpop.permute.xlu0 %561 }
0x10b9   :  { %v564_v58 = vmul.f32 %v562_v56, %v557_v57 }
0x10bb   :  { %566 = vrot.lane.b32.xlu2 %v564_v58, %s857_s17 }
0x10c0   :  { %v635_v59 = vpop.permute.xlu0 %634 }
0x10c1   :  { %v637_v60 = vadd.f32 %v635_v59, %v579_v5 }
0x10c3   :  { %823 = vtanh.f32 %v637_v60 }
0x10c9   :  { %v824_v61 = vpop.eup %823 }
0x10ca   :  { %641 = vrot.lane.b32.xlu2 %v824_v61, %s859_s20 }
0x1115   :  { %v567_v62 = vpop.permute.xlu2 %566 }
0x1116   :  { %v569_v63 = vadd.f32 %v759_v43, %v567_v62 }
0x1118   :  { %825 = vtanh.f32 %v569_v63 }
0x111e   :  { %v826_v0 = vpop.eup %825 }
0x111f   :  { %573 = vrot.lane.b32.xlu1 %v826_v0, %s859_s20 }
0x1124   :  { %v642_v2 = vpop.permute.xlu2 %641 }
0x1125   :  { %v644_v4 = vmul.f32 %v642_v2, %v639_v1 }
0x1127   :  { %v646_v7 = vadd.f32 %v645_v3, %v644_v4 }
0x1129   :  { %827 = vtanh.f32 %v646_v7 }
0x112f   :  { %v828_v8 = vpop.eup %827 }
0x1130   :  { %656 = vrot.lane.b32.xlu1 %v828_v8, %s859_s20 }
0x1191   :  { %v574_v18 = vpop.permute.xlu1 %573 }
0x1192   :  { %v576_v21 = vmul.f32 %v574_v18, %v571_v17 }
0x1194   :  { %v578_v22 = vadd.f32 %v577_v19, %v576_v21 }
0x1196   :  { %829 = vtanh.f32 %v578_v22 }
0x119c   :  { %v830_v23 = vpop.eup %829 }
0x119d   :  { %650 = vrot.lane.b32.xlu0 %v830_v23, %s859_s20  ;;  %s860_s20 = smov [#allocation2]  }
0x119e   :  { %s725_s21 = sshll.u32 %s860_s20, 4  ;;  %s726_s21 = int_to_ptr.vmem [resolvable:$true] %s725_s21 }
0x11a2   :  { %v657_v24 = vpop.permute.xlu1 %656 }
0x11a3   :  { %763 = vst.msk [vmem:[%s1076_s9 + $0x2] sm:$0x3] %vm653_vm7, %v657_v24  ;;  %764 = vmatmul.msk.f32.vlgmr.msra.gmra.mxu1 %vm43_vm4, %v657_v24 }
0x120f   :  { %v651_v5 = vpop.permute.xlu0 %650 }
0x1210   :  { %654 = vst.msk [vmem:[%s1076_s9] sm:$0x3] %vm653_vm7, %v651_v5  ;;  %765 = vmatmul.msk.f32.vlgmr.msra.gmra.mxu2 %vm43_vm4, %v651_v5 }
0x1220   :  { %v688_v25 = vpop.f32.mrf.mxu1 }
0x1293   :  { %v710_v26 = vpop.f32.mrf.mxu2 }
0x1294   :  { %v711_v27 = vadd.f32 %v710_v26, %v688_v25 }
0x1296   :  { %v717_v28 = vadd.f32 %v772_v20, %v711_v27 }
0x1298   :  { %719 = vst.msk [vmem:[#allocation2] sm:$0x3] %vm718_vm8, %v717_v28 }
0x1299   :  { %730 = dma.vmem_to_hbm [thread:$0]  %s726_s21, 32, %s728_s1, [#allocation3]  }
0x129a   :  { %855 = dma.done.wait [#allocation3], 32  }
0x129b   :  { %856 = vsyncadd [#allocation3], 4294967264 }
0x129c   :  { %739 = vsyncpa [#allocation3], 1 }

// kernel: textrnn_gru_forward.2
= control target key start
LH: loop header
LB: loop body
LE: loop exit
PB: predicated region body
PF: predicated region fallthrough
CT: control target
= control target key end

     0   :  { %s1325_s15 = smov 64   ;;  %v1326_v9 = vmov 0.0   ;;  %s1327_s18 = smov 96   ;;  %vm109_vm8 = vcmask 254976   ;;  %vm38_vm9 = vcmask 261120   ;;  %s1741_s2 = inlined_call_operand.vmem [shape: f32[32,96], index: 2, kind: input, shape index: {}]   ;;  %s1742_s3 = inlined_call_operand.vmem [shape: f32[32,96], index: 3, kind: input, shape index: {}]   ;;  %s1743_s4 = inlined_call_operand.vmem [shape: f32[1,32], index: 4, kind: input, shape index: {}]   ;;  %s1744_s5 = inlined_call_operand.vmem [shape: f32[1,32], index: 5, kind: input, shape index: {}]   ;;  %s1745_s0 = inlined_call_operand.vmem [shape: f32[8,2,96], index: 0, kind: input, shape index: {}]   ;;  %s1746_s1 = inlined_call_operand.vmem [shape: f32[8,2,96], index: 1, kind: input, shape index: {}]   ;;  %s1747_s6 = inlined_call_operand.vmem [shape: f32[2,8,2,32], index: 6, kind: output, shape index: {}]  }
   0x1   :  { %v1366_v0 = vld [vmem:[%s1741_s2 + $0x18] sm:$0xff]  ;;  %v1376_v2 = vld [vmem:[%s1741_s2 + $0x10] sm:$0xff]  ;;  %v1388_v4 = vld [vmem:[%s1741_s2 + $0x8] sm:$0xff] }
   0x2   :  { %v1371_v1 = vld [vmem:[%s1742_s3 + $0x18] sm:$0xff]  ;;  %54 = vmatpush.msra.mxu0 %v1366_v0  ;;  %v1383_v3 = vld [vmem:[%s1742_s3 + $0x10] sm:$0xff]  ;;  %v1393_v5 = vld [vmem:[%s1742_s3 + $0x8] sm:$0xff]  ;;  %198 = vmatpush.msra.mxu2 %v1366_v0 }
   0x3   :  { %125 = vmatpush.msra.mxu1 %v1371_v1  ;;  %268 = vmatpush.msra.mxu3 %v1371_v1  ;;  %v1227_v6 = vld [vmem:[%s1743_s4] ss:$0 sm:$0xff]  ;;  %v1166_v20 = vld [vmem:[%s1746_s1 + $0xe] sm:$0x3] }
   0x4   :  { %55 = vmatpush.msra.mxu0 %v1376_v2  ;;  %v1405_v7 = vld [vmem:[%s1741_s2] sm:$0xff]  ;;  %199 = vmatpush.msra.mxu2 %v1376_v2 }
   0x5   :  { %126 = vmatpush.msra.mxu1 %v1383_v3  ;;  %v1410_v8 = vld [vmem:[%s1742_s3] sm:$0xff]  ;;  %269 = vmatpush.msra.mxu3 %v1383_v3 }
   0x6   :  { %56 = vmatpush.msra.mxu0 %v1388_v4  ;;  %82 = vrot.lane.b32.xlu0 %v1227_v6, %s1325_s15  ;;  %v1228_v10 = vld [vmem:[%s1744_s5] ss:$0 sm:$0xff] }
   0x7   :  { %127 = vmatpush.msra.mxu1 %v1393_v5  ;;  %200 = vmatpush.msra.mxu2 %v1388_v4  ;;  %v37_v17 = vld [vmem:[%s1745_s0] sm:$0x3] }
   0x8   :  { %57 = vmatpush.msra.mxu0 %v1405_v7  ;;  %270 = vmatpush.msra.mxu3 %v1393_v5 }
   0x9   :  { %128 = vmatpush.msra.mxu1 %v1410_v8  ;;  %58 = vmatmul.f32.vlgmr.msra.gmra.mxu0 %v1326_v9 }
   0xa   :  { %129 = vmatmul.f32.vlgmr.msra.gmra.mxu1 %v1326_v9  ;;  %201 = vmatpush.msra.mxu2 %v1405_v7 }
   0xb   :  { %338 = vmatpush.msrb.mxu0 %v1366_v0  ;;  %408 = vmatpush.msrb.mxu1 %v1371_v1 }
   0xc   :  { %271 = vmatpush.msra.mxu3 %v1410_v8  ;;  %478 = vmatpush.msrb.mxu2 %v1366_v0 }
   0xd   :  { %339 = vmatpush.msrb.mxu0 %v1376_v2  ;;  %409 = vmatpush.msrb.mxu1 %v1383_v3 }
   0xe   :  { %479 = vmatpush.msrb.mxu2 %v1376_v2  ;;  %548 = vmatpush.msrb.mxu3 %v1371_v1 }
   0xf   :  { %153 = vrot.lane.b32.xlu0 %v1228_v10, %s1325_s15  ;;  %340 = vmatpush.msrb.mxu0 %v1388_v4 }
  0x10   :  { %410 = vmatpush.msrb.mxu1 %v1393_v5  ;;  %480 = vmatpush.msrb.mxu2 %v1388_v4 }
  0x11   :  { %341 = vmatpush.msrb.mxu0 %v1405_v7  ;;  %549 = vmatpush.msrb.mxu3 %v1383_v3 }
  0x12   :  { %411 = vmatpush.msrb.mxu1 %v1410_v8  ;;  %481 = vmatpush.msrb.mxu2 %v1405_v7 }
  0x13   :  { %550 = vmatpush.msrb.mxu3 %v1393_v5  ;;  %618 = vmatpush.msra.mxu0 %v1366_v0 }
  0x14   :  { %688 = vmatpush.msra.mxu1 %v1371_v1 }
  0x15   :  { %551 = vmatpush.msrb.mxu3 %v1410_v8  ;;  %619 = vmatpush.msra.mxu0 %v1376_v2 }
  0x16   :  { %689 = vmatpush.msra.mxu1 %v1383_v3 }
  0x17   :  { %620 = vmatpush.msra.mxu0 %v1388_v4 }
  0x18   :  { %690 = vmatpush.msra.mxu1 %v1393_v5 }
  0x19   :  { %621 = vmatpush.msra.mxu0 %v1405_v7 }
  0x1a   :  { %691 = vmatpush.msra.mxu1 %v1410_v8 }
  0x78   :  { %v1451_v11 = vpop.permute.xlu0 %82 }
  0x81   :  { %v1455_v14 = vpop.permute.xlu0 %153 }
  0x86   :  { %v59_v12 = vpop.f32.mrf.mxu0 }
  0x87   :  { %v85_v13 = vadd.f32 %v1451_v11, %v59_v12  ;;  %v130_v15 = vpop.f32.mrf.mxu1  ;;  %v62_v18 = vadd.f32 %v59_v12, %v37_v17 }
  0x88   :  { %v156_v16 = vadd.f32 %v1455_v14, %v130_v15  ;;  %v133_v21 = vadd.f32 %v1166_v20, %v130_v15 }
  0x89   :  { %87 = vrot.lane.b32.xlu1 %v85_v13, %s1325_s15  ;;  %v1165_v19 = vmul.f32 -1.442695, %v62_v18 }
  0x8a   :  { %v1167_v22 = vmul.f32 -1.442695, %v133_v21 }
  0x8b   :  { %1229 = vpow2.f32 %v1165_v19  ;;  %v1169_v19 = vld [vmem:[%s1745_s0 + $0x2] sm:$0x3] }
  0x8c   :  { %1231 = vpow2.f32 %v1167_v22  ;;  %v1173_v22 = vld [vmem:[%s1746_s1 + $0xc] sm:$0x3] }
  0x91   :  { %158 = vrot.lane.b32.xlu1 %v156_v16, %s1325_s15  ;;  %v1230_v23 = vpop.eup %1229 }
  0x92   :  { %v66_v24 = vadd.f32 1.0, %v1230_v23  ;;  %v1232_v25 = vpop.eup %1231 }
  0x93   :  { %v137_v26 = vadd.f32 1.0, %v1232_v25 }
  0x94   :  { %1233 = vrcp.f32 %v66_v24  ;;  %v78_v35 = vand.u32 2147483648, %v66_v24  ;;  %vm72_vm1 = vweird.f32 %v66_v24  ;;  %v76_v36 = vand.u32 2147483647, %v66_v24 }
  0x95   :  { %1235 = vrcp.f32 %v137_v26  ;;  %vm143_vm4 = vweird.f32 %v137_v26  ;;  %v149_v44 = vand.u32 2147483648, %v137_v26  ;;  %v147_v45 = vand.u32 2147483647, %v137_v26 }
  0x96   :  { %v79_v39 = vor.u32 1.1754944e-38, %v78_v35  ;;  %vm77_vm3 = vcmp.eq.f32.partialorder %v76_v36, 8.507059e+37 }
  0x97   :  { %v150_v47 = vor.u32 1.1754944e-38, %v149_v44  ;;  %vm148_vm7 = vcmp.eq.f32.partialorder %v147_v45, 8.507059e+37 }
  0x9a   :  { %v1234_v27 = vpop.eup %1233 }
  0x9b   :  { %v68_v28 = vmul.f32 %v1234_v27, %v66_v24  ;;  %v1236_v30 = vpop.eup %1235  ;;  %vm73_vm0 = vweird.f32 %v1234_v27 }
  0x9c   :  { %v139_v32 = vmul.f32 %v1236_v30, %v137_v26  ;;  %vm74_vm2 = vmor %vm72_vm1, %vm73_vm0  ;;  %vm144_vm5 = vweird.f32 %v1236_v30 }
  0x9d   :  { %v69_v29 = vsub.f32 1.0, %v68_v28  ;;  %vm145_vm6 = vmor %vm143_vm4, %vm144_vm5 }
  0x9e   :  { %v140_v34 = vsub.f32 1.0, %v139_v32 }
  0x9f   :  { %v70_v31 = vmul.f32 %v1234_v27, %v69_v29 }
  0xa0   :  { %v141_v38 = vmul.f32 %v1236_v30, %v140_v34 }
  0xa1   :  { %v71_v33 = vadd.f32 %v1234_v27, %v70_v31 }
  0xa2   :  { %v142_v43 = vadd.f32 %v1236_v30, %v141_v38 }
  0xa3   :  { %v75_v37 = vsel %vm74_vm2, %v1234_v27, %v71_v33 }
  0xa4   :  { %v80_v41 = vsel %vm77_vm3, %v79_v39, %v75_v37  ;;  %v146_v46 = vsel %vm145_vm6, %v1236_v30, %v142_v43 }
  0xa5   :  { %v151_v49 = vsel %vm148_vm7, %v150_v47, %v146_v46  ;;  %v97_v57 = vsub.f32 1.0, %v80_v41  ;;  %v103_v59 = vmul.f32 0.0, %v80_v41 }
  0xa6   :  { %v168_v62 = vsub.f32 1.0, %v151_v49  ;;  %v174_v6 = vmul.f32 0.0, %v151_v49 }
  0xfb   :  { %v88_v40 = vpop.permute.xlu1 %87 }
  0xfc   :  { %v90_v42 = vmul.f32 %v88_v40, %v80_v41 }
  0xfe   :  { %92 = vrot.lane.b32.xlu2 %v90_v42, %s1325_s15 }
 0x103   :  { %v159_v48 = vpop.permute.xlu1 %158 }
 0x104   :  { %v161_v50 = vmul.f32 %v159_v48, %v151_v49 }
 0x106   :  { %163 = vrot.lane.b32.xlu2 %v161_v50, %s1325_s15 }
 0x158   :  { %v93_v51 = vpop.permute.xlu2 %92 }
 0x159   :  { %v95_v52 = vadd.f32 %v93_v51, %v37_v17 }
 0x15b   :  { %1237 = vtanh.f32 %v95_v52 }
 0x160   :  { %v164_v53 = vpop.permute.xlu2 %163 }
 0x161   :  { %v1238_v54 = vpop.eup %1237  ;;  %v166_v55 = vadd.f32 %v1166_v20, %v164_v53 }
 0x162   :  { %99 = vrot.lane.b32.xlu0 %v1238_v54, %s1327_s18 }
 0x163   :  { %1239 = vtanh.f32 %v166_v55 }
 0x169   :  { %v1240_v56 = vpop.eup %1239 }
 0x16a   :  { %170 = vrot.lane.b32.xlu1 %v1240_v56, %s1327_s18 }
 0x1d4   :  { %v100_v58 = vpop.permute.xlu0 %99 }
 0x1d5   :  { %v102_v60 = vmul.f32 %v100_v58, %v97_v57 }
 0x1d7   :  { %v1469_v61 = vadd.f32 %v103_v59, %v102_v60 }
 0x1d9   :  { %106 = vrot.lane.b32.xlu2 %v1469_v61, %s1327_s18 }
 0x1dc   :  { %v171_v63 = vpop.permute.xlu1 %170 }
 0x1dd   :  { %v173_v9 = vmul.f32 %v171_v63, %v168_v62 }
 0x1df   :  { %v1473_v10 = vadd.f32 %v174_v6, %v173_v9 }
 0x1e1   :  { %177 = vrot.lane.b32.xlu0 %v1473_v10, %s1327_s18 }
 0x233   :  { %v107_v12 = vpop.permute.xlu2 %106 }
 0x234   :  { %110 = vst.msk [vmem:[%s1747_s6] sm:$0x3] %vm109_vm8, %v107_v12  ;;  %1170 = vmatmul.msk.f32.vlgmr.msra.gmra.mxu2 %vm38_vm9, %v107_v12 }
 0x235   :  { %758 = vmatpush.msra.mxu2 %v1366_v0 }
 0x237   :  { %759 = vmatpush.msra.mxu2 %v1376_v2 }
 0x239   :  { %760 = vmatpush.msra.mxu2 %v1388_v4 }
 0x23b   :  { %761 = vmatpush.msra.mxu2 %v1405_v7 }
 0x253   :  { %v178_v13 = vpop.permute.xlu0 %177 }
 0x254   :  { %1168 = vst.msk [vmem:[%s1747_s6 + $0x1e] sm:$0x3] %vm109_vm8, %v178_v13  ;;  %1174 = vmatmul.msk.f32.vlgmr.msra.gmra.mxu3 %vm38_vm9, %v178_v13 }
 0x255   :  { %828 = vmatpush.msra.mxu3 %v1371_v1 }
 0x257   :  { %829 = vmatpush.msra.mxu3 %v1383_v3 }
 0x259   :  { %830 = vmatpush.msra.mxu3 %v1393_v5 }
 0x25b   :  { %831 = vmatpush.msra.mxu3 %v1410_v8 }
 0x2b7   :  { %v203_v15 = vpop.f32.mrf.mxu2 }
 0x2b8   :  { %v226_v16 = vadd.f32 %v203_v15, %v1451_v11  ;;  %v206_v20 = vadd.f32 %v1169_v19, %v203_v15 }
 0x2ba   :  { %228 = vrot.lane.b32.xlu1 %v226_v16, %s1325_s15  ;;  %v1171_v21 = vmul.f32 -1.442695, %v206_v20 }
 0x2bc   :  { %1241 = vpow2.f32 %v1171_v21  ;;  %v1177_v21 = vld [vmem:[%s1745_s0 + $0x4] sm:$0x3] }
 0x2c2   :  { %v1242_v25 = vpop.eup %1241 }
 0x2c3   :  { %v210_v26 = vadd.f32 1.0, %v1242_v25 }
 0x2c5   :  { %v222_v37 = vand.u32 2147483648, %v210_v26  ;;  %vm216_vm11 = vweird.f32 %v210_v26  ;;  %v220_v38 = vand.u32 2147483647, %v210_v26 }
 0x2c7   :  { %v223_v41 = vor.u32 1.1754944e-38, %v222_v37  ;;  %vm221_vm13 = vcmp.eq.f32.partialorder %v220_v38, 8.507059e+37 }
 0x2d7   :  { %v273_v17 = vpop.f32.mrf.mxu3 }
 0x2d8   :  { %v296_v18 = vadd.f32 %v273_v17, %v1455_v14  ;;  %v276_v23 = vadd.f32 %v1173_v22, %v273_v17 }
 0x2da   :  { %298 = vrot.lane.b32.xlu2 %v296_v18, %s1325_s15  ;;  %v1175_v24 = vmul.f32 -1.442695, %v276_v23 }
 0x2dc   :  { %1243 = vpow2.f32 %v1175_v24  ;;  %v1181_v24 = vld [vmem:[%s1746_s1 + $0xa] sm:$0x3] }
 0x2dd   :  { %1245 = vrcp.f32 %v210_v26 }
 0x2e2   :  { %v1244_v27 = vpop.eup %1243 }
 0x2e3   :  { %v280_v28 = vadd.f32 1.0, %v1244_v27  ;;  %v1246_v29 = vpop.eup %1245 }
 0x2e4   :  { %v212_v30 = vmul.f32 %v1246_v29, %v210_v26  ;;  %vm217_vm10 = vweird.f32 %v1246_v29 }
 0x2e5   :  { %1247 = vrcp.f32 %v280_v28  ;;  %vm218_vm12 = vmor %vm216_vm11, %vm217_vm10  ;;  %v292_v46 = vand.u32 2147483648, %v280_v28  ;;  %vm286_vm15 = vweird.f32 %v280_v28  ;;  %v290_v47 = vand.u32 2147483647, %v280_v28 }
 0x2e6   :  { %v213_v31 = vsub.f32 1.0, %v212_v30 }
 0x2e7   :  { %v293_v49 = vor.u32 1.1754944e-38, %v292_v46  ;;  %vm291_vm1 = vcmp.eq.f32.partialorder %v290_v47, 8.507059e+37 }
 0x2e8   :  { %v214_v33 = vmul.f32 %v1246_v29, %v213_v31 }
 0x2ea   :  { %v215_v35 = vadd.f32 %v1246_v29, %v214_v33 }
 0x2eb   :  { %v1248_v32 = vpop.eup %1247 }
 0x2ec   :  { %v282_v34 = vmul.f32 %v1248_v32, %v280_v28  ;;  %v219_v39 = vsel %vm218_vm12, %v1246_v29, %v215_v35  ;;  %vm287_vm14 = vweird.f32 %v1248_v32 }
 0x2ed   :  { %v224_v43 = vsel %vm221_vm13, %v223_v41, %v219_v39  ;;  %vm288_vm0 = vmor %vm286_vm15, %vm287_vm14 }
 0x2ee   :  { %v283_v36 = vsub.f32 1.0, %v282_v34  ;;  %v238_v59 = vsub.f32 1.0, %v224_v43  ;;  %v244_v62 = vmul.f32 %v224_v43, %v1469_v61 }
 0x2f0   :  { %v284_v40 = vmul.f32 %v1248_v32, %v283_v36 }
 0x2f2   :  { %v285_v45 = vadd.f32 %v1248_v32, %v284_v40 }
 0x2f4   :  { %v289_v48 = vsel %vm288_vm0, %v1248_v32, %v285_v45 }
 0x2f5   :  { %v294_v50 = vsel %vm291_vm1, %v293_v49, %v289_v48 }
 0x2f6   :  { %v308_v9 = vsub.f32 1.0, %v294_v50  ;;  %v314_v13 = vmul.f32 %v294_v50, %v1473_v10 }
 0x32c   :  { %v229_v42 = vpop.permute.xlu1 %228 }
 0x32d   :  { %v231_v44 = vmul.f32 %v229_v42, %v224_v43 }
 0x32f   :  { %233 = vrot.lane.b32.xlu0 %v231_v44, %s1325_s15 }
 0x334   :  { %v299_v51 = vpop.permute.xlu2 %298 }
 0x335   :  { %v301_v52 = vmul.f32 %v299_v51, %v294_v50 }
 0x337   :  { %303 = vrot.lane.b32.xlu1 %v301_v52, %s1325_s15 }
 0x3a1   :  { %v234_v53 = vpop.permute.xlu0 %233 }
 0x3a2   :  { %v236_v54 = vadd.f32 %v1169_v19, %v234_v53 }
 0x3a4   :  { %1249 = vtanh.f32 %v236_v54 }
 0x3a9   :  { %v304_v55 = vpop.permute.xlu1 %303 }
 0x3aa   :  { %v1250_v56 = vpop.eup %1249  ;;  %v306_v57 = vadd.f32 %v1173_v22, %v304_v55 }
 0x3ab   :  { %240 = vrot.lane.b32.xlu2 %v1250_v56, %s1327_s18 }
 0x3ac   :  { %1251 = vtanh.f32 %v306_v57 }
 0x3b2   :  { %v1252_v58 = vpop.eup %1251 }
 0x3b3   :  { %310 = vrot.lane.b32.xlu0 %v1252_v58, %s1327_s18 }
 0x405   :  { %v241_v60 = vpop.permute.xlu2 %240 }
 0x406   :  { %v243_v63 = vmul.f32 %v241_v60, %v238_v59 }
 0x408   :  { %v1510_v6 = vadd.f32 %v244_v62, %v243_v63 }
 0x40a   :  { %247 = vrot.lane.b32.xlu1 %v1510_v6, %s1327_s18 }
 0x425   :  { %v311_v12 = vpop.permute.xlu0 %310 }
 0x426   :  { %v313_v15 = vmul.f32 %v311_v12, %v308_v9 }
 0x428   :  { %v1515_v16 = vadd.f32 %v314_v13, %v313_v15 }
 0x42a   :  { %317 = vrot.lane.b32.xlu2 %v1515_v16, %s1327_s18 }
 0x47c   :  { %v248_v17 = vpop.permute.xlu1 %247 }
 0x47d   :  { %1172 = vst.msk [vmem:[%s1747_s6 + $0x2] sm:$0x3] %vm109_vm8, %v248_v17  ;;  %1178 = vmatmul.msk.f32.vlgmr.msrb.gmra.mxu0 %vm38_vm9, %v248_v17 }
 0x47e   :  { %898 = vmatpush.msrb.mxu0 %v1366_v0 }
 0x480   :  { %899 = vmatpush.msrb.mxu0 %v1376_v2 }
 0x482   :  { %900 = vmatpush.msrb.mxu0 %v1388_v4 }
 0x484   :  { %v318_v61 = vpop.permute.xlu2 %317  ;;  %901 = vmatpush.msrb.mxu0 %v1405_v7 }
 0x485   :  { %1176 = vst.msk [vmem:[%s1747_s6 + $0x1c] sm:$0x3] %vm109_vm8, %v318_v61  ;;  %1182 = vmatmul.msk.f32.vlgmr.msrb.gmra.mxu1 %vm38_vm9, %v318_v61 }
 0x486   :  { %968 = vmatpush.msrb.mxu1 %v1371_v1 }
 0x488   :  { %969 = vmatpush.msrb.mxu1 %v1383_v3 }
 0x48a   :  { %970 = vmatpush.msrb.mxu1 %v1393_v5 }
 0x48c   :  { %971 = vmatpush.msrb.mxu1 %v1410_v8 }
 0x4fa   :  { %v343_v10 = vpop.f32.mrf.mxu0 }
 0x4fb   :  { %v366_v18 = vadd.f32 %v343_v10, %v1451_v11  ;;  %v346_v22 = vadd.f32 %v1177_v21, %v343_v10 }
 0x4fd   :  { %368 = vrot.lane.b32.xlu0 %v366_v18, %s1325_s15  ;;  %v1179_v23 = vmul.f32 -1.442695, %v346_v22 }
 0x4ff   :  { %1253 = vpow2.f32 %v1179_v23 }
 0x502   :  { %v413_v19 = vpop.f32.mrf.mxu1 }
 0x503   :  { %v436_v20 = vadd.f32 %v413_v19, %v1455_v14  ;;  %v416_v25 = vadd.f32 %v1181_v24, %v413_v19 }
 0x505   :  { %438 = vrot.lane.b32.xlu1 %v436_v20, %s1325_s15  ;;  %v1183_v26 = vmul.f32 -1.442695, %v416_v25  ;;  %v1254_v27 = vpop.eup %1253 }
 0x506   :  { %v350_v28 = vadd.f32 1.0, %v1254_v27 }
 0x507   :  { %1255 = vpow2.f32 %v1183_v26 }
 0x508   :  { %1257 = vrcp.f32 %v350_v28  ;;  %v362_v39 = vand.u32 2147483648, %v350_v28  ;;  %vm356_vm3 = vweird.f32 %v350_v28  ;;  %v360_v40 = vand.u32 2147483647, %v350_v28 }
 0x50a   :  { %v363_v43 = vor.u32 1.1754944e-38, %v362_v39  ;;  %vm361_vm5 = vcmp.eq.f32.partialorder %v360_v40, 8.507059e+37 }
 0x50d   :  { %v1256_v29 = vpop.eup %1255 }
 0x50e   :  { %v420_v30 = vadd.f32 1.0, %v1256_v29  ;;  %v1258_v31 = vpop.eup %1257 }
 0x50f   :  { %v352_v32 = vmul.f32 %v1258_v31, %v350_v28  ;;  %vm357_vm2 = vweird.f32 %v1258_v31 }
 0x510   :  { %1259 = vrcp.f32 %v420_v30  ;;  %vm358_vm4 = vmor %vm356_vm3, %vm357_vm2  ;;  %v432_v48 = vand.u32 2147483648, %v420_v30  ;;  %vm426_vm7 = vweird.f32 %v420_v30  ;;  %v430_v49 = vand.u32 2147483647, %v420_v30 }
 0x511   :  { %v353_v33 = vsub.f32 1.0, %v352_v32 }
 0x512   :  { %v433_v51 = vor.u32 1.1754944e-38, %v432_v48  ;;  %vm431_vm11 = vcmp.eq.f32.partialorder %v430_v49, 8.507059e+37 }
 0x513   :  { %v354_v35 = vmul.f32 %v1258_v31, %v353_v33 }
 0x515   :  { %v355_v37 = vadd.f32 %v1258_v31, %v354_v35 }
 0x516   :  { %v1260_v34 = vpop.eup %1259 }
 0x517   :  { %v422_v36 = vmul.f32 %v1260_v34, %v420_v30  ;;  %v359_v41 = vsel %vm358_vm4, %v1258_v31, %v355_v37  ;;  %vm427_vm6 = vweird.f32 %v1260_v34 }
 0x518   :  { %v364_v45 = vsel %vm361_vm5, %v363_v43, %v359_v41  ;;  %vm428_vm10 = vmor %vm426_vm7, %vm427_vm6 }
 0x519   :  { %v423_v38 = vsub.f32 1.0, %v422_v36  ;;  %v378_v62 = vsub.f32 1.0, %v364_v45  ;;  %v384_v9 = vmul.f32 %v364_v45, %v1510_v6 }
 0x51b   :  { %v424_v42 = vmul.f32 %v1260_v34, %v423_v38 }
 0x51d   :  { %v425_v47 = vadd.f32 %v1260_v34, %v424_v42 }
 0x51f   :  { %v429_v50 = vsel %vm428_vm10, %v1260_v34, %v425_v47 }
 0x520   :  { %v434_v53 = vsel %vm431_vm11, %v433_v51, %v429_v50 }
 0x521   :  { %v448_v15 = vsub.f32 1.0, %v434_v53  ;;  %v454_v61 = vmul.f32 %v434_v53, %v1515_v16 }
 0x56f   :  { %v369_v44 = vpop.permute.xlu0 %368 }
 0x570   :  { %v371_v46 = vmul.f32 %v369_v44, %v364_v45 }
 0x572   :  { %373 = vrot.lane.b32.xlu2 %v371_v46, %s1325_s15 }
 0x577   :  { %v439_v52 = vpop.permute.xlu1 %438 }
 0x578   :  { %v441_v54 = vmul.f32 %v439_v52, %v434_v53 }
 0x57a   :  { %443 = vrot.lane.b32.xlu0 %v441_v54, %s1325_s15 }
 0x5cc   :  { %v374_v55 = vpop.permute.xlu2 %373 }
 0x5cd   :  { %v376_v56 = vadd.f32 %v1177_v21, %v374_v55  ;;  %v1189_v21 = vld [vmem:[%s1746_s1 + $0x8] sm:$0x3] }
 0x5cf   :  { %1261 = vtanh.f32 %v376_v56 }
 0x5d5   :  { %v1262_v57 = vpop.eup %1261 }
 0x5d6   :  { %380 = vrot.lane.b32.xlu1 %v1262_v57, %s1327_s18 }
 0x5ec   :  { %v444_v58 = vpop.permute.xlu0 %443 }
 0x5ed   :  { %v446_v59 = vadd.f32 %v1181_v24, %v444_v58 }
 0x5ef   :  { %1263 = vtanh.f32 %v446_v59 }
 0x5f5   :  { %v1264_v60 = vpop.eup %1263 }
 0x5f6   :  { %450 = vrot.lane.b32.xlu2 %v1264_v60, %s1327_s18 }
 0x648   :  { %v381_v63 = vpop.permute.xlu1 %380 }
 0x649   :  { %v383_v12 = vmul.f32 %v381_v63, %v378_v62 }
 0x64b   :  { %v1552_v13 = vadd.f32 %v384_v9, %v383_v12 }
 0x64d   :  { %387 = vrot.lane.b32.xlu0 %v1552_v13, %s1327_s18 }
 0x650   :  { %v451_v17 = vpop.permute.xlu2 %450 }
 0x651   :  { %v453_v10 = vmul.f32 %v451_v17, %v448_v15 }
 0x653   :  { %v1557_v18 = vadd.f32 %v454_v61, %v453_v10 }
 0x655   :  { %457 = vrot.lane.b32.xlu1 %v1557_v18, %s1327_s18 }
 0x6bf   :  { %v388_v19 = vpop.permute.xlu0 %387 }
 0x6c0   :  { %1180 = vst.msk [vmem:[%s1747_s6 + $0x4] sm:$0x3] %vm109_vm8, %v388_v19  ;;  %1186 = vmatmul.msk.f32.vlgmr.msrb.gmra.mxu2 %vm38_vm9, %v388_v19  ;;  %v1193_v19 = vld [vmem:[%s1745_s0 + $0x8] sm:$0x3] }
 0x6c1   :  { %1038 = vmatpush.msrb.mxu2 %v1366_v0 }
 0x6c3   :  { %1039 = vmatpush.msrb.mxu2 %v1376_v2 }
 0x6c5   :  { %1040 = vmatpush.msrb.mxu2 %v1388_v4 }
 0x6c7   :  { %v458_v6 = vpop.permute.xlu1 %457  ;;  %1041 = vmatpush.msrb.mxu2 %v1405_v7 }
 0x6c8   :  { %1184 = vst.msk [vmem:[%s1747_s6 + $0x1a] sm:$0x3] %vm109_vm8, %v458_v6  ;;  %1190 = vmatmul.msk.f32.vlgmr.msrb.gmra.mxu3 %vm38_vm9, %v458_v6 }
 0x6c9   :  { %1107 = vmatpush.msrb.mxu3 %v1371_v1  ;;  %v1185_v1 = vld [vmem:[%s1745_s0 + $0x6] sm:$0x3] }
 0x6cb   :  { %1108 = vmatpush.msrb.mxu3 %v1383_v3 }
 0x6cd   :  { %1109 = vmatpush.msrb.mxu3 %v1393_v5 }
 0x6cf   :  { %1110 = vmatpush.msrb.mxu3 %v1410_v8 }
 0x743   :  { %v483_v0 = vpop.f32.mrf.mxu2 }
 0x744   :  { %v506_v2 = vadd.f32 %v483_v0, %v1451_v11  ;;  %v486_v16 = vadd.f32 %v1185_v1, %v483_v0 }
 0x746   :  { %508 = vrot.lane.b32.xlu2 %v506_v2, %s1325_s15  ;;  %v1187_v3 = vmul.f32 -1.442695, %v486_v16  ;;  %v1197_v2 = vld [vmem:[%s1746_s1 + $0x6] sm:$0x3] }
 0x748   :  { %1265 = vpow2.f32 %v1187_v3 }
 0x74b   :  { %v553_v4 = vpop.f32.mrf.mxu3 }
 0x74c   :  { %v576_v7 = vadd.f32 %v553_v4, %v1455_v14  ;;  %v556_v23 = vadd.f32 %v1189_v21, %v553_v4 }
 0x74e   :  { %578 = vrot.lane.b32.xlu0 %v576_v7, %s1325_s15  ;;  %v1266_v5 = vpop.eup %1265  ;;  %v1191_v25 = vmul.f32 -1.442695, %v556_v23 }
 0x74f   :  { %v490_v20 = vadd.f32 1.0, %v1266_v5 }
 0x751   :  { %1267 = vrcp.f32 %v490_v20  ;;  %v502_v28 = vand.u32 2147483648, %v490_v20  ;;  %vm496_vm13 = vweird.f32 %v490_v20  ;;  %v500_v29 = vand.u32 2147483647, %v490_v20 }
 0x752   :  { %1269 = vpow2.f32 %v1191_v25 }
 0x753   :  { %v503_v32 = vor.u32 1.1754944e-38, %v502_v28  ;;  %vm501_vm15 = vcmp.eq.f32.partialorder %v500_v29, 8.507059e+37 }
 0x757   :  { %v1268_v8 = vpop.eup %1267 }
 0x758   :  { %v492_v22 = vmul.f32 %v1268_v8, %v490_v20  ;;  %vm497_vm12 = vweird.f32 %v1268_v8  ;;  %v1270_v30 = vpop.eup %1269 }
 0x759   :  { %vm498_vm14 = vmor %vm496_vm13, %vm497_vm12  ;;  %v560_v33 = vadd.f32 1.0, %v1270_v30 }
 0x75a   :  { %v493_v24 = vsub.f32 1.0, %v492_v22 }
 0x75b   :  { %1271 = vrcp.f32 %v560_v33  ;;  %v572_v42 = vand.u32 2147483648, %v560_v33  ;;  %vm566_vm1 = vweird.f32 %v560_v33  ;;  %v570_v43 = vand.u32 2147483647, %v560_v33 }
 0x75c   :  { %v494_v26 = vmul.f32 %v1268_v8, %v493_v24 }
 0x75d   :  { %v573_v45 = vor.u32 1.1754944e-38, %v572_v42  ;;  %vm571_vm3 = vcmp.eq.f32.partialorder %v570_v43, 8.507059e+37 }
 0x75e   :  { %v495_v27 = vadd.f32 %v1268_v8, %v494_v26 }
 0x760   :  { %v499_v31 = vsel %vm498_vm14, %v1268_v8, %v495_v27 }
 0x761   :  { %v504_v34 = vsel %vm501_vm15, %v503_v32, %v499_v31  ;;  %v1272_v37 = vpop.eup %1271 }
 0x762   :  { %v562_v38 = vmul.f32 %v1272_v37, %v560_v33  ;;  %vm567_vm0 = vweird.f32 %v1272_v37  ;;  %v518_v55 = vsub.f32 1.0, %v504_v34  ;;  %v524_v57 = vmul.f32 %v504_v34, %v1552_v13 }
 0x763   :  { %vm568_vm2 = vmor %vm566_vm1, %vm567_vm0 }
 0x764   :  { %v563_v39 = vsub.f32 1.0, %v562_v38 }
 0x766   :  { %v564_v40 = vmul.f32 %v1272_v37, %v563_v39 }
 0x768   :  { %v565_v41 = vadd.f32 %v1272_v37, %v564_v40 }
 0x76a   :  { %v569_v44 = vsel %vm568_vm2, %v1272_v37, %v565_v41 }
 0x76b   :  { %v574_v47 = vsel %vm571_vm3, %v573_v45, %v569_v44 }
 0x76c   :  { %v588_v60 = vsub.f32 1.0, %v574_v47  ;;  %v594_v63 = vmul.f32 %v574_v47, %v1557_v18 }
 0x7a0   :  { %v509_v35 = vpop.permute.xlu2 %508 }
 0x7a1   :  { %v511_v36 = vmul.f32 %v509_v35, %v504_v34 }
 0x7a3   :  { %513 = vrot.lane.b32.xlu1 %v511_v36, %s1325_s15 }
 0x7c0   :  { %v579_v46 = vpop.permute.xlu0 %578 }
 0x7c1   :  { %v581_v48 = vmul.f32 %v579_v46, %v574_v47 }
 0x7c3   :  { %583 = vrot.lane.b32.xlu2 %v581_v48, %s1325_s15 }
 0x815   :  { %v514_v49 = vpop.permute.xlu1 %513 }
 0x816   :  { %v516_v50 = vadd.f32 %v1185_v1, %v514_v49 }
 0x818   :  { %1273 = vtanh.f32 %v516_v50 }
 0x81d   :  { %v584_v51 = vpop.permute.xlu2 %583 }
 0x81e   :  { %v1274_v52 = vpop.eup %1273  ;;  %v586_v53 = vadd.f32 %v1189_v21, %v584_v51 }
 0x81f   :  { %520 = vrot.lane.b32.xlu0 %v1274_v52, %s1327_s18 }
 0x820   :  { %1275 = vtanh.f32 %v586_v53 }
 0x826   :  { %v1276_v54 = vpop.eup %1275 }
 0x827   :  { %590 = vrot.lane.b32.xlu1 %v1276_v54, %s1327_s18 }
 0x891   :  { %v521_v56 = vpop.permute.xlu0 %520 }
 0x892   :  { %v523_v58 = vmul.f32 %v521_v56, %v518_v55 }
 0x894   :  { %v1594_v59 = vadd.f32 %v524_v57, %v523_v58 }
 0x896   :  { %527 = vrot.lane.b32.xlu2 %v1594_v59, %s1327_s18 }
 0x899   :  { %v591_v62 = vpop.permute.xlu1 %590 }
 0x89a   :  { %v593_v9 = vmul.f32 %v591_v62, %v588_v60 }
 0x89c   :  { %v1599_v12 = vadd.f32 %v594_v63, %v593_v9 }
 0x89e   :  { %597 = vrot.lane.b32.xlu0 %v1599_v12, %s1327_s18 }
 0x8f0   :  { %v528_v15 = vpop.permute.xlu2 %527 }
 0x8f1   :  { %1188 = vst.msk [vmem:[%s1747_s6 + $0x6] sm:$0x3] %vm109_vm8, %v528_v15  ;;  %1194 = vmatmul.msk.f32.vlgmr.msra.gmra.mxu0 %vm38_vm9, %v528_v15  ;;  %v1201_v15 = vld [vmem:[%s1745_s0 + $0xa] sm:$0x3] }
 0x910   :  { %v598_v13 = vpop.permute.xlu0 %597 }
 0x911   :  { %1192 = vst.msk [vmem:[%s1747_s6 + $0x18] sm:$0x3] %vm109_vm8, %v598_v13  ;;  %1198 = vmatmul.msk.f32.vlgmr.msra.gmra.mxu1 %vm38_vm9, %v598_v13 }
 0x96e   :  { %v623_v17 = vpop.f32.mrf.mxu0 }
 0x96f   :  { %v646_v61 = vadd.f32 %v623_v17, %v1451_v11  ;;  %v626_v6 = vadd.f32 %v1193_v19, %v623_v17 }
 0x971   :  { %648 = vrot.lane.b32.xlu1 %v646_v61, %s1325_s15  ;;  %v1195_v0 = vmul.f32 -1.442695, %v626_v6  ;;  %v1205_v61 = vld [vmem:[%s1746_s1 + $0x4] sm:$0x3] }
 0x973   :  { %1277 = vpow2.f32 %v1195_v0 }
 0x979   :  { %v1278_v1 = vpop.eup %1277 }
 0x97a   :  { %v630_v16 = vadd.f32 1.0, %v1278_v1 }
 0x97c   :  { %v642_v27 = vand.u32 2147483648, %v630_v16  ;;  %vm636_vm5 = vweird.f32 %v630_v16  ;;  %v640_v28 = vand.u32 2147483647, %v630_v16 }
 0x97e   :  { %v643_v31 = vor.u32 1.1754944e-38, %v642_v27  ;;  %vm641_vm7 = vcmp.eq.f32.partialorder %v640_v28, 8.507059e+37 }
 0x98e   :  { %v693_v10 = vpop.f32.mrf.mxu1 }
 0x98f   :  { %v716_v18 = vadd.f32 %v693_v10, %v1455_v14  ;;  %v696_v4 = vadd.f32 %v1197_v2, %v693_v10 }
 0x991   :  { %718 = vrot.lane.b32.xlu2 %v716_v18, %s1325_s15  ;;  %v1199_v7 = vmul.f32 -1.442695, %v696_v4 }
 0x993   :  { %1279 = vpow2.f32 %v1199_v7 }
 0x994   :  { %1281 = vrcp.f32 %v630_v16 }
 0x999   :  { %v1280_v3 = vpop.eup %1279 }
 0x99a   :  { %v700_v5 = vadd.f32 1.0, %v1280_v3  ;;  %v1282_v20 = vpop.eup %1281 }
 0x99b   :  { %v632_v8 = vmul.f32 %v1282_v20, %v630_v16  ;;  %vm637_vm4 = vweird.f32 %v1282_v20 }
 0x99c   :  { %1283 = vrcp.f32 %v700_v5  ;;  %vm638_vm6 = vmor %vm636_vm5, %vm637_vm4  ;;  %v712_v36 = vand.u32 2147483648, %v700_v5  ;;  %vm706_vm11 = vweird.f32 %v700_v5  ;;  %v710_v37 = vand.u32 2147483647, %v700_v5 }
 0x99d   :  { %v633_v21 = vsub.f32 1.0, %v632_v8 }
 0x99e   :  { %v713_v39 = vor.u32 1.1754944e-38, %v712_v36  ;;  %vm711_vm13 = vcmp.eq.f32.partialorder %v710_v37, 8.507059e+37 }
 0x99f   :  { %v634_v23 = vmul.f32 %v1282_v20, %v633_v21 }
 0x9a1   :  { %v635_v25 = vadd.f32 %v1282_v20, %v634_v23 }
 0x9a2   :  { %v1284_v22 = vpop.eup %1283 }
 0x9a3   :  { %v702_v24 = vmul.f32 %v1284_v22, %v700_v5  ;;  %v639_v29 = vsel %vm638_vm6, %v1282_v20, %v635_v25  ;;  %vm707_vm10 = vweird.f32 %v1284_v22 }
 0x9a4   :  { %v644_v33 = vsel %vm641_vm7, %v643_v31, %v639_v29  ;;  %vm708_vm12 = vmor %vm706_vm11, %vm707_vm10 }
 0x9a5   :  { %v703_v26 = vsub.f32 1.0, %v702_v24  ;;  %v658_v49 = vsub.f32 1.0, %v644_v33  ;;  %v664_v51 = vmul.f32 %v644_v33, %v1594_v59 }
 0x9a7   :  { %v704_v30 = vmul.f32 %v1284_v22, %v703_v26 }
 0x9a9   :  { %v705_v35 = vadd.f32 %v1284_v22, %v704_v30 }
 0x9ab   :  { %v709_v38 = vsel %vm708_vm12, %v1284_v22, %v705_v35 }
 0x9ac   :  { %v714_v40 = vsel %vm711_vm13, %v713_v39, %v709_v38 }
 0x9ad   :  { %v728_v54 = vsub.f32 1.0, %v714_v40  ;;  %v734_v56 = vmul.f32 %v714_v40, %v1599_v12 }
 0x9e3   :  { %v649_v32 = vpop.permute.xlu1 %648 }
 0x9e4   :  { %v651_v34 = vmul.f32 %v649_v32, %v644_v33 }
 0x9e6   :  { %653 = vrot.lane.b32.xlu0 %v651_v34, %s1325_s15 }
 0x9eb   :  { %v719_v41 = vpop.permute.xlu2 %718 }
 0x9ec   :  { %v721_v42 = vmul.f32 %v719_v41, %v714_v40 }
 0x9ee   :  { %723 = vrot.lane.b32.xlu1 %v721_v42, %s1325_s15 }
 0xa58   :  { %v654_v43 = vpop.permute.xlu0 %653 }
 0xa59   :  { %v656_v44 = vadd.f32 %v1193_v19, %v654_v43 }
 0xa5b   :  { %1285 = vtanh.f32 %v656_v44 }
 0xa60   :  { %v724_v45 = vpop.permute.xlu1 %723 }
 0xa61   :  { %v1286_v46 = vpop.eup %1285  ;;  %v726_v47 = vadd.f32 %v1197_v2, %v724_v45 }
 0xa62   :  { %660 = vrot.lane.b32.xlu2 %v1286_v46, %s1327_s18 }
 0xa63   :  { %1287 = vtanh.f32 %v726_v47 }
 0xa69   :  { %v1288_v48 = vpop.eup %1287 }
 0xa6a   :  { %730 = vrot.lane.b32.xlu0 %v1288_v48, %s1327_s18 }
 0xabc   :  { %v661_v50 = vpop.permute.xlu2 %660 }
 0xabd   :  { %v663_v52 = vmul.f32 %v661_v50, %v658_v49 }
 0xabf   :  { %v1628_v53 = vadd.f32 %v664_v51, %v663_v52 }
 0xac1   :  { %667 = vrot.lane.b32.xlu1 %v1628_v53, %s1327_s18 }
 0xadc   :  { %v731_v55 = vpop.permute.xlu0 %730 }
 0xadd   :  { %v733_v57 = vmul.f32 %v731_v55, %v728_v54 }
 0xadf   :  { %v1633_v58 = vadd.f32 %v734_v56, %v733_v57 }
 0xae1   :  { %737 = vrot.lane.b32.xlu2 %v1633_v58, %s1327_s18 }
 0xb33   :  { %v668_v60 = vpop.permute.xlu1 %667 }
 0xb34   :  { %1196 = vst.msk [vmem:[%s1747_s6 + $0x8] sm:$0x3] %vm109_vm8, %v668_v60  ;;  %1202 = vmatmul.msk.f32.vlgmr.msra.gmra.mxu2 %vm38_vm9, %v668_v60  ;;  %v1209_v60 = vld [vmem:[%s1745_s0 + $0xc] sm:$0x3] }
 0xb3b   :  { %v738_v59 = vpop.permute.xlu2 %737 }
 0xb3c   :  { %1200 = vst.msk [vmem:[%s1747_s6 + $0x16] sm:$0x3] %vm109_vm8, %v738_v59  ;;  %1206 = vmatmul.msk.f32.vlgmr.msra.gmra.mxu3 %vm38_vm9, %v738_v59 }
 0xbb7   :  { %v763_v62 = vpop.f32.mrf.mxu2 }
 0xbb8   :  { %v786_v63 = vadd.f32 %v763_v62, %v1451_v11  ;;  %v766_v13 = vadd.f32 %v1201_v15, %v763_v62 }
 0xbba   :  { %788 = vrot.lane.b32.xlu0 %v786_v63, %s1325_s15  ;;  %v1203_v17 = vmul.f32 -1.442695, %v766_v13 }
 0xbbc   :  { %1289 = vpow2.f32 %v1203_v17 }
 0xbbf   :  { %v833_v9 = vpop.f32.mrf.mxu3 }
 0xbc0   :  { %v856_v12 = vadd.f32 %v833_v9, %v1455_v14  ;;  %v836_v10 = vadd.f32 %v1205_v61, %v833_v9 }
 0xbc2   :  { %858 = vrot.lane.b32.xlu1 %v856_v12, %s1325_s15  ;;  %v1207_v18 = vmul.f32 -1.442695, %v836_v10  ;;  %v1290_v19 = vpop.eup %1289 }
 0xbc3   :  { %v770_v6 = vadd.f32 1.0, %v1290_v19 }
 0xbc4   :  { %1291 = vpow2.f32 %v1207_v18 }
 0xbc5   :  { %1293 = vrcp.f32 %v770_v6  ;;  %v782_v21 = vand.u32 2147483648, %v770_v6  ;;  %vm776_vm15 = vweird.f32 %v770_v6  ;;  %v780_v22 = vand.u32 2147483647, %v770_v6 }
 0xbc7   :  { %v783_v25 = vor.u32 1.1754944e-38, %v782_v21  ;;  %vm781_vm1 = vcmp.eq.f32.partialorder %v780_v22, 8.507059e+37 }
 0xbca   :  { %v1292_v0 = vpop.eup %1291 }
 0xbcb   :  { %v840_v2 = vadd.f32 1.0, %v1292_v0  ;;  %v1294_v4 = vpop.eup %1293 }
 0xbcc   :  { %v772_v7 = vmul.f32 %v1294_v4, %v770_v6  ;;  %vm777_vm14 = vweird.f32 %v1294_v4 }
 0xbcd   :  { %1295 = vrcp.f32 %v840_v2  ;;  %vm778_vm0 = vmor %vm776_vm15, %vm777_vm14  ;;  %v852_v30 = vand.u32 2147483648, %v840_v2  ;;  %vm846_vm3 = vweird.f32 %v840_v2  ;;  %v850_v31 = vand.u32 2147483647, %v840_v2 }
 0xbce   :  { %v773_v1 = vsub.f32 1.0, %v772_v7 }
 0xbcf   :  { %v853_v33 = vor.u32 1.1754944e-38, %v852_v30  ;;  %vm851_vm5 = vcmp.eq.f32.partialorder %v850_v31, 8.507059e+37 }
 0xbd0   :  { %v774_v3 = vmul.f32 %v1294_v4, %v773_v1 }
 0xbd2   :  { %v775_v20 = vadd.f32 %v1294_v4, %v774_v3 }
 0xbd3   :  { %v1296_v16 = vpop.eup %1295 }
 0xbd4   :  { %v842_v5 = vmul.f32 %v1296_v16, %v840_v2  ;;  %v779_v23 = vsel %vm778_vm0, %v1294_v4, %v775_v20  ;;  %vm847_vm2 = vweird.f32 %v1296_v16 }
 0xbd5   :  { %v784_v27 = vsel %vm781_vm1, %v783_v25, %v779_v23  ;;  %vm848_vm4 = vmor %vm846_vm3, %vm847_vm2 }
 0xbd6   :  { %v843_v8 = vsub.f32 1.0, %v842_v5  ;;  %v798_v43 = vsub.f32 1.0, %v784_v27  ;;  %v804_v45 = vmul.f32 %v784_v27, %v1628_v53 }
 0xbd8   :  { %v844_v24 = vmul.f32 %v1296_v16, %v843_v8 }
 0xbda   :  { %v845_v29 = vadd.f32 %v1296_v16, %v844_v24 }
 0xbdc   :  { %v849_v32 = vsel %vm848_vm4, %v1296_v16, %v845_v29 }
 0xbdd   :  { %v854_v35 = vsel %vm851_vm5, %v853_v33, %v849_v32 }
 0xbde   :  { %v868_v48 = vsub.f32 1.0, %v854_v35  ;;  %v874_v50 = vmul.f32 %v854_v35, %v1633_v58 }
 0xc2c   :  { %v789_v26 = vpop.permute.xlu0 %788 }
 0xc2d   :  { %v791_v28 = vmul.f32 %v789_v26, %v784_v27 }
 0xc2f   :  { %793 = vrot.lane.b32.xlu2 %v791_v28, %s1325_s15 }
 0xc34   :  { %v859_v34 = vpop.permute.xlu1 %858 }
 0xc35   :  { %v861_v36 = vmul.f32 %v859_v34, %v854_v35 }
 0xc37   :  { %863 = vrot.lane.b32.xlu0 %v861_v36, %s1325_s15 }
 0xc89   :  { %v794_v37 = vpop.permute.xlu2 %793 }
 0xc8a   :  { %v796_v38 = vadd.f32 %v1201_v15, %v794_v37  ;;  %v1213_v15 = vld [vmem:[%s1746_s1 + $0x2] sm:$0x3] }
 0xc8c   :  { %1297 = vtanh.f32 %v796_v38 }
 0xc92   :  { %v1298_v39 = vpop.eup %1297 }
 0xc93   :  { %800 = vrot.lane.b32.xlu1 %v1298_v39, %s1327_s18 }
 0xca9   :  { %v864_v40 = vpop.permute.xlu0 %863 }
 0xcaa   :  { %v866_v41 = vadd.f32 %v1205_v61, %v864_v40 }
 0xcac   :  { %1299 = vtanh.f32 %v866_v41 }
 0xcb2   :  { %v1300_v42 = vpop.eup %1299 }
 0xcb3   :  { %870 = vrot.lane.b32.xlu2 %v1300_v42, %s1327_s18 }
 0xd05   :  { %v801_v44 = vpop.permute.xlu1 %800 }
 0xd06   :  { %v803_v46 = vmul.f32 %v801_v44, %v798_v43 }
 0xd08   :  { %v1662_v47 = vadd.f32 %v804_v45, %v803_v46 }
 0xd0a   :  { %807 = vrot.lane.b32.xlu0 %v1662_v47, %s1327_s18 }
 0xd0d   :  { %v871_v49 = vpop.permute.xlu2 %870 }
 0xd0e   :  { %v873_v51 = vmul.f32 %v871_v49, %v868_v48 }
 0xd10   :  { %v1667_v52 = vadd.f32 %v874_v50, %v873_v51 }
 0xd12   :  { %877 = vrot.lane.b32.xlu1 %v1667_v52, %s1327_s18 }
 0xd7c   :  { %v808_v54 = vpop.permute.xlu0 %807 }
 0xd7d   :  { %1204 = vst.msk [vmem:[%s1747_s6 + $0xa] sm:$0x3] %vm109_vm8, %v808_v54  ;;  %1210 = vmatmul.msk.f32.vlgmr.msrb.gmra.mxu0 %vm38_vm9, %v808_v54  ;;  %v1217_v54 = vld [vmem:[%s1745_s0 + $0xe] sm:$0x3] }
 0xd84   :  { %v878_v53 = vpop.permute.xlu1 %877 }
 0xd85   :  { %1208 = vst.msk [vmem:[%s1747_s6 + $0x14] sm:$0x3] %vm109_vm8, %v878_v53  ;;  %1214 = vmatmul.msk.f32.vlgmr.msrb.gmra.mxu1 %vm38_vm9, %v878_v53 }
 0xdfa   :  { %v903_v55 = vpop.f32.mrf.mxu0 }
 0xdfb   :  { %v926_v56 = vadd.f32 %v903_v55, %v1451_v11  ;;  %v906_v59 = vadd.f32 %v1209_v60, %v903_v55 }
 0xdfd   :  { %928 = vrot.lane.b32.xlu2 %v926_v56, %s1325_s15  ;;  %v1211_v62 = vmul.f32 -1.442695, %v906_v59  ;;  %v1092_v56 = vld [vmem:[%s1746_s1] sm:$0x3] }
 0xdff   :  { %1301 = vpow2.f32 %v1211_v62 }
 0xe02   :  { %v973_v57 = vpop.f32.mrf.mxu1 }
 0xe03   :  { %v996_v58 = vadd.f32 %v973_v57, %v1455_v14  ;;  %v976_v17 = vadd.f32 %v1213_v15, %v973_v57 }
 0xe05   :  { %998 = vrot.lane.b32.xlu0 %v996_v58, %s1325_s15  ;;  %v1302_v63 = vpop.eup %1301  ;;  %v1215_v10 = vmul.f32 -1.442695, %v976_v17 }
 0xe06   :  { %v910_v9 = vadd.f32 1.0, %v1302_v63 }
 0xe08   :  { %1303 = vrcp.f32 %v910_v9  ;;  %v922_v6 = vand.u32 2147483648, %v910_v9  ;;  %vm916_vm7 = vweird.f32 %v910_v9  ;;  %v920_v0 = vand.u32 2147483647, %v910_v9 }
 0xe09   :  { %1305 = vpow2.f32 %v1215_v10 }
 0xe0a   :  { %v923_v7 = vor.u32 1.1754944e-38, %v922_v6  ;;  %vm921_vm11 = vcmp.eq.f32.partialorder %v920_v0, 8.507059e+37 }
 0xe0e   :  { %v1304_v12 = vpop.eup %1303 }
 0xe0f   :  { %v912_v13 = vmul.f32 %v1304_v12, %v910_v9  ;;  %vm917_vm6 = vweird.f32 %v1304_v12  ;;  %v1306_v2 = vpop.eup %1305 }
 0xe10   :  { %vm918_vm10 = vmor %vm916_vm7, %vm917_vm6  ;;  %v980_v1 = vadd.f32 1.0, %v1306_v2 }
 0xe11   :  { %v913_v61 = vsub.f32 1.0, %v912_v13 }
 0xe12   :  { %1307 = vrcp.f32 %v980_v1  ;;  %v992_v24 = vand.u32 2147483648, %v980_v1  ;;  %vm986_vm13 = vweird.f32 %v980_v1  ;;  %v990_v25 = vand.u32 2147483647, %v980_v1 }
 0xe13   :  { %v914_v18 = vmul.f32 %v1304_v12, %v913_v61 }
 0xe14   :  { %v993_v27 = vor.u32 1.1754944e-38, %v992_v24  ;;  %vm991_vm15 = vcmp.eq.f32.partialorder %v990_v25, 8.507059e+37 }
 0xe15   :  { %v915_v19 = vadd.f32 %v1304_v12, %v914_v18 }
 0xe17   :  { %v919_v4 = vsel %vm918_vm10, %v1304_v12, %v915_v19 }
 0xe18   :  { %v924_v16 = vsel %vm921_vm11, %v923_v7, %v919_v4  ;;  %v1308_v20 = vpop.eup %1307 }
 0xe19   :  { %v982_v8 = vmul.f32 %v1308_v20, %v980_v1  ;;  %vm987_vm12 = vweird.f32 %v1308_v20  ;;  %v938_v37 = vsub.f32 1.0, %v924_v16  ;;  %v944_v39 = vmul.f32 %v924_v16, %v1662_v47 }
 0xe1a   :  { %vm988_vm14 = vmor %vm986_vm13, %vm987_vm12 }
 0xe1b   :  { %v983_v21 = vsub.f32 1.0, %v982_v8 }
 0xe1d   :  { %v984_v22 = vmul.f32 %v1308_v20, %v983_v21 }
 0xe1f   :  { %v985_v23 = vadd.f32 %v1308_v20, %v984_v22 }
 0xe21   :  { %v989_v26 = vsel %vm988_vm14, %v1308_v20, %v985_v23 }
 0xe22   :  { %v994_v29 = vsel %vm991_vm15, %v993_v27, %v989_v26 }
 0xe23   :  { %v1008_v42 = vsub.f32 1.0, %v994_v29  ;;  %v1014_v44 = vmul.f32 %v994_v29, %v1667_v52 }
 0xe57   :  { %v929_v3 = vpop.permute.xlu2 %928 }
 0xe58   :  { %v931_v5 = vmul.f32 %v929_v3, %v924_v16 }
 0xe5a   :  { %933 = vrot.lane.b32.xlu1 %v931_v5, %s1325_s15 }
 0xe77   :  { %v999_v28 = vpop.permute.xlu0 %998 }
 0xe78   :  { %v1001_v30 = vmul.f32 %v999_v28, %v994_v29 }
 0xe7a   :  { %1003 = vrot.lane.b32.xlu2 %v1001_v30, %s1325_s15 }
 0xecc   :  { %v934_v31 = vpop.permute.xlu1 %933 }
 0xecd   :  { %v936_v32 = vadd.f32 %v1209_v60, %v934_v31 }
 0xecf   :  { %1309 = vtanh.f32 %v936_v32 }
 0xed4   :  { %v1004_v33 = vpop.permute.xlu2 %1003 }
 0xed5   :  { %v1310_v34 = vpop.eup %1309  ;;  %v1006_v35 = vadd.f32 %v1213_v15, %v1004_v33 }
 0xed6   :  { %940 = vrot.lane.b32.xlu0 %v1310_v34, %s1327_s18 }
 0xed7   :  { %1311 = vtanh.f32 %v1006_v35 }
 0xedd   :  { %v1312_v36 = vpop.eup %1311 }
 0xede   :  { %1010 = vrot.lane.b32.xlu1 %v1312_v36, %s1327_s18 }
 0xf48   :  { %v941_v38 = vpop.permute.xlu0 %940 }
 0xf49   :  { %v943_v40 = vmul.f32 %v941_v38, %v938_v37 }
 0xf4b   :  { %v1696_v41 = vadd.f32 %v944_v39, %v943_v40 }
 0xf4d   :  { %947 = vrot.lane.b32.xlu2 %v1696_v41, %s1327_s18 }
 0xf50   :  { %v1011_v43 = vpop.permute.xlu1 %1010 }
 0xf51   :  { %v1013_v45 = vmul.f32 %v1011_v43, %v1008_v42 }
 0xf53   :  { %v1701_v46 = vadd.f32 %v1014_v44, %v1013_v45 }
 0xf55   :  { %1017 = vrot.lane.b32.xlu0 %v1701_v46, %s1327_s18 }
 0xfa7   :  { %v948_v48 = vpop.permute.xlu2 %947 }
 0xfa8   :  { %1212 = vst.msk [vmem:[%s1747_s6 + $0xc] sm:$0x3] %vm109_vm8, %v948_v48  ;;  %1218 = vmatmul.msk.f32.vlgmr.msrb.gmra.mxu2 %vm38_vm9, %v948_v48 }
 0xfc7   :  { %v1018_v47 = vpop.permute.xlu0 %1017 }
 0xfc8   :  { %1216 = vst.msk [vmem:[%s1747_s6 + $0x12] sm:$0x3] %vm109_vm8, %v1018_v47  ;;  %1221 = vmatmul.msk.f32.vlgmr.msrb.gmra.mxu3 %vm38_vm9, %v1018_v47 }
0x102b   :  { %v1043_v49 = vpop.f32.mrf.mxu2 }
0x102c   :  { %v1066_v50 = vadd.f32 %v1043_v49, %v1451_v11  ;;  %v1046_v53 = vadd.f32 %v1217_v54, %v1043_v49 }
0x102e   :  { %1068 = vrot.lane.b32.xlu1 %v1066_v50, %s1325_s15  ;;  %v1219_v55 = vmul.f32 -1.442695, %v1046_v53 }
0x1030   :  { %1313 = vpow2.f32 %v1219_v55 }
0x1036   :  { %v1314_v58 = vpop.eup %1313 }
0x1037   :  { %v1050_v60 = vadd.f32 1.0, %v1314_v58 }
0x1039   :  { %v1062_v10 = vand.u32 2147483648, %v1050_v60  ;;  %vm1056_vm0 = vweird.f32 %v1050_v60  ;;  %v1060_v18 = vand.u32 2147483647, %v1050_v60 }
0x103b   :  { %v1063_v0 = vor.u32 1.1754944e-38, %v1062_v10  ;;  %vm1061_vm2 = vcmp.eq.f32.partialorder %v1060_v18, 8.507059e+37 }
0x104b   :  { %v1112_v51 = vpop.f32.mrf.mxu3 }
0x104c   :  { %v1135_v52 = vadd.f32 %v1112_v51, %v1455_v14  ;;  %v1115_v57 = vadd.f32 %v1112_v51, %v1092_v56 }
0x104e   :  { %1137 = vrot.lane.b32.xlu2 %v1135_v52, %s1325_s15  ;;  %v1222_v11 = vmul.f32 -1.442695, %v1115_v57 }
0x1050   :  { %1315 = vpow2.f32 %v1222_v11 }
0x1051   :  { %1317 = vrcp.f32 %v1050_v60 }
0x1056   :  { %v1316_v14 = vpop.eup %1315 }
0x1057   :  { %v1119_v59 = vadd.f32 1.0, %v1316_v14  ;;  %v1318_v62 = vpop.eup %1317 }
0x1058   :  { %v1052_v63 = vmul.f32 %v1318_v62, %v1050_v60  ;;  %vm1057_vm9 = vweird.f32 %v1318_v62 }
0x1059   :  { %1319 = vrcp.f32 %v1119_v59  ;;  %vm1058_vm1 = vmor %vm1056_vm0, %vm1057_vm9  ;;  %v1131_v16 = vand.u32 2147483648, %v1119_v59  ;;  %vm1125_vm4 = vweird.f32 %v1119_v59  ;;  %v1129_v3 = vand.u32 2147483647, %v1119_v59 }
0x105a   :  { %v1053_v9 = vsub.f32 1.0, %v1052_v63 }
0x105b   :  { %v1132_v20 = vor.u32 1.1754944e-38, %v1131_v16  ;;  %vm1130_vm6 = vcmp.eq.f32.partialorder %v1129_v3, 8.507059e+37 }
0x105c   :  { %v1054_v15 = vmul.f32 %v1318_v62, %v1053_v9 }
0x105e   :  { %v1055_v17 = vadd.f32 %v1318_v62, %v1054_v15 }
0x105f   :  { %v1320_v12 = vpop.eup %1319 }
0x1060   :  { %v1121_v13 = vmul.f32 %v1320_v12, %v1119_v59  ;;  %v1059_v19 = vsel %vm1058_vm1, %v1318_v62, %v1055_v17  ;;  %vm1126_vm3 = vweird.f32 %v1320_v12 }
0x1061   :  { %v1064_v4 = vsel %vm1061_vm2, %v1063_v0, %v1059_v19  ;;  %vm1127_vm5 = vmor %vm1125_vm4, %vm1126_vm3 }
0x1062   :  { %v1122_v61 = vsub.f32 1.0, %v1121_v13  ;;  %v1078_v29 = vsub.f32 1.0, %v1064_v4  ;;  %v1084_v31 = vmul.f32 %v1064_v4, %v1696_v41 }
0x1064   :  { %v1123_v6 = vmul.f32 %v1320_v12, %v1122_v61 }
0x1066   :  { %v1124_v1 = vadd.f32 %v1320_v12, %v1123_v6 }
0x1068   :  { %v1128_v5 = vsel %vm1127_vm5, %v1320_v12, %v1124_v1 }
0x1069   :  { %v1133_v8 = vsel %vm1130_vm6, %v1132_v20, %v1128_v5 }
0x106a   :  { %v1147_v34 = vsub.f32 1.0, %v1133_v8  ;;  %v1153_v36 = vmul.f32 %v1133_v8, %v1701_v46 }
0x10a0   :  { %v1069_v2 = vpop.permute.xlu1 %1068 }
0x10a1   :  { %v1071_v7 = vmul.f32 %v1069_v2, %v1064_v4 }
0x10a3   :  { %1073 = vrot.lane.b32.xlu0 %v1071_v7, %s1325_s15 }
0x10a8   :  { %v1138_v21 = vpop.permute.xlu2 %1137 }
0x10a9   :  { %v1140_v22 = vmul.f32 %v1138_v21, %v1133_v8 }
0x10ab   :  { %1142 = vrot.lane.b32.xlu1 %v1140_v22, %s1325_s15 }
0x1115   :  { %v1074_v23 = vpop.permute.xlu0 %1073 }
0x1116   :  { %v1076_v24 = vadd.f32 %v1217_v54, %v1074_v23 }
0x1118   :  { %1321 = vtanh.f32 %v1076_v24 }
0x111d   :  { %v1143_v25 = vpop.permute.xlu1 %1142 }
0x111e   :  { %v1322_v26 = vpop.eup %1321  ;;  %v1145_v27 = vadd.f32 %v1143_v25, %v1092_v56 }
0x111f   :  { %1080 = vrot.lane.b32.xlu2 %v1322_v26, %s1327_s18 }
0x1120   :  { %1323 = vtanh.f32 %v1145_v27 }
0x1126   :  { %v1324_v28 = vpop.eup %1323 }
0x1127   :  { %1149 = vrot.lane.b32.xlu0 %v1324_v28, %s1327_s18 }
0x1179   :  { %v1081_v30 = vpop.permute.xlu2 %1080 }
0x117a   :  { %v1083_v32 = vmul.f32 %v1081_v30, %v1078_v29 }
0x117c   :  { %v1085_v33 = vadd.f32 %v1084_v31, %v1083_v32 }
0x117e   :  { %1087 = vrot.lane.b32.xlu1 %v1085_v33, %s1327_s18 }
0x1199   :  { %v1150_v35 = vpop.permute.xlu0 %1149 }
0x119a   :  { %v1152_v37 = vmul.f32 %v1150_v35, %v1147_v34 }
0x119c   :  { %v1154_v38 = vadd.f32 %v1153_v36, %v1152_v37 }
0x119e   :  { %1156 = vrot.lane.b32.xlu2 %v1154_v38, %s1327_s18 }
0x11f0   :  { %v1088_v39 = vpop.permute.xlu1 %1087 }
0x11f1   :  { %1220 = vst.msk [vmem:[%s1747_s6 + $0xe] sm:$0x3] %vm109_vm8, %v1088_v39 }
0x11f8   :  { %v1157_v40 = vpop.permute.xlu2 %1156 }
0x11f9   :  { %1223 = vst.msk [vmem:[%s1747_s6 + $0x10] sm:$0x3] %vm109_vm8, %v1157_v40 }

</bundles_post_ra>
